<compile_context>
chip_gen: v7x
topology: tpu7x:2x2x1
jax: 0.10.0
libtpu: 0.0.40
codegen_flags: <defaults>
</compile_context>

<pallas_src>
import functools
import math

import jax
import jax.numpy as jnp
from jax.experimental import pallas as pl
from jax.experimental.pallas import tpu as pltpu

VMEM = pltpu.MemorySpace.VMEM
SMEM = pltpu.MemorySpace.SMEM


# ------------------------------ helpers --------------------------------------
def _lstm_cell_from_gates(gates, c_prev, H):
    """PyTorch LSTM cell update from pre-activation gates (i, f, g, o order).

    Single-tanh trick: sigmoid(x) = 0.5*(1 + tanh(x/2)), so one tanh pass over
    the full (B, 4H) tensor serves both the sigmoid lanes (i, f, o) and the
    tanh lanes (g).  Lane selection uses a broadcasted iota mask.
    """
    lane = jax.lax.broadcasted_iota(jnp.int32, gates.shape, 1)
    is_g = jnp.logical_and(lane >= 2 * H, lane < 3 * H)
    z = jnp.where(is_g, gates, 0.5 * gates)
    th = jnp.tanh(z)
    act = jnp.where(is_g, th, 0.5 * th + 0.5)
    i = act[:, 0:H]
    f = act[:, H:2 * H]
    g = act[:, 2 * H:3 * H]
    o = act[:, 3 * H:4 * H]
    c_new = f * c_prev + i * g
    h_new = o * jnp.tanh(c_new)
    return h_new, c_new


def _argmax_lanes(x):
    """First-occurrence argmax over the last (lane) axis; returns (rows, 1) int32."""
    lane = jax.lax.broadcasted_iota(jnp.int32, x.shape, x.ndim - 1)
    mx = jnp.max(x, axis=-1, keepdims=True)
    sentinel = jnp.int32(x.shape[-1])
    return jnp.min(jnp.where(x >= mx, lane, sentinel), axis=-1, keepdims=True)


# --------------------------- fused TSPNet kernel ------------------------------
def tspnet_kernel(num_heads, train,
                  seed_ref,
                  x_ref, w1_ref, b1_ref,
                  ewih_ref, ewhh_ref, eb_ref,
                  dw_ref, db_ref,
                  wq_ref, bq_ref, wk_ref, bk_ref,
                  outs_ref, acts_ref,
                  enc_ref, gx_ref, kc_ref, h_ref, c_ref,
                  xstar_ref, mask_ref, first_ref, xh_ref):
    B, L, D = x_ref.shape
    H = w1_ref.shape[1]
    NLe = ewih_ref.shape[0]
    NLd = dw_ref.shape[0]
    T = outs_ref.shape[0]                 # L + 1 decode steps
    LP = outs_ref.shape[2]                # lane-dense padded L
    TP = acts_ref.shape[1]                # lane-dense padded T
    hd = H // num_heads
    scale = 1.0 / math.sqrt(hd)
    f32 = jnp.float32

    # =================== Encoder: fc1 + stacked LSTM =========================
    flat = (jnp.dot(x_ref[...].reshape(B * L, D), w1_ref[...],
                    preferred_element_type=f32) + b1_ref[...])
    for layer in range(NLe):
        # Hoisted input->gates matmul for the whole sequence (one MXU slab),
        # staged in a VMEM scratch so the time loop carries only (h, c).
        gx_ref[...] = (jnp.dot(flat, ewih_ref[layer],
                               preferred_element_type=f32)
                       + eb_ref[layer]).reshape(B, L, 4 * H)
        whh = ewhh_ref[layer]             # (H, 4H)

        def tstep(t, carry, whh=whh):
            h, c = carry
            gates = (gx_ref[:, pl.ds(t, 1), :].reshape(B, 4 * H)
                     + jnp.dot(h, whh, preferred_element_type=f32))
            h, c = _lstm_cell_from_gates(gates, c, H)
            enc_ref[:, pl.ds(t, 1), :] = h.reshape(B, 1, H)
            return (h, c)

        jax.lax.fori_loop(0, L, tstep,
                          (jnp.zeros((B, H), f32), jnp.zeros((B, H), f32)),
                          unroll=(L <= 32))
        # TODO(synk): inter-layer LSTM dropout (p=0.3) is identity (eval mode).
        if layer + 1 < NLe:
            flat = enc_ref[...].reshape(B * L, H)

    # =================== Decode init (straight-line, once) ===================
    k_all = (jnp.dot(enc_ref[...].reshape(B * L, H), wk_ref[...],
                     preferred_element_type=f32) + bk_ref[...])
    kc_ref[...] = k_all.reshape(B, L, H)            # cached K = enc @ Wk + bk
    h_ref[...] = jnp.zeros(h_ref.shape, f32)
    c_ref[...] = jnp.zeros(c_ref.shape, f32)
    xstar_ref[...] = jnp.zeros(xstar_ref.shape, f32)  # start token = zeros
    mask_ref[...] = jnp.zeros(mask_ref.shape, f32)
    first_ref[...] = jnp.zeros(first_ref.shape, f32)
    acts_ref[...] = jnp.zeros(acts_ref.shape, jnp.int32)
    if train:
        pltpu.prng_seed(seed_ref[0])

    # Loop-invariant iotas hoisted out of the decode loop.
    lane_L = jax.lax.broadcasted_iota(jnp.int32, (B, L), 1)
    lane_T = jax.lax.broadcasted_iota(jnp.int32, (B, TP), 1)

    # =================== Autoregressive decode loop ==========================
    @pl.loop(0, T)
    def _decode_step(t):
        mask = mask_ref[...]                                 # 1.0 = ignore
        # Final (return) step: drop the FIRST chosen city from the ignore mask
        # (torch: indices_to_ignore = indices_to_ignore[:, 1:]).
        mask_used = jnp.where(t == T - 1, mask * (1.0 - first_ref[...]), mask)

        # ---- 3-layer LSTM, one time step (dropout identity in eval) --------
        x = xstar_ref[...]
        for layer in range(NLd):
            xh_ref[:, 0:H] = x                               # [x | h] staging
            xh_ref[:, H:2 * H] = h_ref[layer]
            gates = (jnp.dot(xh_ref[...], dw_ref[layer],
                             preferred_element_type=f32) + db_ref[layer])
            h_new, c_new = _lstm_cell_from_gates(gates, c_ref[layer], H)
            h_ref[layer] = h_new
            c_ref[layer] = c_new
            x = h_new
        y = x                                                # (B, H)

        # ---- multi-head attention weights (V never needed) -----------------
        q = (jnp.dot(y, wq_ref[...], preferred_element_type=f32)
             + bq_ref[...]) * scale                          # (B, H)
        k = kc_ref[...]                                      # (B, L, H)
        attn = jnp.zeros((B, L), f32)
        for hh in range(num_heads):
            qh = q[:, hh * hd:(hh + 1) * hd][:, None, :]     # (B, 1, hd)
            kh = k[:, :, hh * hd:(hh + 1) * hd]              # (B, L, hd)
            s = jnp.einsum('bqd,bkd->bqk', qh, kh,
                           preferred_element_type=f32)[:, 0, :]
            s = jnp.where(mask_used > 0.5, -1e30, s)         # finite, NaN-safe
            s = s - jnp.max(s, axis=-1, keepdims=True)
            p = jnp.exp(s)
            p = p * pl.reciprocal(jnp.sum(p, axis=-1, keepdims=True),
                                  approx=True)
            attn = attn + p
        attn = attn * (1.0 / num_heads)                      # avg over heads
        # TSPNet post-processing: clamp(min=1e-9) then EXACT renormalization.
        attn = jnp.maximum(attn, 1e-9)
        attn = attn / jnp.sum(attn, axis=-1, keepdims=True)

        # ---- choose the next city in-kernel ---------------------------------
        if train:
            # TODO(synk): torch.multinomial's RNG stream cannot be reproduced;
            # equivalent categorical sampling via Gumbel-max with the TPU PRNG.
            BP = max(8, pl.cdiv(B, 8) * 8)
            LPAD = max(128, pl.cdiv(L, 128) * 128)
            bits = pltpu.prng_random_bits((BP, LPAD))[:B, :L]
            u = (bits & 0x7FFFFF).astype(f32) * (1.0 / float(1 << 23))
            u = jnp.clip(u, 1e-7, 1.0 - 1e-7)
            gumbel = -jnp.log(-jnp.log(u))
            idx = _argmax_lanes(jnp.log(attn) + gumbel)      # (B, 1) int32
        else:
            idx = _argmax_lanes(attn)                        # (B, 1) int32

        onehot = (lane_L == idx).astype(f32)                 # (B, L)
        first_ref[...] = jnp.where(t == 0, onehot, first_ref[...])
        mask_ref[...] = jnp.maximum(mask, onehot)            # incremental mask
        # x_star <- enc[b, idx_b, :] via a one-hot MXU contraction (no gather).
        xstar_ref[...] = jnp.einsum('bqk,bkd->bqd', onehot[:, None, :],
                                    enc_ref[...],
                                    preferred_element_type=f32)[:, 0, :]

        # ---- outputs: lane-dense attn row + packed action indices ----------
        if LP > L:
            row = jnp.concatenate([attn, jnp.zeros((B, LP - L), f32)], axis=-1)
        else:
            row = attn
        outs_ref[pl.ds(t, 1), :, :] = row.reshape(1, B, LP)
        acts_ref[...] = jnp.where(lane_T == t,
                                  jnp.broadcast_to(idx, (B, TP)),
                                  acts_ref[...])


# ------------------------------- wrapper --------------------------------------
def tspnet_forward(params, X, num_heads, mode="eval_greedy", key=None):
    """Returns (outs (B, L+1, L), action_indices (B, L+1, 1))."""
    if mode == "train":
        train = True
        if key is None:
            key = jax.random.PRNGKey(0)
        seed = jax.random.randint(key, (1,), 0, jnp.iinfo(jnp.int32).max,
                                  dtype=jnp.int32)
    elif mode == "eval_greedy":
        train = False
        seed = jnp.zeros((1,), jnp.int32)
    else:
        raise ValueError("wrong mode")

    B, L, D = X.shape
    H = params["fc1_w"].shape[1]
    assert H % num_heads == 0
    T = L + 1
    LP = pl.cdiv(L, 128) * 128           # lane-dense padded attn row width
    TP = pl.cdiv(T, 128) * 128           # lane-dense padded action row width
    NLd = params["dec_wih"].shape[0]

    # Prefuse decoder weights/biases:  gates = [x | h] @ [Wih^T ; Whh^T] + b.
    dec_w = jnp.concatenate([params["dec_wih"], params["dec_whh"]], axis=1)
    dec_b = params["dec_bih"] + params["dec_bhh"]
    enc_b = params["enc_bih"] + params["enc_bhh"]

    kern = functools.partial(tspnet_kernel, num_heads, train)
    outs_p, acts = pl.pallas_call(
        kern,
        out_shape=(jax.ShapeDtypeStruct((T, B, LP), jnp.float32),
                   jax.ShapeDtypeStruct((B, TP), jnp.int32)),
        in_specs=[pl.BlockSpec(memory_space=SMEM)]         # RNG seed
                 + [pl.BlockSpec(memory_space=VMEM)] * 12,
        out_specs=(pl.BlockSpec(memory_space=VMEM),
                   pl.BlockSpec(memory_space=VMEM)),
        scratch_shapes=[
            pltpu.VMEM((B, L, H), jnp.float32),       # encoder output enc
            pltpu.VMEM((B, L, 4 * H), jnp.float32),   # hoisted gx slab
            pltpu.VMEM((B, L, H), jnp.float32),       # cached K = enc@Wk + bk
            pltpu.VMEM((NLd, B, H), jnp.float32),     # decoder h state
            pltpu.VMEM((NLd, B, H), jnp.float32),     # decoder c state
            pltpu.VMEM((B, H), jnp.float32),          # x_star
            pltpu.VMEM((B, L), jnp.float32),          # running ignore mask
            pltpu.VMEM((B, L), jnp.float32),          # one-hot first action
            pltpu.VMEM((B, 2 * H), jnp.float32),      # [x | h] staging buffer
        ],
    )(seed, X, params["fc1_w"], params["fc1_b"],
      params["enc_wih"], params["enc_whh"], enc_b,
      dec_w, dec_b,
      params["attn_wq"], params["attn_bq"], params["attn_wk"],
      params["attn_bk"])

    outs = jnp.transpose(outs_p[:, :, :L], (1, 0, 2))              # (B, T, L)
    action_indices = acts[:, :T].astype(jnp.float32)[:, :, None]   # (B, T, 1)
    return outs, action_indices


# ------------------------------- params ---------------------------------------
def init_params(key, input_dim, hidden_dim, num_layers_enc, num_layers_dec):
    H = hidden_dim
    keys = iter(jax.random.split(key, 16))

    def u(shape, k_scale):
        return jax.random.uniform(next(keys), shape, jnp.float32, -k_scale, k_scale)

    k_lin = 1.0 / math.sqrt(input_dim)
    k_h = 1.0 / math.sqrt(H)
    return {
        # Encoder: Linear(input_dim, H) + LSTM(H, H, num_layers_enc)
        "fc1_w":  u((input_dim, H), k_lin),              # stored transposed (in, out)
        "fc1_b":  u((1, H), k_lin),
        "enc_wih": u((num_layers_enc, H, 4 * H), k_h),   # W_ih^T per layer
        "enc_whh": u((num_layers_enc, H, 4 * H), k_h),   # W_hh^T per layer
        "enc_bih": u((num_layers_enc, 4 * H), k_h),
        "enc_bhh": u((num_layers_enc, 4 * H), k_h),
        # Decoder LSTM(H, H, num_layers_dec)
        "dec_wih": u((num_layers_dec, H, 4 * H), k_h),
        "dec_whh": u((num_layers_dec, H, 4 * H), k_h),
        "dec_bih": u((num_layers_dec, 4 * H), k_h),
        "dec_bhh": u((num_layers_dec, 4 * H), k_h),
        # MultiheadAttention in_proj (only Q/K needed; biases init to 0 as in torch)
        "attn_wq": u((H, H), k_h),                       # Wq^T
        "attn_bq": jnp.zeros((1, H), jnp.float32),
        "attn_wk": u((H, H), k_h),                       # Wk^T
        "attn_bk": jnp.zeros((1, H), jnp.float32),
    }


if __name__ == "__main__":
    key = jax.random.PRNGKey(0)
    k_param, k_x = jax.random.split(key)

    B, L, D, H = 2, 8, 2, 32            # batch, num_cities, coord_dim, hidden_dim
    NL_ENC = NL_DEC = 3
    NUM_HEADS = 2

    params = init_params(k_param, D, H, NL_ENC, NL_DEC)
    X = jax.random.normal(k_x, (B, L, D), jnp.float32)

    fwd = jax.jit(functools.partial(tspnet_forward, num_heads=NUM_HEADS,
                                    mode="eval_greedy"))
    outs, action_indices = fwd(params, X)
    jax.block_until_ready((outs, action_indices))

    assert outs.shape == (B, L + 1, L)
    assert action_indices.shape == (B, L + 1, 1)
    assert bool(jnp.all(jnp.isfinite(outs)))
    # Each policy row is a probability distribution.
    assert bool(jnp.all(jnp.abs(jnp.sum(outs, axis=-1) - 1.0) < 1e-4))
    acts = action_indices[:, :, 0].astype(jnp.int32)
    # Greedy decode visits every city exactly once, then returns to the start.
    assert bool(jnp.all(jnp.sort(acts[:, :L], axis=1)
                        == jnp.arange(L, dtype=jnp.int32)[None, :]))
    assert bool(jnp.all(acts[:, L] == acts[:, 0]))
    print("KERNEL_OK")
</pallas_src>

<mosaic_0001>
module attributes {stable_mosaic.version = 11 : i64} {
  func.func @tspnet_kernel(%arg0: memref<1xi32, #tpu.memory_space<smem>>, %arg1: memref<2x8x2xf32, #tpu.memory_space<vmem>>, %arg2: memref<2x32xf32, #tpu.memory_space<vmem>>, %arg3: memref<1x32xf32, #tpu.memory_space<vmem>>, %arg4: memref<3x32x128xf32, #tpu.memory_space<vmem>>, %arg5: memref<3x32x128xf32, #tpu.memory_space<vmem>>, %arg6: memref<3x128xf32, #tpu.memory_space<vmem>>, %arg7: memref<3x64x128xf32, #tpu.memory_space<vmem>>, %arg8: memref<3x128xf32, #tpu.memory_space<vmem>>, %arg9: memref<32x32xf32, #tpu.memory_space<vmem>>, %arg10: memref<1x32xf32, #tpu.memory_space<vmem>>, %arg11: memref<32x32xf32, #tpu.memory_space<vmem>>, %arg12: memref<1x32xf32, #tpu.memory_space<vmem>>, %arg13: memref<9x2x128xf32, #tpu.memory_space<vmem>>, %arg14: memref<2x128xi32, #tpu.memory_space<vmem>>, %arg15: memref<2x8x32xf32, #tpu.memory_space<vmem>>, %arg16: memref<2x8x128xf32, #tpu.memory_space<vmem>>, %arg17: memref<2x8x32xf32, #tpu.memory_space<vmem>>, %arg18: memref<3x2x32xf32, #tpu.memory_space<vmem>>, %arg19: memref<3x2x32xf32, #tpu.memory_space<vmem>>, %arg20: memref<2x32xf32, #tpu.memory_space<vmem>>, %arg21: memref<2x8xf32, #tpu.memory_space<vmem>>, %arg22: memref<2x8xf32, #tpu.memory_space<vmem>>, %arg23: memref<2x64xf32, #tpu.memory_space<vmem>>) attributes {dimension_semantics = [], scalar_prefetch = 0 : i64, scratch_operands = 9 : i64, tpu.core_type = #tpu.core_type<tc>} {
    %c0 = arith.constant 0 : index
    %c0_0 = arith.constant 0 : index
    %c0_1 = arith.constant 0 : index
    %0 = vector.load %arg1[%c0, %c0_0, %c0_1] : memref<2x8x2xf32, #tpu.memory_space<vmem>>, vector<2x8x2xf32>
    %1 = vector.shape_cast %0 : vector<2x8x2xf32> to vector<16x2xf32>
    %c0_2 = arith.constant 0 : index
    %c0_3 = arith.constant 0 : index
    %2 = vector.load %arg2[%c0_2, %c0_3] : memref<2x32xf32, #tpu.memory_space<vmem>>, vector<2x32xf32>
    %cst = arith.constant dense<0.000000e+00> : vector<16x32xf32>
    %3 = tpu.matmul %1, %2, %cst {dimension_numbers = #tpu.dot_dimension_numbers<[1], [0], [0], [1], [0, 0, 1, 1], [], []>} : vector<16x2xf32>, vector<2x32xf32>, vector<16x32xf32> -> vector<16x32xf32>
    %c0_4 = arith.constant 0 : index
    %c0_5 = arith.constant 0 : index
    %4 = vector.load %arg3[%c0_4, %c0_5] : memref<1x32xf32, #tpu.memory_space<vmem>>, vector<1x32xf32>
    %5 = vector.broadcast %4 : vector<1x32xf32> to vector<16x32xf32>
    %6 = arith.addf %3, %5 : vector<16x32xf32>
    %c0_6 = arith.constant 0 : index
    %c0_7 = arith.constant 0 : index
    %c0_8 = arith.constant 0 : index
    %7 = vector.load %arg4[%c0_6, %c0_7, %c0_8] : memref<3x32x128xf32, #tpu.memory_space<vmem>>, vector<1x32x128xf32>
    %8 = vector.shape_cast %7 : vector<1x32x128xf32> to vector<32x128xf32>
    %cst_9 = arith.constant dense<0.000000e+00> : vector<16x128xf32>
    %9 = tpu.matmul %6, %8, %cst_9 {dimension_numbers = #tpu.dot_dimension_numbers<[1], [0], [0], [1], [0, 0, 1, 1], [], []>} : vector<16x32xf32>, vector<32x128xf32>, vector<16x128xf32> -> vector<16x128xf32>
    %c0_10 = arith.constant 0 : index
    %c0_11 = arith.constant 0 : index
    %10 = vector.load %arg6[%c0_10, %c0_11] : memref<3x128xf32, #tpu.memory_space<vmem>>, vector<1x128xf32>
    %11 = vector.shape_cast %10 : vector<1x128xf32> to vector<128xf32>
    %12 = vector.shape_cast %11 : vector<128xf32> to vector<1x128xf32>
    %13 = vector.broadcast %12 : vector<1x128xf32> to vector<16x128xf32>
    %14 = arith.addf %9, %13 : vector<16x128xf32>
    %15 = vector.shape_cast %14 : vector<16x128xf32> to vector<2x8x128xf32>
    %c0_12 = arith.constant 0 : index
    %c0_13 = arith.constant 0 : index
    %c0_14 = arith.constant 0 : index
    %16 = vector.load %arg16[%c0_12, %c0_13, %c0_14] : memref<2x8x128xf32, #tpu.memory_space<vmem>>, vector<2x8x128xf32>
    tpu.vector_store %arg16[%c0_12, %c0_13, %c0_14], %15 {strides = array<i32>} : memref<2x8x128xf32, #tpu.memory_space<vmem>>, vector<2x8x128xf32>,
    %c0_15 = arith.constant 0 : index
    %c0_16 = arith.constant 0 : index
    %c0_17 = arith.constant 0 : index
    %17 = vector.load %arg5[%c0_15, %c0_16, %c0_17] : memref<3x32x128xf32, #tpu.memory_space<vmem>>, vector<1x32x128xf32>
    %18 = vector.shape_cast %17 : vector<1x32x128xf32> to vector<32x128xf32>
    %cst_18 = arith.constant 0.000000e+00 : f32
    %19 = vector.broadcast %cst_18 : f32 to vector<2x32xf32>
    %cst_19 = arith.constant 0.000000e+00 : f32
    %20 = vector.broadcast %cst_19 : f32 to vector<2x32xf32>
    %c0_i32 = arith.constant 0 : i32
    %c0_20 = arith.constant 0 : index
    %21 = arith.index_cast %c0_i32 : i32 to index
    %c0_21 = arith.constant 0 : index
    %22 = vector.load %arg16[%c0_20, %21, %c0_21] : memref<2x8x128xf32, #tpu.memory_space<vmem>>, vector<2x1x128xf32>
    %23 = vector.shape_cast %22 : vector<2x1x128xf32> to vector<2x128xf32>
    %cst_22 = arith.constant dense<0.000000e+00> : vector<2x128xf32>
    %24 = tpu.matmul %19, %18, %cst_22 {dimension_numbers = #tpu.dot_dimension_numbers<[1], [0], [0], [1], [0, 0, 1, 1], [], []>} : vector<2x32xf32>, vector<32x128xf32>, vector<2x128xf32> -> vector<2x128xf32>
    %25 = arith.addf %23, %24 : vector<2x128xf32>
    %26 = tpu.iota {dimensions = array<i32: 1>} : vector<2x128xi32>
    %c64_i32 = arith.constant 64 : i32
    %27 = vector.broadcast %c64_i32 : i32 to vector<2x128xi32>
    %28 = arith.cmpi sge, %26, %27 : vector<2x128xi32>
    %c96_i32 = arith.constant 96 : i32
    %29 = vector.broadcast %c96_i32 : i32 to vector<2x128xi32>
    %30 = arith.cmpi slt, %26, %29 : vector<2x128xi32>
    %31 = arith.andi %28, %30 : vector<2x128xi1>
    %cst_23 = arith.constant 5.000000e-01 : f32
    %32 = vector.broadcast %cst_23 : f32 to vector<2x128xf32>
    %33 = arith.mulf %32, %25 : vector<2x128xf32>
    %34 = arith.select %31, %25, %33 : vector<2x128xi1>, vector<2x128xf32>
    %35 = math.tanh %34 : vector<2x128xf32>
    %cst_24 = arith.constant 5.000000e-01 : f32
    %36 = vector.broadcast %cst_24 : f32 to vector<2x128xf32>
    %37 = arith.mulf %36, %35 : vector<2x128xf32>
    %cst_25 = arith.constant 5.000000e-01 : f32
    %38 = vector.broadcast %cst_25 : f32 to vector<2x128xf32>
    %39 = arith.addf %37, %38 : vector<2x128xf32>
    %40 = arith.select %31, %35, %39 : vector<2x128xi1>, vector<2x128xf32>
    %41 = vector.extract_strided_slice %40 {offsets = [0, 0], sizes = [2, 32], strides = [1, 1]} : vector<2x128xf32> to vector<2x32xf32>
    %42 = vector.extract_strided_slice %40 {offsets = [0, 32], sizes = [2, 32], strides = [1, 1]} : vector<2x128xf32> to vector<2x32xf32>
    %43 = vector.extract_strided_slice %40 {offsets = [0, 64], sizes = [2, 32], strides = [1, 1]} : vector<2x128xf32> to vector<2x32xf32>
    %44 = vector.extract_strided_slice %40 {offsets = [0, 96], sizes = [2, 32], strides = [1, 1]} : vector<2x128xf32> to vector<2x32xf32>
    %45 = arith.mulf %42, %20 : vector<2x32xf32>
    %46 = arith.mulf %41, %43 : vector<2x32xf32>
    %47 = arith.addf %45, %46 : vector<2x32xf32>
    %48 = math.tanh %47 : vector<2x32xf32>
    %49 = arith.mulf %44, %48 : vector<2x32xf32>
    %50 = vector.shape_cast %49 : vector<2x32xf32> to vector<2x1x32xf32>
    %c0_26 = arith.constant 0 : index
    %51 = arith.index_cast %c0_i32 : i32 to index
    %c0_27 = arith.constant 0 : index
    %52 = vector.load %arg15[%c0_26, %51, %c0_27] : memref<2x8x32xf32, #tpu.memory_space<vmem>>, vector<2x1x32xf32>
    tpu.vector_store %arg15[%c0_26, %51, %c0_27], %50 {strides = array<i32>} : memref<2x8x32xf32, #tpu.memory_space<vmem>>, vector<2x1x32xf32>,
    %c1_i32 = arith.constant 1 : i32
    %c0_28 = arith.constant 0 : index
    %53 = arith.index_cast %c1_i32 : i32 to index
    %c0_29 = arith.constant 0 : index
    %54 = vector.load %arg16[%c0_28, %53, %c0_29] : memref<2x8x128xf32, #tpu.memory_space<vmem>>, vector<2x1x128xf32>
    %55 = vector.shape_cast %54 : vector<2x1x128xf32> to vector<2x128xf32>
    %cst_30 = arith.constant dense<0.000000e+00> : vector<2x128xf32>
    %56 = tpu.matmul %49, %18, %cst_30 {dimension_numbers = #tpu.dot_dimension_numbers<[1], [0], [0], [1], [0, 0, 1, 1], [], []>} : vector<2x32xf32>, vector<32x128xf32>, vector<2x128xf32> -> vector<2x128xf32>
    %57 = arith.addf %55, %56 : vector<2x128xf32>
    %58 = tpu.iota {dimensions = array<i32: 1>} : vector<2x128xi32>
    %c64_i32_31 = arith.constant 64 : i32
    %59 = vector.broadcast %c64_i32_31 : i32 to vector<2x128xi32>
    %60 = arith.cmpi sge, %58, %59 : vector<2x128xi32>
    %c96_i32_32 = arith.constant 96 : i32
    %61 = vector.broadcast %c96_i32_32 : i32 to vector<2x128xi32>
    %62 = arith.cmpi slt, %58, %61 : vector<2x128xi32>
    %63 = arith.andi %60, %62 : vector<2x128xi1>
    %cst_33 = arith.constant 5.000000e-01 : f32
    %64 = vector.broadcast %cst_33 : f32 to vector<2x128xf32>
    %65 = arith.mulf %64, %57 : vector<2x128xf32>
    %66 = arith.select %63, %57, %65 : vector<2x128xi1>, vector<2x128xf32>
    %67 = math.tanh %66 : vector<2x128xf32>
    %cst_34 = arith.constant 5.000000e-01 : f32
    %68 = vector.broadcast %cst_34 : f32 to vector<2x128xf32>
    %69 = arith.mulf %68, %67 : vector<2x128xf32>
    %cst_35 = arith.constant 5.000000e-01 : f32
    %70 = vector.broadcast %cst_35 : f32 to vector<2x128xf32>
    %71 = arith.addf %69, %70 : vector<2x128xf32>
    %72 = arith.select %63, %67, %71 : vector<2x128xi1>, vector<2x128xf32>
    %73 = vector.extract_strided_slice %72 {offsets = [0, 0], sizes = [2, 32], strides = [1, 1]} : vector<2x128xf32> to vector<2x32xf32>
    %74 = vector.extract_strided_slice %72 {offsets = [0, 32], sizes = [2, 32], strides = [1, 1]} : vector<2x128xf32> to vector<2x32xf32>
    %75 = vector.extract_strided_slice %72 {offsets = [0, 64], sizes = [2, 32], strides = [1, 1]} : vector<2x128xf32> to vector<2x32xf32>
    %76 = vector.extract_strided_slice %72 {offsets = [0, 96], sizes = [2, 32], strides = [1, 1]} : vector<2x128xf32> to vector<2x32xf32>
    %77 = arith.mulf %74, %47 : vector<2x32xf32>
    %78 = arith.mulf %73, %75 : vector<2x32xf32>
    %79 = arith.addf %77, %78 : vector<2x32xf32>
    %80 = math.tanh %79 : vector<2x32xf32>
    %81 = arith.mulf %76, %80 : vector<2x32xf32>
    %82 = vector.shape_cast %81 : vector<2x32xf32> to vector<2x1x32xf32>
    %c0_36 = arith.constant 0 : index
    %83 = arith.index_cast %c1_i32 : i32 to index
    %c0_37 = arith.constant 0 : index
    %84 = vector.load %arg15[%c0_36, %83, %c0_37] : memref<2x8x32xf32, #tpu.memory_space<vmem>>, vector<2x1x32xf32>
    tpu.vector_store %arg15[%c0_36, %83, %c0_37], %82 {strides = array<i32>} : memref<2x8x32xf32, #tpu.memory_space<vmem>>, vector<2x1x32xf32>,
    %c2_i32 = arith.constant 2 : i32
    %c0_38 = arith.constant 0 : index
    %85 = arith.index_cast %c2_i32 : i32 to index
    %c0_39 = arith.constant 0 : index
    %86 = vector.load %arg16[%c0_38, %85, %c0_39] : memref<2x8x128xf32, #tpu.memory_space<vmem>>, vector<2x1x128xf32>
    %87 = vector.shape_cast %86 : vector<2x1x128xf32> to vector<2x128xf32>
    %cst_40 = arith.constant dense<0.000000e+00> : vector<2x128xf32>
    %88 = tpu.matmul %81, %18, %cst_40 {dimension_numbers = #tpu.dot_dimension_numbers<[1], [0], [0], [1], [0, 0, 1, 1], [], []>} : vector<2x32xf32>, vector<32x128xf32>, vector<2x128xf32> -> vector<2x128xf32>
    %89 = arith.addf %87, %88 : vector<2x128xf32>
    %90 = tpu.iota {dimensions = array<i32: 1>} : vector<2x128xi32>
    %c64_i32_41 = arith.constant 64 : i32
    %91 = vector.broadcast %c64_i32_41 : i32 to vector<2x128xi32>
    %92 = arith.cmpi sge, %90, %91 : vector<2x128xi32>
    %c96_i32_42 = arith.constant 96 : i32
    %93 = vector.broadcast %c96_i32_42 : i32 to vector<2x128xi32>
    %94 = arith.cmpi slt, %90, %93 : vector<2x128xi32>
    %95 = arith.andi %92, %94 : vector<2x128xi1>
    %cst_43 = arith.constant 5.000000e-01 : f32
    %96 = vector.broadcast %cst_43 : f32 to vector<2x128xf32>
    %97 = arith.mulf %96, %89 : vector<2x128xf32>
    %98 = arith.select %95, %89, %97 : vector<2x128xi1>, vector<2x128xf32>
    %99 = math.tanh %98 : vector<2x128xf32>
    %cst_44 = arith.constant 5.000000e-01 : f32
    %100 = vector.broadcast %cst_44 : f32 to vector<2x128xf32>
    %101 = arith.mulf %100, %99 : vector<2x128xf32>
    %cst_45 = arith.constant 5.000000e-01 : f32
    %102 = vector.broadcast %cst_45 : f32 to vector<2x128xf32>
    %103 = arith.addf %101, %102 : vector<2x128xf32>
    %104 = arith.select %95, %99, %103 : vector<2x128xi1>, vector<2x128xf32>
    %105 = vector.extract_strided_slice %104 {offsets = [0, 0], sizes = [2, 32], strides = [1, 1]} : vector<2x128xf32> to vector<2x32xf32>
    %106 = vector.extract_strided_slice %104 {offsets = [0, 32], sizes = [2, 32], strides = [1, 1]} : vector<2x128xf32> to vector<2x32xf32>
    %107 = vector.extract_strided_slice %104 {offsets = [0, 64], sizes = [2, 32], strides = [1, 1]} : vector<2x128xf32> to vector<2x32xf32>
    %108 = vector.extract_strided_slice %104 {offsets = [0, 96], sizes = [2, 32], strides = [1, 1]} : vector<2x128xf32> to vector<2x32xf32>
    %109 = arith.mulf %106, %79 : vector<2x32xf32>
    %110 = arith.mulf %105, %107 : vector<2x32xf32>
    %111 = arith.addf %109, %110 : vector<2x32xf32>
    %112 = math.tanh %111 : vector<2x32xf32>
    %113 = arith.mulf %108, %112 : vector<2x32xf32>
    %114 = vector.shape_cast %113 : vector<2x32xf32> to vector<2x1x32xf32>
    %c0_46 = arith.constant 0 : index
    %115 = arith.index_cast %c2_i32 : i32 to index
    %c0_47 = arith.constant 0 : index
    %116 = vector.load %arg15[%c0_46, %115, %c0_47] : memref<2x8x32xf32, #tpu.memory_space<vmem>>, vector<2x1x32xf32>
    tpu.vector_store %arg15[%c0_46, %115, %c0_47], %114 {strides = array<i32>} : memref<2x8x32xf32, #tpu.memory_space<vmem>>, vector<2x1x32xf32>,
    %c3_i32 = arith.constant 3 : i32
    %c0_48 = arith.constant 0 : index
    %117 = arith.index_cast %c3_i32 : i32 to index
    %c0_49 = arith.constant 0 : index
    %118 = vector.load %arg16[%c0_48, %117, %c0_49] : memref<2x8x128xf32, #tpu.memory_space<vmem>>, vector<2x1x128xf32>
    %119 = vector.shape_cast %118 : vector<2x1x128xf32> to vector<2x128xf32>
    %cst_50 = arith.constant dense<0.000000e+00> : vector<2x128xf32>
    %120 = tpu.matmul %113, %18, %cst_50 {dimension_numbers = #tpu.dot_dimension_numbers<[1], [0], [0], [1], [0, 0, 1, 1], [], []>} : vector<2x32xf32>, vector<32x128xf32>, vector<2x128xf32> -> vector<2x128xf32>
    %121 = arith.addf %119, %120 : vector<2x128xf32>
    %122 = tpu.iota {dimensions = array<i32: 1>} : vector<2x128xi32>
    %c64_i32_51 = arith.constant 64 : i32
    %123 = vector.broadcast %c64_i32_51 : i32 to vector<2x128xi32>
    %124 = arith.cmpi sge, %122, %123 : vector<2x128xi32>
    %c96_i32_52 = arith.constant 96 : i32
    %125 = vector.broadcast %c96_i32_52 : i32 to vector<2x128xi32>
    %126 = arith.cmpi slt, %122, %125 : vector<2x128xi32>
    %127 = arith.andi %124, %126 : vector<2x128xi1>
    %cst_53 = arith.constant 5.000000e-01 : f32
    %128 = vector.broadcast %cst_53 : f32 to vector<2x128xf32>
    %129 = arith.mulf %128, %121 : vector<2x128xf32>
    %130 = arith.select %127, %121, %129 : vector<2x128xi1>, vector<2x128xf32>
    %131 = math.tanh %130 : vector<2x128xf32>
    %cst_54 = arith.constant 5.000000e-01 : f32
    %132 = vector.broadcast %cst_54 : f32 to vector<2x128xf32>
    %133 = arith.mulf %132, %131 : vector<2x128xf32>
    %cst_55 = arith.constant 5.000000e-01 : f32
    %134 = vector.broadcast %cst_55 : f32 to vector<2x128xf32>
    %135 = arith.addf %133, %134 : vector<2x128xf32>
    %136 = arith.select %127, %131, %135 : vector<2x128xi1>, vector<2x128xf32>
    %137 = vector.extract_strided_slice %136 {offsets = [0, 0], sizes = [2, 32], strides = [1, 1]} : vector<2x128xf32> to vector<2x32xf32>
    %138 = vector.extract_strided_slice %136 {offsets = [0, 32], sizes = [2, 32], strides = [1, 1]} : vector<2x128xf32> to vector<2x32xf32>
    %139 = vector.extract_strided_slice %136 {offsets = [0, 64], sizes = [2, 32], strides = [1, 1]} : vector<2x128xf32> to vector<2x32xf32>
    %140 = vector.extract_strided_slice %136 {offsets = [0, 96], sizes = [2, 32], strides = [1, 1]} : vector<2x128xf32> to vector<2x32xf32>
    %141 = arith.mulf %138, %111 : vector<2x32xf32>
    %142 = arith.mulf %137, %139 : vector<2x32xf32>
    %143 = arith.addf %141, %142 : vector<2x32xf32>
    %144 = math.tanh %143 : vector<2x32xf32>
    %145 = arith.mulf %140, %144 : vector<2x32xf32>
    %146 = vector.shape_cast %145 : vector<2x32xf32> to vector<2x1x32xf32>
    %c0_56 = arith.constant 0 : index
    %147 = arith.index_cast %c3_i32 : i32 to index
    %c0_57 = arith.constant 0 : index
    %148 = vector.load %arg15[%c0_56, %147, %c0_57] : memref<2x8x32xf32, #tpu.memory_space<vmem>>, vector<2x1x32xf32>
    tpu.vector_store %arg15[%c0_56, %147, %c0_57], %146 {strides = array<i32>} : memref<2x8x32xf32, #tpu.memory_space<vmem>>, vector<2x1x32xf32>,
    %c4_i32 = arith.constant 4 : i32
    %c0_58 = arith.constant 0 : index
    %149 = arith.index_cast %c4_i32 : i32 to index
    %c0_59 = arith.constant 0 : index
    %150 = vector.load %arg16[%c0_58, %149, %c0_59] : memref<2x8x128xf32, #tpu.memory_space<vmem>>, vector<2x1x128xf32>
    %151 = vector.shape_cast %150 : vector<2x1x128xf32> to vector<2x128xf32>
    %cst_60 = arith.constant dense<0.000000e+00> : vector<2x128xf32>
    %152 = tpu.matmul %145, %18, %cst_60 {dimension_numbers = #tpu.dot_dimension_numbers<[1], [0], [0], [1], [0, 0, 1, 1], [], []>} : vector<2x32xf32>, vector<32x128xf32>, vector<2x128xf32> -> vector<2x128xf32>
    %153 = arith.addf %151, %152 : vector<2x128xf32>
    %154 = tpu.iota {dimensions = array<i32: 1>} : vector<2x128xi32>
    %c64_i32_61 = arith.constant 64 : i32
    %155 = vector.broadcast %c64_i32_61 : i32 to vector<2x128xi32>
    %156 = arith.cmpi sge, %154, %155 : vector<2x128xi32>
    %c96_i32_62 = arith.constant 96 : i32
    %157 = vector.broadcast %c96_i32_62 : i32 to vector<2x128xi32>
    %158 = arith.cmpi slt, %154, %157 : vector<2x128xi32>
    %159 = arith.andi %156, %158 : vector<2x128xi1>
    %cst_63 = arith.constant 5.000000e-01 : f32
    %160 = vector.broadcast %cst_63 : f32 to vector<2x128xf32>
    %161 = arith.mulf %160, %153 : vector<2x128xf32>
    %162 = arith.select %159, %153, %161 : vector<2x128xi1>, vector<2x128xf32>
    %163 = math.tanh %162 : vector<2x128xf32>
    %cst_64 = arith.constant 5.000000e-01 : f32
    %164 = vector.broadcast %cst_64 : f32 to vector<2x128xf32>
    %165 = arith.mulf %164, %163 : vector<2x128xf32>
    %cst_65 = arith.constant 5.000000e-01 : f32
    %166 = vector.broadcast %cst_65 : f32 to vector<2x128xf32>
    %167 = arith.addf %165, %166 : vector<2x128xf32>
    %168 = arith.select %159, %163, %167 : vector<2x128xi1>, vector<2x128xf32>
    %169 = vector.extract_strided_slice %168 {offsets = [0, 0], sizes = [2, 32], strides = [1, 1]} : vector<2x128xf32> to vector<2x32xf32>
    %170 = vector.extract_strided_slice %168 {offsets = [0, 32], sizes = [2, 32], strides = [1, 1]} : vector<2x128xf32> to vector<2x32xf32>
    %171 = vector.extract_strided_slice %168 {offsets = [0, 64], sizes = [2, 32], strides = [1, 1]} : vector<2x128xf32> to vector<2x32xf32>
    %172 = vector.extract_strided_slice %168 {offsets = [0, 96], sizes = [2, 32], strides = [1, 1]} : vector<2x128xf32> to vector<2x32xf32>
    %173 = arith.mulf %170, %143 : vector<2x32xf32>
    %174 = arith.mulf %169, %171 : vector<2x32xf32>
    %175 = arith.addf %173, %174 : vector<2x32xf32>
    %176 = math.tanh %175 : vector<2x32xf32>
    %177 = arith.mulf %172, %176 : vector<2x32xf32>
    %178 = vector.shape_cast %177 : vector<2x32xf32> to vector<2x1x32xf32>
    %c0_66 = arith.constant 0 : index
    %179 = arith.index_cast %c4_i32 : i32 to index
    %c0_67 = arith.constant 0 : index
    %180 = vector.load %arg15[%c0_66, %179, %c0_67] : memref<2x8x32xf32, #tpu.memory_space<vmem>>, vector<2x1x32xf32>
    tpu.vector_store %arg15[%c0_66, %179, %c0_67], %178 {strides = array<i32>} : memref<2x8x32xf32, #tpu.memory_space<vmem>>, vector<2x1x32xf32>,
    %c5_i32 = arith.constant 5 : i32
    %c0_68 = arith.constant 0 : index
    %181 = arith.index_cast %c5_i32 : i32 to index
    %c0_69 = arith.constant 0 : index
    %182 = vector.load %arg16[%c0_68, %181, %c0_69] : memref<2x8x128xf32, #tpu.memory_space<vmem>>, vector<2x1x128xf32>
    %183 = vector.shape_cast %182 : vector<2x1x128xf32> to vector<2x128xf32>
    %cst_70 = arith.constant dense<0.000000e+00> : vector<2x128xf32>
    %184 = tpu.matmul %177, %18, %cst_70 {dimension_numbers = #tpu.dot_dimension_numbers<[1], [0], [0], [1], [0, 0, 1, 1], [], []>} : vector<2x32xf32>, vector<32x128xf32>, vector<2x128xf32> -> vector<2x128xf32>
    %185 = arith.addf %183, %184 : vector<2x128xf32>
    %186 = tpu.iota {dimensions = array<i32: 1>} : vector<2x128xi32>
    %c64_i32_71 = arith.constant 64 : i32
    %187 = vector.broadcast %c64_i32_71 : i32 to vector<2x128xi32>
    %188 = arith.cmpi sge, %186, %187 : vector<2x128xi32>
    %c96_i32_72 = arith.constant 96 : i32
    %189 = vector.broadcast %c96_i32_72 : i32 to vector<2x128xi32>
    %190 = arith.cmpi slt, %186, %189 : vector<2x128xi32>
    %191 = arith.andi %188, %190 : vector<2x128xi1>
    %cst_73 = arith.constant 5.000000e-01 : f32
    %192 = vector.broadcast %cst_73 : f32 to vector<2x128xf32>
    %193 = arith.mulf %192, %185 : vector<2x128xf32>
    %194 = arith.select %191, %185, %193 : vector<2x128xi1>, vector<2x128xf32>
    %195 = math.tanh %194 : vector<2x128xf32>
    %cst_74 = arith.constant 5.000000e-01 : f32
    %196 = vector.broadcast %cst_74 : f32 to vector<2x128xf32>
    %197 = arith.mulf %196, %195 : vector<2x128xf32>
    %cst_75 = arith.constant 5.000000e-01 : f32
    %198 = vector.broadcast %cst_75 : f32 to vector<2x128xf32>
    %199 = arith.addf %197, %198 : vector<2x128xf32>
    %200 = arith.select %191, %195, %199 : vector<2x128xi1>, vector<2x128xf32>
    %201 = vector.extract_strided_slice %200 {offsets = [0, 0], sizes = [2, 32], strides = [1, 1]} : vector<2x128xf32> to vector<2x32xf32>
    %202 = vector.extract_strided_slice %200 {offsets = [0, 32], sizes = [2, 32], strides = [1, 1]} : vector<2x128xf32> to vector<2x32xf32>
    %203 = vector.extract_strided_slice %200 {offsets = [0, 64], sizes = [2, 32], strides = [1, 1]} : vector<2x128xf32> to vector<2x32xf32>
    %204 = vector.extract_strided_slice %200 {offsets = [0, 96], sizes = [2, 32], strides = [1, 1]} : vector<2x128xf32> to vector<2x32xf32>
    %205 = arith.mulf %202, %175 : vector<2x32xf32>
    %206 = arith.mulf %201, %203 : vector<2x32xf32>
    %207 = arith.addf %205, %206 : vector<2x32xf32>
    %208 = math.tanh %207 : vector<2x32xf32>
    %209 = arith.mulf %204, %208 : vector<2x32xf32>
    %210 = vector.shape_cast %209 : vector<2x32xf32> to vector<2x1x32xf32>
    %c0_76 = arith.constant 0 : index
    %211 = arith.index_cast %c5_i32 : i32 to index
    %c0_77 = arith.constant 0 : index
    %212 = vector.load %arg15[%c0_76, %211, %c0_77] : memref<2x8x32xf32, #tpu.memory_space<vmem>>, vector<2x1x32xf32>
    tpu.vector_store %arg15[%c0_76, %211, %c0_77], %210 {strides = array<i32>} : memref<2x8x32xf32, #tpu.memory_space<vmem>>, vector<2x1x32xf32>,
    %c6_i32 = arith.constant 6 : i32
    %c0_78 = arith.constant 0 : index
    %213 = arith.index_cast %c6_i32 : i32 to index
    %c0_79 = arith.constant 0 : index
    %214 = vector.load %arg16[%c0_78, %213, %c0_79] : memref<2x8x128xf32, #tpu.memory_space<vmem>>, vector<2x1x128xf32>
    %215 = vector.shape_cast %214 : vector<2x1x128xf32> to vector<2x128xf32>
    %cst_80 = arith.constant dense<0.000000e+00> : vector<2x128xf32>
    %216 = tpu.matmul %209, %18, %cst_80 {dimension_numbers = #tpu.dot_dimension_numbers<[1], [0], [0], [1], [0, 0, 1, 1], [], []>} : vector<2x32xf32>, vector<32x128xf32>, vector<2x128xf32> -> vector<2x128xf32>
    %217 = arith.addf %215, %216 : vector<2x128xf32>
    %218 = tpu.iota {dimensions = array<i32: 1>} : vector<2x128xi32>
    %c64_i32_81 = arith.constant 64 : i32
    %219 = vector.broadcast %c64_i32_81 : i32 to vector<2x128xi32>
    %220 = arith.cmpi sge, %218, %219 : vector<2x128xi32>
    %c96_i32_82 = arith.constant 96 : i32
    %221 = vector.broadcast %c96_i32_82 : i32 to vector<2x128xi32>
    %222 = arith.cmpi slt, %218, %221 : vector<2x128xi32>
    %223 = arith.andi %220, %222 : vector<2x128xi1>
    %cst_83 = arith.constant 5.000000e-01 : f32
    %224 = vector.broadcast %cst_83 : f32 to vector<2x128xf32>
    %225 = arith.mulf %224, %217 : vector<2x128xf32>
    %226 = arith.select %223, %217, %225 : vector<2x128xi1>, vector<2x128xf32>
    %227 = math.tanh %226 : vector<2x128xf32>
    %cst_84 = arith.constant 5.000000e-01 : f32
    %228 = vector.broadcast %cst_84 : f32 to vector<2x128xf32>
    %229 = arith.mulf %228, %227 : vector<2x128xf32>
    %cst_85 = arith.constant 5.000000e-01 : f32
    %230 = vector.broadcast %cst_85 : f32 to vector<2x128xf32>
    %231 = arith.addf %229, %230 : vector<2x128xf32>
    %232 = arith.select %223, %227, %231 : vector<2x128xi1>, vector<2x128xf32>
    %233 = vector.extract_strided_slice %232 {offsets = [0, 0], sizes = [2, 32], strides = [1, 1]} : vector<2x128xf32> to vector<2x32xf32>
    %234 = vector.extract_strided_slice %232 {offsets = [0, 32], sizes = [2, 32], strides = [1, 1]} : vector<2x128xf32> to vector<2x32xf32>
    %235 = vector.extract_strided_slice %232 {offsets = [0, 64], sizes = [2, 32], strides = [1, 1]} : vector<2x128xf32> to vector<2x32xf32>
    %236 = vector.extract_strided_slice %232 {offsets = [0, 96], sizes = [2, 32], strides = [1, 1]} : vector<2x128xf32> to vector<2x32xf32>
    %237 = arith.mulf %234, %207 : vector<2x32xf32>
    %238 = arith.mulf %233, %235 : vector<2x32xf32>
    %239 = arith.addf %237, %238 : vector<2x32xf32>
    %240 = math.tanh %239 : vector<2x32xf32>
    %241 = arith.mulf %236, %240 : vector<2x32xf32>
    %242 = vector.shape_cast %241 : vector<2x32xf32> to vector<2x1x32xf32>
    %c0_86 = arith.constant 0 : index
    %243 = arith.index_cast %c6_i32 : i32 to index
    %c0_87 = arith.constant 0 : index
    %244 = vector.load %arg15[%c0_86, %243, %c0_87] : memref<2x8x32xf32, #tpu.memory_space<vmem>>, vector<2x1x32xf32>
    tpu.vector_store %arg15[%c0_86, %243, %c0_87], %242 {strides = array<i32>} : memref<2x8x32xf32, #tpu.memory_space<vmem>>, vector<2x1x32xf32>,
    %c7_i32 = arith.constant 7 : i32
    %c0_88 = arith.constant 0 : index
    %245 = arith.index_cast %c7_i32 : i32 to index
    %c0_89 = arith.constant 0 : index
    %246 = vector.load %arg16[%c0_88, %245, %c0_89] : memref<2x8x128xf32, #tpu.memory_space<vmem>>, vector<2x1x128xf32>
    %247 = vector.shape_cast %246 : vector<2x1x128xf32> to vector<2x128xf32>
    %cst_90 = arith.constant dense<0.000000e+00> : vector<2x128xf32>
    %248 = tpu.matmul %241, %18, %cst_90 {dimension_numbers = #tpu.dot_dimension_numbers<[1], [0], [0], [1], [0, 0, 1, 1], [], []>} : vector<2x32xf32>, vector<32x128xf32>, vector<2x128xf32> -> vector<2x128xf32>
    %249 = arith.addf %247, %248 : vector<2x128xf32>
    %250 = tpu.iota {dimensions = array<i32: 1>} : vector<2x128xi32>
    %c64_i32_91 = arith.constant 64 : i32
    %251 = vector.broadcast %c64_i32_91 : i32 to vector<2x128xi32>
    %252 = arith.cmpi sge, %250, %251 : vector<2x128xi32>
    %c96_i32_92 = arith.constant 96 : i32
    %253 = vector.broadcast %c96_i32_92 : i32 to vector<2x128xi32>
    %254 = arith.cmpi slt, %250, %253 : vector<2x128xi32>
    %255 = arith.andi %252, %254 : vector<2x128xi1>
    %cst_93 = arith.constant 5.000000e-01 : f32
    %256 = vector.broadcast %cst_93 : f32 to vector<2x128xf32>
    %257 = arith.mulf %256, %249 : vector<2x128xf32>
    %258 = arith.select %255, %249, %257 : vector<2x128xi1>, vector<2x128xf32>
    %259 = math.tanh %258 : vector<2x128xf32>
    %cst_94 = arith.constant 5.000000e-01 : f32
    %260 = vector.broadcast %cst_94 : f32 to vector<2x128xf32>
    %261 = arith.mulf %260, %259 : vector<2x128xf32>
    %cst_95 = arith.constant 5.000000e-01 : f32
    %262 = vector.broadcast %cst_95 : f32 to vector<2x128xf32>
    %263 = arith.addf %261, %262 : vector<2x128xf32>
    %264 = arith.select %255, %259, %263 : vector<2x128xi1>, vector<2x128xf32>
    %265 = vector.extract_strided_slice %264 {offsets = [0, 0], sizes = [2, 32], strides = [1, 1]} : vector<2x128xf32> to vector<2x32xf32>
    %266 = vector.extract_strided_slice %264 {offsets = [0, 32], sizes = [2, 32], strides = [1, 1]} : vector<2x128xf32> to vector<2x32xf32>
    %267 = vector.extract_strided_slice %264 {offsets = [0, 64], sizes = [2, 32], strides = [1, 1]} : vector<2x128xf32> to vector<2x32xf32>
    %268 = vector.extract_strided_slice %264 {offsets = [0, 96], sizes = [2, 32], strides = [1, 1]} : vector<2x128xf32> to vector<2x32xf32>
    %269 = arith.mulf %266, %239 : vector<2x32xf32>
    %270 = arith.mulf %265, %267 : vector<2x32xf32>
    %271 = arith.addf %269, %270 : vector<2x32xf32>
    %272 = math.tanh %271 : vector<2x32xf32>
    %273 = arith.mulf %268, %272 : vector<2x32xf32>
    %274 = vector.shape_cast %273 : vector<2x32xf32> to vector<2x1x32xf32>
    %c0_96 = arith.constant 0 : index
    %275 = arith.index_cast %c7_i32 : i32 to index
    %c0_97 = arith.constant 0 : index
    %276 = vector.load %arg15[%c0_96, %275, %c0_97] : memref<2x8x32xf32, #tpu.memory_space<vmem>>, vector<2x1x32xf32>
    tpu.vector_store %arg15[%c0_96, %275, %c0_97], %274 {strides = array<i32>} : memref<2x8x32xf32, #tpu.memory_space<vmem>>, vector<2x1x32xf32>,
    %c8_i32 = arith.constant 8 : i32
    %c0_98 = arith.constant 0 : index
    %c0_99 = arith.constant 0 : index
    %c0_100 = arith.constant 0 : index
    %277 = vector.load %arg15[%c0_98, %c0_99, %c0_100] : memref<2x8x32xf32, #tpu.memory_space<vmem>>, vector<2x8x32xf32>
    %278 = vector.shape_cast %277 : vector<2x8x32xf32> to vector<16x32xf32>
    %c1 = arith.constant 1 : index
    %c0_101 = arith.constant 0 : index
    %c0_102 = arith.constant 0 : index
    %279 = vector.load %arg4[%c1, %c0_101, %c0_102] : memref<3x32x128xf32, #tpu.memory_space<vmem>>, vector<1x32x128xf32>
    %280 = vector.shape_cast %279 : vector<1x32x128xf32> to vector<32x128xf32>
    %cst_103 = arith.constant dense<0.000000e+00> : vector<16x128xf32>
    %281 = tpu.matmul %278, %280, %cst_103 {dimension_numbers = #tpu.dot_dimension_numbers<[1], [0], [0], [1], [0, 0, 1, 1], [], []>} : vector<16x32xf32>, vector<32x128xf32>, vector<16x128xf32> -> vector<16x128xf32>
    %c1_104 = arith.constant 1 : index
    %c0_105 = arith.constant 0 : index
    %282 = vector.load %arg6[%c1_104, %c0_105] : memref<3x128xf32, #tpu.memory_space<vmem>>, vector<1x128xf32>
    %283 = vector.shape_cast %282 : vector<1x128xf32> to vector<128xf32>
    %284 = vector.shape_cast %283 : vector<128xf32> to vector<1x128xf32>
    %285 = vector.broadcast %284 : vector<1x128xf32> to vector<16x128xf32>
    %286 = arith.addf %281, %285 : vector<16x128xf32>
    %287 = vector.shape_cast %286 : vector<16x128xf32> to vector<2x8x128xf32>
    %c0_106 = arith.constant 0 : index
    %c0_107 = arith.constant 0 : index
    %c0_108 = arith.constant 0 : index
    %288 = vector.load %arg16[%c0_106, %c0_107, %c0_108] : memref<2x8x128xf32, #tpu.memory_space<vmem>>, vector<2x8x128xf32>
    tpu.vector_store %arg16[%c0_106, %c0_107, %c0_108], %287 {strides = array<i32>} : memref<2x8x128xf32, #tpu.memory_space<vmem>>, vector<2x8x128xf32>,
    %c1_109 = arith.constant 1 : index
    %c0_110 = arith.constant 0 : index
    %c0_111 = arith.constant 0 : index
    %289 = vector.load %arg5[%c1_109, %c0_110, %c0_111] : memref<3x32x128xf32, #tpu.memory_space<vmem>>, vector<1x32x128xf32>
    %290 = vector.shape_cast %289 : vector<1x32x128xf32> to vector<32x128xf32>
    %cst_112 = arith.constant 0.000000e+00 : f32
    %291 = vector.broadcast %cst_112 : f32 to vector<2x32xf32>
    %cst_113 = arith.constant 0.000000e+00 : f32
    %292 = vector.broadcast %cst_113 : f32 to vector<2x32xf32>
    %c0_i32_114 = arith.constant 0 : i32
    %c0_115 = arith.constant 0 : index
    %293 = arith.index_cast %c0_i32_114 : i32 to index
    %c0_116 = arith.constant 0 : index
    %294 = vector.load %arg16[%c0_115, %293, %c0_116] : memref<2x8x128xf32, #tpu.memory_space<vmem>>, vector<2x1x128xf32>
    %295 = vector.shape_cast %294 : vector<2x1x128xf32> to vector<2x128xf32>
    %cst_117 = arith.constant dense<0.000000e+00> : vector<2x128xf32>
    %296 = tpu.matmul %291, %290, %cst_117 {dimension_numbers = #tpu.dot_dimension_numbers<[1], [0], [0], [1], [0, 0, 1, 1], [], []>} : vector<2x32xf32>, vector<32x128xf32>, vector<2x128xf32> -> vector<2x128xf32>
    %297 = arith.addf %295, %296 : vector<2x128xf32>
    %298 = tpu.iota {dimensions = array<i32: 1>} : vector<2x128xi32>
    %c64_i32_118 = arith.constant 64 : i32
    %299 = vector.broadcast %c64_i32_118 : i32 to vector<2x128xi32>
    %300 = arith.cmpi sge, %298, %299 : vector<2x128xi32>
    %c96_i32_119 = arith.constant 96 : i32
    %301 = vector.broadcast %c96_i32_119 : i32 to vector<2x128xi32>
    %302 = arith.cmpi slt, %298, %301 : vector<2x128xi32>
    %303 = arith.andi %300, %302 : vector<2x128xi1>
    %cst_120 = arith.constant 5.000000e-01 : f32
    %304 = vector.broadcast %cst_120 : f32 to vector<2x128xf32>
    %305 = arith.mulf %304, %297 : vector<2x128xf32>
    %306 = arith.select %303, %297, %305 : vector<2x128xi1>, vector<2x128xf32>
    %307 = math.tanh %306 : vector<2x128xf32>
    %cst_121 = arith.constant 5.000000e-01 : f32
    %308 = vector.broadcast %cst_121 : f32 to vector<2x128xf32>
    %309 = arith.mulf %308, %307 : vector<2x128xf32>
    %cst_122 = arith.constant 5.000000e-01 : f32
    %310 = vector.broadcast %cst_122 : f32 to vector<2x128xf32>
    %311 = arith.addf %309, %310 : vector<2x128xf32>
    %312 = arith.select %303, %307, %311 : vector<2x128xi1>, vector<2x128xf32>
    %313 = vector.extract_strided_slice %312 {offsets = [0, 0], sizes = [2, 32], strides = [1, 1]} : vector<2x128xf32> to vector<2x32xf32>
    %314 = vector.extract_strided_slice %312 {offsets = [0, 32], sizes = [2, 32], strides = [1, 1]} : vector<2x128xf32> to vector<2x32xf32>
    %315 = vector.extract_strided_slice %312 {offsets = [0, 64], sizes = [2, 32], strides = [1, 1]} : vector<2x128xf32> to vector<2x32xf32>
    %316 = vector.extract_strided_slice %312 {offsets = [0, 96], sizes = [2, 32], strides = [1, 1]} : vector<2x128xf32> to vector<2x32xf32>
    %317 = arith.mulf %314, %292 : vector<2x32xf32>
    %318 = arith.mulf %313, %315 : vector<2x32xf32>
    %319 = arith.addf %317, %318 : vector<2x32xf32>
    %320 = math.tanh %319 : vector<2x32xf32>
    %321 = arith.mulf %316, %320 : vector<2x32xf32>
    %322 = vector.shape_cast %321 : vector<2x32xf32> to vector<2x1x32xf32>
    %c0_123 = arith.constant 0 : index
    %323 = arith.index_cast %c0_i32_114 : i32 to index
    %c0_124 = arith.constant 0 : index
    %324 = vector.load %arg15[%c0_123, %323, %c0_124] : memref<2x8x32xf32, #tpu.memory_space<vmem>>, vector<2x1x32xf32>
    tpu.vector_store %arg15[%c0_123, %323, %c0_124], %322 {strides = array<i32>} : memref<2x8x32xf32, #tpu.memory_space<vmem>>, vector<2x1x32xf32>,
    %c1_i32_125 = arith.constant 1 : i32
    %c0_126 = arith.constant 0 : index
    %325 = arith.index_cast %c1_i32_125 : i32 to index
    %c0_127 = arith.constant 0 : index
    %326 = vector.load %arg16[%c0_126, %325, %c0_127] : memref<2x8x128xf32, #tpu.memory_space<vmem>>, vector<2x1x128xf32>
    %327 = vector.shape_cast %326 : vector<2x1x128xf32> to vector<2x128xf32>
    %cst_128 = arith.constant dense<0.000000e+00> : vector<2x128xf32>
    %328 = tpu.matmul %321, %290, %cst_128 {dimension_numbers = #tpu.dot_dimension_numbers<[1], [0], [0], [1], [0, 0, 1, 1], [], []>} : vector<2x32xf32>, vector<32x128xf32>, vector<2x128xf32> -> vector<2x128xf32>
    %329 = arith.addf %327, %328 : vector<2x128xf32>
    %330 = tpu.iota {dimensions = array<i32: 1>} : vector<2x128xi32>
    %c64_i32_129 = arith.constant 64 : i32
    %331 = vector.broadcast %c64_i32_129 : i32 to vector<2x128xi32>
    %332 = arith.cmpi sge, %330, %331 : vector<2x128xi32>
    %c96_i32_130 = arith.constant 96 : i32
    %333 = vector.broadcast %c96_i32_130 : i32 to vector<2x128xi32>
    %334 = arith.cmpi slt, %330, %333 : vector<2x128xi32>
    %335 = arith.andi %332, %334 : vector<2x128xi1>
    %cst_131 = arith.constant 5.000000e-01 : f32
    %336 = vector.broadcast %cst_131 : f32 to vector<2x128xf32>
    %337 = arith.mulf %336, %329 : vector<2x128xf32>
    %338 = arith.select %335, %329, %337 : vector<2x128xi1>, vector<2x128xf32>
    %339 = math.tanh %338 : vector<2x128xf32>
    %cst_132 = arith.constant 5.000000e-01 : f32
    %340 = vector.broadcast %cst_132 : f32 to vector<2x128xf32>
    %341 = arith.mulf %340, %339 : vector<2x128xf32>
    %cst_133 = arith.constant 5.000000e-01 : f32
    %342 = vector.broadcast %cst_133 : f32 to vector<2x128xf32>
    %343 = arith.addf %341, %342 : vector<2x128xf32>
    %344 = arith.select %335, %339, %343 : vector<2x128xi1>, vector<2x128xf32>
    %345 = vector.extract_strided_slice %344 {offsets = [0, 0], sizes = [2, 32], strides = [1, 1]} : vector<2x128xf32> to vector<2x32xf32>
    %346 = vector.extract_strided_slice %344 {offsets = [0, 32], sizes = [2, 32], strides = [1, 1]} : vector<2x128xf32> to vector<2x32xf32>
    %347 = vector.extract_strided_slice %344 {offsets = [0, 64], sizes = [2, 32], strides = [1, 1]} : vector<2x128xf32> to vector<2x32xf32>
    %348 = vector.extract_strided_slice %344 {offsets = [0, 96], sizes = [2, 32], strides = [1, 1]} : vector<2x128xf32> to vector<2x32xf32>
    %349 = arith.mulf %346, %319 : vector<2x32xf32>
    %350 = arith.mulf %345, %347 : vector<2x32xf32>
    %351 = arith.addf %349, %350 : vector<2x32xf32>
    %352 = math.tanh %351 : vector<2x32xf32>
    %353 = arith.mulf %348, %352 : vector<2x32xf32>
    %354 = vector.shape_cast %353 : vector<2x32xf32> to vector<2x1x32xf32>
    %c0_134 = arith.constant 0 : index
    %355 = arith.index_cast %c1_i32_125 : i32 to index
    %c0_135 = arith.constant 0 : index
    %356 = vector.load %arg15[%c0_134, %355, %c0_135] : memref<2x8x32xf32, #tpu.memory_space<vmem>>, vector<2x1x32xf32>
    tpu.vector_store %arg15[%c0_134, %355, %c0_135], %354 {strides = array<i32>} : memref<2x8x32xf32, #tpu.memory_space<vmem>>, vector<2x1x32xf32>,
    %c2_i32_136 = arith.constant 2 : i32
    %c0_137 = arith.constant 0 : index
    %357 = arith.index_cast %c2_i32_136 : i32 to index
    %c0_138 = arith.constant 0 : index
    %358 = vector.load %arg16[%c0_137, %357, %c0_138] : memref<2x8x128xf32, #tpu.memory_space<vmem>>, vector<2x1x128xf32>
    %359 = vector.shape_cast %358 : vector<2x1x128xf32> to vector<2x128xf32>
    %cst_139 = arith.constant dense<0.000000e+00> : vector<2x128xf32>
    %360 = tpu.matmul %353, %290, %cst_139 {dimension_numbers = #tpu.dot_dimension_numbers<[1], [0], [0], [1], [0, 0, 1, 1], [], []>} : vector<2x32xf32>, vector<32x128xf32>, vector<2x128xf32> -> vector<2x128xf32>
    %361 = arith.addf %359, %360 : vector<2x128xf32>
    %362 = tpu.iota {dimensions = array<i32: 1>} : vector<2x128xi32>
    %c64_i32_140 = arith.constant 64 : i32
    %363 = vector.broadcast %c64_i32_140 : i32 to vector<2x128xi32>
    %364 = arith.cmpi sge, %362, %363 : vector<2x128xi32>
    %c96_i32_141 = arith.constant 96 : i32
    %365 = vector.broadcast %c96_i32_141 : i32 to vector<2x128xi32>
    %366 = arith.cmpi slt, %362, %365 : vector<2x128xi32>
    %367 = arith.andi %364, %366 : vector<2x128xi1>
    %cst_142 = arith.constant 5.000000e-01 : f32
    %368 = vector.broadcast %cst_142 : f32 to vector<2x128xf32>
    %369 = arith.mulf %368, %361 : vector<2x128xf32>
    %370 = arith.select %367, %361, %369 : vector<2x128xi1>, vector<2x128xf32>
    %371 = math.tanh %370 : vector<2x128xf32>
    %cst_143 = arith.constant 5.000000e-01 : f32
    %372 = vector.broadcast %cst_143 : f32 to vector<2x128xf32>
    %373 = arith.mulf %372, %371 : vector<2x128xf32>
    %cst_144 = arith.constant 5.000000e-01 : f32
    %374 = vector.broadcast %cst_144 : f32 to vector<2x128xf32>
    %375 = arith.addf %373, %374 : vector<2x128xf32>
    %376 = arith.select %367, %371, %375 : vector<2x128xi1>, vector<2x128xf32>
    %377 = vector.extract_strided_slice %376 {offsets = [0, 0], sizes = [2, 32], strides = [1, 1]} : vector<2x128xf32> to vector<2x32xf32>
    %378 = vector.extract_strided_slice %376 {offsets = [0, 32], sizes = [2, 32], strides = [1, 1]} : vector<2x128xf32> to vector<2x32xf32>
    %379 = vector.extract_strided_slice %376 {offsets = [0, 64], sizes = [2, 32], strides = [1, 1]} : vector<2x128xf32> to vector<2x32xf32>
    %380 = vector.extract_strided_slice %376 {offsets = [0, 96], sizes = [2, 32], strides = [1, 1]} : vector<2x128xf32> to vector<2x32xf32>
    %381 = arith.mulf %378, %351 : vector<2x32xf32>
    %382 = arith.mulf %377, %379 : vector<2x32xf32>
    %383 = arith.addf %381, %382 : vector<2x32xf32>
    %384 = math.tanh %383 : vector<2x32xf32>
    %385 = arith.mulf %380, %384 : vector<2x32xf32>
    %386 = vector.shape_cast %385 : vector<2x32xf32> to vector<2x1x32xf32>
    %c0_145 = arith.constant 0 : index
    %387 = arith.index_cast %c2_i32_136 : i32 to index
    %c0_146 = arith.constant 0 : index
    %388 = vector.load %arg15[%c0_145, %387, %c0_146] : memref<2x8x32xf32, #tpu.memory_space<vmem>>, vector<2x1x32xf32>
    tpu.vector_store %arg15[%c0_145, %387, %c0_146], %386 {strides = array<i32>} : memref<2x8x32xf32, #tpu.memory_space<vmem>>, vector<2x1x32xf32>,
    %c3_i32_147 = arith.constant 3 : i32
    %c0_148 = arith.constant 0 : index
    %389 = arith.index_cast %c3_i32_147 : i32 to index
    %c0_149 = arith.constant 0 : index
    %390 = vector.load %arg16[%c0_148, %389, %c0_149] : memref<2x8x128xf32, #tpu.memory_space<vmem>>, vector<2x1x128xf32>
    %391 = vector.shape_cast %390 : vector<2x1x128xf32> to vector<2x128xf32>
    %cst_150 = arith.constant dense<0.000000e+00> : vector<2x128xf32>
    %392 = tpu.matmul %385, %290, %cst_150 {dimension_numbers = #tpu.dot_dimension_numbers<[1], [0], [0], [1], [0, 0, 1, 1], [], []>} : vector<2x32xf32>, vector<32x128xf32>, vector<2x128xf32> -> vector<2x128xf32>
    %393 = arith.addf %391, %392 : vector<2x128xf32>
    %394 = tpu.iota {dimensions = array<i32: 1>} : vector<2x128xi32>
    %c64_i32_151 = arith.constant 64 : i32
    %395 = vector.broadcast %c64_i32_151 : i32 to vector<2x128xi32>
    %396 = arith.cmpi sge, %394, %395 : vector<2x128xi32>
    %c96_i32_152 = arith.constant 96 : i32
    %397 = vector.broadcast %c96_i32_152 : i32 to vector<2x128xi32>
    %398 = arith.cmpi slt, %394, %397 : vector<2x128xi32>
    %399 = arith.andi %396, %398 : vector<2x128xi1>
    %cst_153 = arith.constant 5.000000e-01 : f32
    %400 = vector.broadcast %cst_153 : f32 to vector<2x128xf32>
    %401 = arith.mulf %400, %393 : vector<2x128xf32>
    %402 = arith.select %399, %393, %401 : vector<2x128xi1>, vector<2x128xf32>
    %403 = math.tanh %402 : vector<2x128xf32>
    %cst_154 = arith.constant 5.000000e-01 : f32
    %404 = vector.broadcast %cst_154 : f32 to vector<2x128xf32>
    %405 = arith.mulf %404, %403 : vector<2x128xf32>
    %cst_155 = arith.constant 5.000000e-01 : f32
    %406 = vector.broadcast %cst_155 : f32 to vector<2x128xf32>
    %407 = arith.addf %405, %406 : vector<2x128xf32>
    %408 = arith.select %399, %403, %407 : vector<2x128xi1>, vector<2x128xf32>
    %409 = vector.extract_strided_slice %408 {offsets = [0, 0], sizes = [2, 32], strides = [1, 1]} : vector<2x128xf32> to vector<2x32xf32>
    %410 = vector.extract_strided_slice %408 {offsets = [0, 32], sizes = [2, 32], strides = [1, 1]} : vector<2x128xf32> to vector<2x32xf32>
    %411 = vector.extract_strided_slice %408 {offsets = [0, 64], sizes = [2, 32], strides = [1, 1]} : vector<2x128xf32> to vector<2x32xf32>
    %412 = vector.extract_strided_slice %408 {offsets = [0, 96], sizes = [2, 32], strides = [1, 1]} : vector<2x128xf32> to vector<2x32xf32>
    %413 = arith.mulf %410, %383 : vector<2x32xf32>
    %414 = arith.mulf %409, %411 : vector<2x32xf32>
    %415 = arith.addf %413, %414 : vector<2x32xf32>
    %416 = math.tanh %415 : vector<2x32xf32>
    %417 = arith.mulf %412, %416 : vector<2x32xf32>
    %418 = vector.shape_cast %417 : vector<2x32xf32> to vector<2x1x32xf32>
    %c0_156 = arith.constant 0 : index
    %419 = arith.index_cast %c3_i32_147 : i32 to index
    %c0_157 = arith.constant 0 : index
    %420 = vector.load %arg15[%c0_156, %419, %c0_157] : memref<2x8x32xf32, #tpu.memory_space<vmem>>, vector<2x1x32xf32>
    tpu.vector_store %arg15[%c0_156, %419, %c0_157], %418 {strides = array<i32>} : memref<2x8x32xf32, #tpu.memory_space<vmem>>, vector<2x1x32xf32>,
    %c4_i32_158 = arith.constant 4 : i32
    %c0_159 = arith.constant 0 : index
    %421 = arith.index_cast %c4_i32_158 : i32 to index
    %c0_160 = arith.constant 0 : index
    %422 = vector.load %arg16[%c0_159, %421, %c0_160] : memref<2x8x128xf32, #tpu.memory_space<vmem>>, vector<2x1x128xf32>
    %423 = vector.shape_cast %422 : vector<2x1x128xf32> to vector<2x128xf32>
    %cst_161 = arith.constant dense<0.000000e+00> : vector<2x128xf32>
    %424 = tpu.matmul %417, %290, %cst_161 {dimension_numbers = #tpu.dot_dimension_numbers<[1], [0], [0], [1], [0, 0, 1, 1], [], []>} : vector<2x32xf32>, vector<32x128xf32>, vector<2x128xf32> -> vector<2x128xf32>
    %425 = arith.addf %423, %424 : vector<2x128xf32>
    %426 = tpu.iota {dimensions = array<i32: 1>} : vector<2x128xi32>
    %c64_i32_162 = arith.constant 64 : i32
    %427 = vector.broadcast %c64_i32_162 : i32 to vector<2x128xi32>
    %428 = arith.cmpi sge, %426, %427 : vector<2x128xi32>
    %c96_i32_163 = arith.constant 96 : i32
    %429 = vector.broadcast %c96_i32_163 : i32 to vector<2x128xi32>
    %430 = arith.cmpi slt, %426, %429 : vector<2x128xi32>
    %431 = arith.andi %428, %430 : vector<2x128xi1>
    %cst_164 = arith.constant 5.000000e-01 : f32
    %432 = vector.broadcast %cst_164 : f32 to vector<2x128xf32>
    %433 = arith.mulf %432, %425 : vector<2x128xf32>
    %434 = arith.select %431, %425, %433 : vector<2x128xi1>, vector<2x128xf32>
    %435 = math.tanh %434 : vector<2x128xf32>
    %cst_165 = arith.constant 5.000000e-01 : f32
    %436 = vector.broadcast %cst_165 : f32 to vector<2x128xf32>
    %437 = arith.mulf %436, %435 : vector<2x128xf32>
    %cst_166 = arith.constant 5.000000e-01 : f32
    %438 = vector.broadcast %cst_166 : f32 to vector<2x128xf32>
    %439 = arith.addf %437, %438 : vector<2x128xf32>
    %440 = arith.select %431, %435, %439 : vector<2x128xi1>, vector<2x128xf32>
    %441 = vector.extract_strided_slice %440 {offsets = [0, 0], sizes = [2, 32], strides = [1, 1]} : vector<2x128xf32> to vector<2x32xf32>
    %442 = vector.extract_strided_slice %440 {offsets = [0, 32], sizes = [2, 32], strides = [1, 1]} : vector<2x128xf32> to vector<2x32xf32>
    %443 = vector.extract_strided_slice %440 {offsets = [0, 64], sizes = [2, 32], strides = [1, 1]} : vector<2x128xf32> to vector<2x32xf32>
    %444 = vector.extract_strided_slice %440 {offsets = [0, 96], sizes = [2, 32], strides = [1, 1]} : vector<2x128xf32> to vector<2x32xf32>
    %445 = arith.mulf %442, %415 : vector<2x32xf32>
    %446 = arith.mulf %441, %443 : vector<2x32xf32>
    %447 = arith.addf %445, %446 : vector<2x32xf32>
    %448 = math.tanh %447 : vector<2x32xf32>
    %449 = arith.mulf %444, %448 : vector<2x32xf32>
    %450 = vector.shape_cast %449 : vector<2x32xf32> to vector<2x1x32xf32>
    %c0_167 = arith.constant 0 : index
    %451 = arith.index_cast %c4_i32_158 : i32 to index
    %c0_168 = arith.constant 0 : index
    %452 = vector.load %arg15[%c0_167, %451, %c0_168] : memref<2x8x32xf32, #tpu.memory_space<vmem>>, vector<2x1x32xf32>
    tpu.vector_store %arg15[%c0_167, %451, %c0_168], %450 {strides = array<i32>} : memref<2x8x32xf32, #tpu.memory_space<vmem>>, vector<2x1x32xf32>,
    %c5_i32_169 = arith.constant 5 : i32
    %c0_170 = arith.constant 0 : index
    %453 = arith.index_cast %c5_i32_169 : i32 to index
    %c0_171 = arith.constant 0 : index
    %454 = vector.load %arg16[%c0_170, %453, %c0_171] : memref<2x8x128xf32, #tpu.memory_space<vmem>>, vector<2x1x128xf32>
    %455 = vector.shape_cast %454 : vector<2x1x128xf32> to vector<2x128xf32>
    %cst_172 = arith.constant dense<0.000000e+00> : vector<2x128xf32>
    %456 = tpu.matmul %449, %290, %cst_172 {dimension_numbers = #tpu.dot_dimension_numbers<[1], [0], [0], [1], [0, 0, 1, 1], [], []>} : vector<2x32xf32>, vector<32x128xf32>, vector<2x128xf32> -> vector<2x128xf32>
    %457 = arith.addf %455, %456 : vector<2x128xf32>
    %458 = tpu.iota {dimensions = array<i32: 1>} : vector<2x128xi32>
    %c64_i32_173 = arith.constant 64 : i32
    %459 = vector.broadcast %c64_i32_173 : i32 to vector<2x128xi32>
    %460 = arith.cmpi sge, %458, %459 : vector<2x128xi32>
    %c96_i32_174 = arith.constant 96 : i32
    %461 = vector.broadcast %c96_i32_174 : i32 to vector<2x128xi32>
    %462 = arith.cmpi slt, %458, %461 : vector<2x128xi32>
    %463 = arith.andi %460, %462 : vector<2x128xi1>
    %cst_175 = arith.constant 5.000000e-01 : f32
    %464 = vector.broadcast %cst_175 : f32 to vector<2x128xf32>
    %465 = arith.mulf %464, %457 : vector<2x128xf32>
    %466 = arith.select %463, %457, %465 : vector<2x128xi1>, vector<2x128xf32>
    %467 = math.tanh %466 : vector<2x128xf32>
    %cst_176 = arith.constant 5.000000e-01 : f32
    %468 = vector.broadcast %cst_176 : f32 to vector<2x128xf32>
    %469 = arith.mulf %468, %467 : vector<2x128xf32>
    %cst_177 = arith.constant 5.000000e-01 : f32
    %470 = vector.broadcast %cst_177 : f32 to vector<2x128xf32>
    %471 = arith.addf %469, %470 : vector<2x128xf32>
    %472 = arith.select %463, %467, %471 : vector<2x128xi1>, vector<2x128xf32>
    %473 = vector.extract_strided_slice %472 {offsets = [0, 0], sizes = [2, 32], strides = [1, 1]} : vector<2x128xf32> to vector<2x32xf32>
    %474 = vector.extract_strided_slice %472 {offsets = [0, 32], sizes = [2, 32], strides = [1, 1]} : vector<2x128xf32> to vector<2x32xf32>
    %475 = vector.extract_strided_slice %472 {offsets = [0, 64], sizes = [2, 32], strides = [1, 1]} : vector<2x128xf32> to vector<2x32xf32>
    %476 = vector.extract_strided_slice %472 {offsets = [0, 96], sizes = [2, 32], strides = [1, 1]} : vector<2x128xf32> to vector<2x32xf32>
    %477 = arith.mulf %474, %447 : vector<2x32xf32>
    %478 = arith.mulf %473, %475 : vector<2x32xf32>
    %479 = arith.addf %477, %478 : vector<2x32xf32>
    %480 = math.tanh %479 : vector<2x32xf32>
    %481 = arith.mulf %476, %480 : vector<2x32xf32>
    %482 = vector.shape_cast %481 : vector<2x32xf32> to vector<2x1x32xf32>
    %c0_178 = arith.constant 0 : index
    %483 = arith.index_cast %c5_i32_169 : i32 to index
    %c0_179 = arith.constant 0 : index
    %484 = vector.load %arg15[%c0_178, %483, %c0_179] : memref<2x8x32xf32, #tpu.memory_space<vmem>>, vector<2x1x32xf32>
    tpu.vector_store %arg15[%c0_178, %483, %c0_179], %482 {strides = array<i32>} : memref<2x8x32xf32, #tpu.memory_space<vmem>>, vector<2x1x32xf32>,
    %c6_i32_180 = arith.constant 6 : i32
    %c0_181 = arith.constant 0 : index
    %485 = arith.index_cast %c6_i32_180 : i32 to index
    %c0_182 = arith.constant 0 : index
    %486 = vector.load %arg16[%c0_181, %485, %c0_182] : memref<2x8x128xf32, #tpu.memory_space<vmem>>, vector<2x1x128xf32>
    %487 = vector.shape_cast %486 : vector<2x1x128xf32> to vector<2x128xf32>
    %cst_183 = arith.constant dense<0.000000e+00> : vector<2x128xf32>
    %488 = tpu.matmul %481, %290, %cst_183 {dimension_numbers = #tpu.dot_dimension_numbers<[1], [0], [0], [1], [0, 0, 1, 1], [], []>} : vector<2x32xf32>, vector<32x128xf32>, vector<2x128xf32> -> vector<2x128xf32>
    %489 = arith.addf %487, %488 : vector<2x128xf32>
    %490 = tpu.iota {dimensions = array<i32: 1>} : vector<2x128xi32>
    %c64_i32_184 = arith.constant 64 : i32
    %491 = vector.broadcast %c64_i32_184 : i32 to vector<2x128xi32>
    %492 = arith.cmpi sge, %490, %491 : vector<2x128xi32>
    %c96_i32_185 = arith.constant 96 : i32
    %493 = vector.broadcast %c96_i32_185 : i32 to vector<2x128xi32>
    %494 = arith.cmpi slt, %490, %493 : vector<2x128xi32>
    %495 = arith.andi %492, %494 : vector<2x128xi1>
    %cst_186 = arith.constant 5.000000e-01 : f32
    %496 = vector.broadcast %cst_186 : f32 to vector<2x128xf32>
    %497 = arith.mulf %496, %489 : vector<2x128xf32>
    %498 = arith.select %495, %489, %497 : vector<2x128xi1>, vector<2x128xf32>
    %499 = math.tanh %498 : vector<2x128xf32>
    %cst_187 = arith.constant 5.000000e-01 : f32
    %500 = vector.broadcast %cst_187 : f32 to vector<2x128xf32>
    %501 = arith.mulf %500, %499 : vector<2x128xf32>
    %cst_188 = arith.constant 5.000000e-01 : f32
    %502 = vector.broadcast %cst_188 : f32 to vector<2x128xf32>
    %503 = arith.addf %501, %502 : vector<2x128xf32>
    %504 = arith.select %495, %499, %503 : vector<2x128xi1>, vector<2x128xf32>
    %505 = vector.extract_strided_slice %504 {offsets = [0, 0], sizes = [2, 32], strides = [1, 1]} : vector<2x128xf32> to vector<2x32xf32>
    %506 = vector.extract_strided_slice %504 {offsets = [0, 32], sizes = [2, 32], strides = [1, 1]} : vector<2x128xf32> to vector<2x32xf32>
    %507 = vector.extract_strided_slice %504 {offsets = [0, 64], sizes = [2, 32], strides = [1, 1]} : vector<2x128xf32> to vector<2x32xf32>
    %508 = vector.extract_strided_slice %504 {offsets = [0, 96], sizes = [2, 32], strides = [1, 1]} : vector<2x128xf32> to vector<2x32xf32>
    %509 = arith.mulf %506, %479 : vector<2x32xf32>
    %510 = arith.mulf %505, %507 : vector<2x32xf32>
    %511 = arith.addf %509, %510 : vector<2x32xf32>
    %512 = math.tanh %511 : vector<2x32xf32>
    %513 = arith.mulf %508, %512 : vector<2x32xf32>
    %514 = vector.shape_cast %513 : vector<2x32xf32> to vector<2x1x32xf32>
    %c0_189 = arith.constant 0 : index
    %515 = arith.index_cast %c6_i32_180 : i32 to index
    %c0_190 = arith.constant 0 : index
    %516 = vector.load %arg15[%c0_189, %515, %c0_190] : memref<2x8x32xf32, #tpu.memory_space<vmem>>, vector<2x1x32xf32>
    tpu.vector_store %arg15[%c0_189, %515, %c0_190], %514 {strides = array<i32>} : memref<2x8x32xf32, #tpu.memory_space<vmem>>, vector<2x1x32xf32>,
    %c7_i32_191 = arith.constant 7 : i32
    %c0_192 = arith.constant 0 : index
    %517 = arith.index_cast %c7_i32_191 : i32 to index
    %c0_193 = arith.constant 0 : index
    %518 = vector.load %arg16[%c0_192, %517, %c0_193] : memref<2x8x128xf32, #tpu.memory_space<vmem>>, vector<2x1x128xf32>
    %519 = vector.shape_cast %518 : vector<2x1x128xf32> to vector<2x128xf32>
    %cst_194 = arith.constant dense<0.000000e+00> : vector<2x128xf32>
    %520 = tpu.matmul %513, %290, %cst_194 {dimension_numbers = #tpu.dot_dimension_numbers<[1], [0], [0], [1], [0, 0, 1, 1], [], []>} : vector<2x32xf32>, vector<32x128xf32>, vector<2x128xf32> -> vector<2x128xf32>
    %521 = arith.addf %519, %520 : vector<2x128xf32>
    %522 = tpu.iota {dimensions = array<i32: 1>} : vector<2x128xi32>
    %c64_i32_195 = arith.constant 64 : i32
    %523 = vector.broadcast %c64_i32_195 : i32 to vector<2x128xi32>
    %524 = arith.cmpi sge, %522, %523 : vector<2x128xi32>
    %c96_i32_196 = arith.constant 96 : i32
    %525 = vector.broadcast %c96_i32_196 : i32 to vector<2x128xi32>
    %526 = arith.cmpi slt, %522, %525 : vector<2x128xi32>
    %527 = arith.andi %524, %526 : vector<2x128xi1>
    %cst_197 = arith.constant 5.000000e-01 : f32
    %528 = vector.broadcast %cst_197 : f32 to vector<2x128xf32>
    %529 = arith.mulf %528, %521 : vector<2x128xf32>
    %530 = arith.select %527, %521, %529 : vector<2x128xi1>, vector<2x128xf32>
    %531 = math.tanh %530 : vector<2x128xf32>
    %cst_198 = arith.constant 5.000000e-01 : f32
    %532 = vector.broadcast %cst_198 : f32 to vector<2x128xf32>
    %533 = arith.mulf %532, %531 : vector<2x128xf32>
    %cst_199 = arith.constant 5.000000e-01 : f32
    %534 = vector.broadcast %cst_199 : f32 to vector<2x128xf32>
    %535 = arith.addf %533, %534 : vector<2x128xf32>
    %536 = arith.select %527, %531, %535 : vector<2x128xi1>, vector<2x128xf32>
    %537 = vector.extract_strided_slice %536 {offsets = [0, 0], sizes = [2, 32], strides = [1, 1]} : vector<2x128xf32> to vector<2x32xf32>
    %538 = vector.extract_strided_slice %536 {offsets = [0, 32], sizes = [2, 32], strides = [1, 1]} : vector<2x128xf32> to vector<2x32xf32>
    %539 = vector.extract_strided_slice %536 {offsets = [0, 64], sizes = [2, 32], strides = [1, 1]} : vector<2x128xf32> to vector<2x32xf32>
    %540 = vector.extract_strided_slice %536 {offsets = [0, 96], sizes = [2, 32], strides = [1, 1]} : vector<2x128xf32> to vector<2x32xf32>
    %541 = arith.mulf %538, %511 : vector<2x32xf32>
    %542 = arith.mulf %537, %539 : vector<2x32xf32>
    %543 = arith.addf %541, %542 : vector<2x32xf32>
    %544 = math.tanh %543 : vector<2x32xf32>
    %545 = arith.mulf %540, %544 : vector<2x32xf32>
    %546 = vector.shape_cast %545 : vector<2x32xf32> to vector<2x1x32xf32>
    %c0_200 = arith.constant 0 : index
    %547 = arith.index_cast %c7_i32_191 : i32 to index
    %c0_201 = arith.constant 0 : index
    %548 = vector.load %arg15[%c0_200, %547, %c0_201] : memref<2x8x32xf32, #tpu.memory_space<vmem>>, vector<2x1x32xf32>
    tpu.vector_store %arg15[%c0_200, %547, %c0_201], %546 {strides = array<i32>} : memref<2x8x32xf32, #tpu.memory_space<vmem>>, vector<2x1x32xf32>,
    %c8_i32_202 = arith.constant 8 : i32
    %c0_203 = arith.constant 0 : index
    %c0_204 = arith.constant 0 : index
    %c0_205 = arith.constant 0 : index
    %549 = vector.load %arg15[%c0_203, %c0_204, %c0_205] : memref<2x8x32xf32, #tpu.memory_space<vmem>>, vector<2x8x32xf32>
    %550 = vector.shape_cast %549 : vector<2x8x32xf32> to vector<16x32xf32>
    %c2 = arith.constant 2 : index
    %c0_206 = arith.constant 0 : index
    %c0_207 = arith.constant 0 : index
    %551 = vector.load %arg4[%c2, %c0_206, %c0_207] : memref<3x32x128xf32, #tpu.memory_space<vmem>>, vector<1x32x128xf32>
    %552 = vector.shape_cast %551 : vector<1x32x128xf32> to vector<32x128xf32>
    %cst_208 = arith.constant dense<0.000000e+00> : vector<16x128xf32>
    %553 = tpu.matmul %550, %552, %cst_208 {dimension_numbers = #tpu.dot_dimension_numbers<[1], [0], [0], [1], [0, 0, 1, 1], [], []>} : vector<16x32xf32>, vector<32x128xf32>, vector<16x128xf32> -> vector<16x128xf32>
    %c2_209 = arith.constant 2 : index
    %c0_210 = arith.constant 0 : index
    %554 = vector.load %arg6[%c2_209, %c0_210] : memref<3x128xf32, #tpu.memory_space<vmem>>, vector<1x128xf32>
    %555 = vector.shape_cast %554 : vector<1x128xf32> to vector<128xf32>
    %556 = vector.shape_cast %555 : vector<128xf32> to vector<1x128xf32>
    %557 = vector.broadcast %556 : vector<1x128xf32> to vector<16x128xf32>
    %558 = arith.addf %553, %557 : vector<16x128xf32>
    %559 = vector.shape_cast %558 : vector<16x128xf32> to vector<2x8x128xf32>
    %c0_211 = arith.constant 0 : index
    %c0_212 = arith.constant 0 : index
    %c0_213 = arith.constant 0 : index
    %560 = vector.load %arg16[%c0_211, %c0_212, %c0_213] : memref<2x8x128xf32, #tpu.memory_space<vmem>>, vector<2x8x128xf32>
    tpu.vector_store %arg16[%c0_211, %c0_212, %c0_213], %559 {strides = array<i32>} : memref<2x8x128xf32, #tpu.memory_space<vmem>>, vector<2x8x128xf32>,
    %c2_214 = arith.constant 2 : index
    %c0_215 = arith.constant 0 : index
    %c0_216 = arith.constant 0 : index
    %561 = vector.load %arg5[%c2_214, %c0_215, %c0_216] : memref<3x32x128xf32, #tpu.memory_space<vmem>>, vector<1x32x128xf32>
    %562 = vector.shape_cast %561 : vector<1x32x128xf32> to vector<32x128xf32>
    %cst_217 = arith.constant 0.000000e+00 : f32
    %563 = vector.broadcast %cst_217 : f32 to vector<2x32xf32>
    %cst_218 = arith.constant 0.000000e+00 : f32
    %564 = vector.broadcast %cst_218 : f32 to vector<2x32xf32>
    %c0_i32_219 = arith.constant 0 : i32
    %c0_220 = arith.constant 0 : index
    %565 = arith.index_cast %c0_i32_219 : i32 to index
    %c0_221 = arith.constant 0 : index
    %566 = vector.load %arg16[%c0_220, %565, %c0_221] : memref<2x8x128xf32, #tpu.memory_space<vmem>>, vector<2x1x128xf32>
    %567 = vector.shape_cast %566 : vector<2x1x128xf32> to vector<2x128xf32>
    %cst_222 = arith.constant dense<0.000000e+00> : vector<2x128xf32>
    %568 = tpu.matmul %563, %562, %cst_222 {dimension_numbers = #tpu.dot_dimension_numbers<[1], [0], [0], [1], [0, 0, 1, 1], [], []>} : vector<2x32xf32>, vector<32x128xf32>, vector<2x128xf32> -> vector<2x128xf32>
    %569 = arith.addf %567, %568 : vector<2x128xf32>
    %570 = tpu.iota {dimensions = array<i32: 1>} : vector<2x128xi32>
    %c64_i32_223 = arith.constant 64 : i32
    %571 = vector.broadcast %c64_i32_223 : i32 to vector<2x128xi32>
    %572 = arith.cmpi sge, %570, %571 : vector<2x128xi32>
    %c96_i32_224 = arith.constant 96 : i32
    %573 = vector.broadcast %c96_i32_224 : i32 to vector<2x128xi32>
    %574 = arith.cmpi slt, %570, %573 : vector<2x128xi32>
    %575 = arith.andi %572, %574 : vector<2x128xi1>
    %cst_225 = arith.constant 5.000000e-01 : f32
    %576 = vector.broadcast %cst_225 : f32 to vector<2x128xf32>
    %577 = arith.mulf %576, %569 : vector<2x128xf32>
    %578 = arith.select %575, %569, %577 : vector<2x128xi1>, vector<2x128xf32>
    %579 = math.tanh %578 : vector<2x128xf32>
    %cst_226 = arith.constant 5.000000e-01 : f32
    %580 = vector.broadcast %cst_226 : f32 to vector<2x128xf32>
    %581 = arith.mulf %580, %579 : vector<2x128xf32>
    %cst_227 = arith.constant 5.000000e-01 : f32
    %582 = vector.broadcast %cst_227 : f32 to vector<2x128xf32>
    %583 = arith.addf %581, %582 : vector<2x128xf32>
    %584 = arith.select %575, %579, %583 : vector<2x128xi1>, vector<2x128xf32>
    %585 = vector.extract_strided_slice %584 {offsets = [0, 0], sizes = [2, 32], strides = [1, 1]} : vector<2x128xf32> to vector<2x32xf32>
    %586 = vector.extract_strided_slice %584 {offsets = [0, 32], sizes = [2, 32], strides = [1, 1]} : vector<2x128xf32> to vector<2x32xf32>
    %587 = vector.extract_strided_slice %584 {offsets = [0, 64], sizes = [2, 32], strides = [1, 1]} : vector<2x128xf32> to vector<2x32xf32>
    %588 = vector.extract_strided_slice %584 {offsets = [0, 96], sizes = [2, 32], strides = [1, 1]} : vector<2x128xf32> to vector<2x32xf32>
    %589 = arith.mulf %586, %564 : vector<2x32xf32>
    %590 = arith.mulf %585, %587 : vector<2x32xf32>
    %591 = arith.addf %589, %590 : vector<2x32xf32>
    %592 = math.tanh %591 : vector<2x32xf32>
    %593 = arith.mulf %588, %592 : vector<2x32xf32>
    %594 = vector.shape_cast %593 : vector<2x32xf32> to vector<2x1x32xf32>
    %c0_228 = arith.constant 0 : index
    %595 = arith.index_cast %c0_i32_219 : i32 to index
    %c0_229 = arith.constant 0 : index
    %596 = vector.load %arg15[%c0_228, %595, %c0_229] : memref<2x8x32xf32, #tpu.memory_space<vmem>>, vector<2x1x32xf32>
    tpu.vector_store %arg15[%c0_228, %595, %c0_229], %594 {strides = array<i32>} : memref<2x8x32xf32, #tpu.memory_space<vmem>>, vector<2x1x32xf32>,
    %c1_i32_230 = arith.constant 1 : i32
    %c0_231 = arith.constant 0 : index
    %597 = arith.index_cast %c1_i32_230 : i32 to index
    %c0_232 = arith.constant 0 : index
    %598 = vector.load %arg16[%c0_231, %597, %c0_232] : memref<2x8x128xf32, #tpu.memory_space<vmem>>, vector<2x1x128xf32>
    %599 = vector.shape_cast %598 : vector<2x1x128xf32> to vector<2x128xf32>
    %cst_233 = arith.constant dense<0.000000e+00> : vector<2x128xf32>
    %600 = tpu.matmul %593, %562, %cst_233 {dimension_numbers = #tpu.dot_dimension_numbers<[1], [0], [0], [1], [0, 0, 1, 1], [], []>} : vector<2x32xf32>, vector<32x128xf32>, vector<2x128xf32> -> vector<2x128xf32>
    %601 = arith.addf %599, %600 : vector<2x128xf32>
    %602 = tpu.iota {dimensions = array<i32: 1>} : vector<2x128xi32>
    %c64_i32_234 = arith.constant 64 : i32
    %603 = vector.broadcast %c64_i32_234 : i32 to vector<2x128xi32>
    %604 = arith.cmpi sge, %602, %603 : vector<2x128xi32>
    %c96_i32_235 = arith.constant 96 : i32
    %605 = vector.broadcast %c96_i32_235 : i32 to vector<2x128xi32>
    %606 = arith.cmpi slt, %602, %605 : vector<2x128xi32>
    %607 = arith.andi %604, %606 : vector<2x128xi1>
    %cst_236 = arith.constant 5.000000e-01 : f32
    %608 = vector.broadcast %cst_236 : f32 to vector<2x128xf32>
    %609 = arith.mulf %608, %601 : vector<2x128xf32>
    %610 = arith.select %607, %601, %609 : vector<2x128xi1>, vector<2x128xf32>
    %611 = math.tanh %610 : vector<2x128xf32>
    %cst_237 = arith.constant 5.000000e-01 : f32
    %612 = vector.broadcast %cst_237 : f32 to vector<2x128xf32>
    %613 = arith.mulf %612, %611 : vector<2x128xf32>
    %cst_238 = arith.constant 5.000000e-01 : f32
    %614 = vector.broadcast %cst_238 : f32 to vector<2x128xf32>
    %615 = arith.addf %613, %614 : vector<2x128xf32>
    %616 = arith.select %607, %611, %615 : vector<2x128xi1>, vector<2x128xf32>
    %617 = vector.extract_strided_slice %616 {offsets = [0, 0], sizes = [2, 32], strides = [1, 1]} : vector<2x128xf32> to vector<2x32xf32>
    %618 = vector.extract_strided_slice %616 {offsets = [0, 32], sizes = [2, 32], strides = [1, 1]} : vector<2x128xf32> to vector<2x32xf32>
    %619 = vector.extract_strided_slice %616 {offsets = [0, 64], sizes = [2, 32], strides = [1, 1]} : vector<2x128xf32> to vector<2x32xf32>
    %620 = vector.extract_strided_slice %616 {offsets = [0, 96], sizes = [2, 32], strides = [1, 1]} : vector<2x128xf32> to vector<2x32xf32>
    %621 = arith.mulf %618, %591 : vector<2x32xf32>
    %622 = arith.mulf %617, %619 : vector<2x32xf32>
    %623 = arith.addf %621, %622 : vector<2x32xf32>
    %624 = math.tanh %623 : vector<2x32xf32>
    %625 = arith.mulf %620, %624 : vector<2x32xf32>
    %626 = vector.shape_cast %625 : vector<2x32xf32> to vector<2x1x32xf32>
    %c0_239 = arith.constant 0 : index
    %627 = arith.index_cast %c1_i32_230 : i32 to index
    %c0_240 = arith.constant 0 : index
    %628 = vector.load %arg15[%c0_239, %627, %c0_240] : memref<2x8x32xf32, #tpu.memory_space<vmem>>, vector<2x1x32xf32>
    tpu.vector_store %arg15[%c0_239, %627, %c0_240], %626 {strides = array<i32>} : memref<2x8x32xf32, #tpu.memory_space<vmem>>, vector<2x1x32xf32>,
    %c2_i32_241 = arith.constant 2 : i32
    %c0_242 = arith.constant 0 : index
    %629 = arith.index_cast %c2_i32_241 : i32 to index
    %c0_243 = arith.constant 0 : index
    %630 = vector.load %arg16[%c0_242, %629, %c0_243] : memref<2x8x128xf32, #tpu.memory_space<vmem>>, vector<2x1x128xf32>
    %631 = vector.shape_cast %630 : vector<2x1x128xf32> to vector<2x128xf32>
    %cst_244 = arith.constant dense<0.000000e+00> : vector<2x128xf32>
    %632 = tpu.matmul %625, %562, %cst_244 {dimension_numbers = #tpu.dot_dimension_numbers<[1], [0], [0], [1], [0, 0, 1, 1], [], []>} : vector<2x32xf32>, vector<32x128xf32>, vector<2x128xf32> -> vector<2x128xf32>
    %633 = arith.addf %631, %632 : vector<2x128xf32>
    %634 = tpu.iota {dimensions = array<i32: 1>} : vector<2x128xi32>
    %c64_i32_245 = arith.constant 64 : i32
    %635 = vector.broadcast %c64_i32_245 : i32 to vector<2x128xi32>
    %636 = arith.cmpi sge, %634, %635 : vector<2x128xi32>
    %c96_i32_246 = arith.constant 96 : i32
    %637 = vector.broadcast %c96_i32_246 : i32 to vector<2x128xi32>
    %638 = arith.cmpi slt, %634, %637 : vector<2x128xi32>
    %639 = arith.andi %636, %638 : vector<2x128xi1>
    %cst_247 = arith.constant 5.000000e-01 : f32
    %640 = vector.broadcast %cst_247 : f32 to vector<2x128xf32>
    %641 = arith.mulf %640, %633 : vector<2x128xf32>
    %642 = arith.select %639, %633, %641 : vector<2x128xi1>, vector<2x128xf32>
    %643 = math.tanh %642 : vector<2x128xf32>
    %cst_248 = arith.constant 5.000000e-01 : f32
    %644 = vector.broadcast %cst_248 : f32 to vector<2x128xf32>
    %645 = arith.mulf %644, %643 : vector<2x128xf32>
    %cst_249 = arith.constant 5.000000e-01 : f32
    %646 = vector.broadcast %cst_249 : f32 to vector<2x128xf32>
    %647 = arith.addf %645, %646 : vector<2x128xf32>
    %648 = arith.select %639, %643, %647 : vector<2x128xi1>, vector<2x128xf32>
    %649 = vector.extract_strided_slice %648 {offsets = [0, 0], sizes = [2, 32], strides = [1, 1]} : vector<2x128xf32> to vector<2x32xf32>
    %650 = vector.extract_strided_slice %648 {offsets = [0, 32], sizes = [2, 32], strides = [1, 1]} : vector<2x128xf32> to vector<2x32xf32>
    %651 = vector.extract_strided_slice %648 {offsets = [0, 64], sizes = [2, 32], strides = [1, 1]} : vector<2x128xf32> to vector<2x32xf32>
    %652 = vector.extract_strided_slice %648 {offsets = [0, 96], sizes = [2, 32], strides = [1, 1]} : vector<2x128xf32> to vector<2x32xf32>
    %653 = arith.mulf %650, %623 : vector<2x32xf32>
    %654 = arith.mulf %649, %651 : vector<2x32xf32>
    %655 = arith.addf %653, %654 : vector<2x32xf32>
    %656 = math.tanh %655 : vector<2x32xf32>
    %657 = arith.mulf %652, %656 : vector<2x32xf32>
    %658 = vector.shape_cast %657 : vector<2x32xf32> to vector<2x1x32xf32>
    %c0_250 = arith.constant 0 : index
    %659 = arith.index_cast %c2_i32_241 : i32 to index
    %c0_251 = arith.constant 0 : index
    %660 = vector.load %arg15[%c0_250, %659, %c0_251] : memref<2x8x32xf32, #tpu.memory_space<vmem>>, vector<2x1x32xf32>
    tpu.vector_store %arg15[%c0_250, %659, %c0_251], %658 {strides = array<i32>} : memref<2x8x32xf32, #tpu.memory_space<vmem>>, vector<2x1x32xf32>,
    %c3_i32_252 = arith.constant 3 : i32
    %c0_253 = arith.constant 0 : index
    %661 = arith.index_cast %c3_i32_252 : i32 to index
    %c0_254 = arith.constant 0 : index
    %662 = vector.load %arg16[%c0_253, %661, %c0_254] : memref<2x8x128xf32, #tpu.memory_space<vmem>>, vector<2x1x128xf32>
    %663 = vector.shape_cast %662 : vector<2x1x128xf32> to vector<2x128xf32>
    %cst_255 = arith.constant dense<0.000000e+00> : vector<2x128xf32>
    %664 = tpu.matmul %657, %562, %cst_255 {dimension_numbers = #tpu.dot_dimension_numbers<[1], [0], [0], [1], [0, 0, 1, 1], [], []>} : vector<2x32xf32>, vector<32x128xf32>, vector<2x128xf32> -> vector<2x128xf32>
    %665 = arith.addf %663, %664 : vector<2x128xf32>
    %666 = tpu.iota {dimensions = array<i32: 1>} : vector<2x128xi32>
    %c64_i32_256 = arith.constant 64 : i32
    %667 = vector.broadcast %c64_i32_256 : i32 to vector<2x128xi32>
    %668 = arith.cmpi sge, %666, %667 : vector<2x128xi32>
    %c96_i32_257 = arith.constant 96 : i32
    %669 = vector.broadcast %c96_i32_257 : i32 to vector<2x128xi32>
    %670 = arith.cmpi slt, %666, %669 : vector<2x128xi32>
    %671 = arith.andi %668, %670 : vector<2x128xi1>
    %cst_258 = arith.constant 5.000000e-01 : f32
    %672 = vector.broadcast %cst_258 : f32 to vector<2x128xf32>
    %673 = arith.mulf %672, %665 : vector<2x128xf32>
    %674 = arith.select %671, %665, %673 : vector<2x128xi1>, vector<2x128xf32>
    %675 = math.tanh %674 : vector<2x128xf32>
    %cst_259 = arith.constant 5.000000e-01 : f32
    %676 = vector.broadcast %cst_259 : f32 to vector<2x128xf32>
    %677 = arith.mulf %676, %675 : vector<2x128xf32>
    %cst_260 = arith.constant 5.000000e-01 : f32
    %678 = vector.broadcast %cst_260 : f32 to vector<2x128xf32>
    %679 = arith.addf %677, %678 : vector<2x128xf32>
    %680 = arith.select %671, %675, %679 : vector<2x128xi1>, vector<2x128xf32>
    %681 = vector.extract_strided_slice %680 {offsets = [0, 0], sizes = [2, 32], strides = [1, 1]} : vector<2x128xf32> to vector<2x32xf32>
    %682 = vector.extract_strided_slice %680 {offsets = [0, 32], sizes = [2, 32], strides = [1, 1]} : vector<2x128xf32> to vector<2x32xf32>
    %683 = vector.extract_strided_slice %680 {offsets = [0, 64], sizes = [2, 32], strides = [1, 1]} : vector<2x128xf32> to vector<2x32xf32>
    %684 = vector.extract_strided_slice %680 {offsets = [0, 96], sizes = [2, 32], strides = [1, 1]} : vector<2x128xf32> to vector<2x32xf32>
    %685 = arith.mulf %682, %655 : vector<2x32xf32>
    %686 = arith.mulf %681, %683 : vector<2x32xf32>
    %687 = arith.addf %685, %686 : vector<2x32xf32>
    %688 = math.tanh %687 : vector<2x32xf32>
    %689 = arith.mulf %684, %688 : vector<2x32xf32>
    %690 = vector.shape_cast %689 : vector<2x32xf32> to vector<2x1x32xf32>
    %c0_261 = arith.constant 0 : index
    %691 = arith.index_cast %c3_i32_252 : i32 to index
    %c0_262 = arith.constant 0 : index
    %692 = vector.load %arg15[%c0_261, %691, %c0_262] : memref<2x8x32xf32, #tpu.memory_space<vmem>>, vector<2x1x32xf32>
    tpu.vector_store %arg15[%c0_261, %691, %c0_262], %690 {strides = array<i32>} : memref<2x8x32xf32, #tpu.memory_space<vmem>>, vector<2x1x32xf32>,
    %c4_i32_263 = arith.constant 4 : i32
    %c0_264 = arith.constant 0 : index
    %693 = arith.index_cast %c4_i32_263 : i32 to index
    %c0_265 = arith.constant 0 : index
    %694 = vector.load %arg16[%c0_264, %693, %c0_265] : memref<2x8x128xf32, #tpu.memory_space<vmem>>, vector<2x1x128xf32>
    %695 = vector.shape_cast %694 : vector<2x1x128xf32> to vector<2x128xf32>
    %cst_266 = arith.constant dense<0.000000e+00> : vector<2x128xf32>
    %696 = tpu.matmul %689, %562, %cst_266 {dimension_numbers = #tpu.dot_dimension_numbers<[1], [0], [0], [1], [0, 0, 1, 1], [], []>} : vector<2x32xf32>, vector<32x128xf32>, vector<2x128xf32> -> vector<2x128xf32>
    %697 = arith.addf %695, %696 : vector<2x128xf32>
    %698 = tpu.iota {dimensions = array<i32: 1>} : vector<2x128xi32>
    %c64_i32_267 = arith.constant 64 : i32
    %699 = vector.broadcast %c64_i32_267 : i32 to vector<2x128xi32>
    %700 = arith.cmpi sge, %698, %699 : vector<2x128xi32>
    %c96_i32_268 = arith.constant 96 : i32
    %701 = vector.broadcast %c96_i32_268 : i32 to vector<2x128xi32>
    %702 = arith.cmpi slt, %698, %701 : vector<2x128xi32>
    %703 = arith.andi %700, %702 : vector<2x128xi1>
    %cst_269 = arith.constant 5.000000e-01 : f32
    %704 = vector.broadcast %cst_269 : f32 to vector<2x128xf32>
    %705 = arith.mulf %704, %697 : vector<2x128xf32>
    %706 = arith.select %703, %697, %705 : vector<2x128xi1>, vector<2x128xf32>
    %707 = math.tanh %706 : vector<2x128xf32>
    %cst_270 = arith.constant 5.000000e-01 : f32
    %708 = vector.broadcast %cst_270 : f32 to vector<2x128xf32>
    %709 = arith.mulf %708, %707 : vector<2x128xf32>
    %cst_271 = arith.constant 5.000000e-01 : f32
    %710 = vector.broadcast %cst_271 : f32 to vector<2x128xf32>
    %711 = arith.addf %709, %710 : vector<2x128xf32>
    %712 = arith.select %703, %707, %711 : vector<2x128xi1>, vector<2x128xf32>
    %713 = vector.extract_strided_slice %712 {offsets = [0, 0], sizes = [2, 32], strides = [1, 1]} : vector<2x128xf32> to vector<2x32xf32>
    %714 = vector.extract_strided_slice %712 {offsets = [0, 32], sizes = [2, 32], strides = [1, 1]} : vector<2x128xf32> to vector<2x32xf32>
    %715 = vector.extract_strided_slice %712 {offsets = [0, 64], sizes = [2, 32], strides = [1, 1]} : vector<2x128xf32> to vector<2x32xf32>
    %716 = vector.extract_strided_slice %712 {offsets = [0, 96], sizes = [2, 32], strides = [1, 1]} : vector<2x128xf32> to vector<2x32xf32>
    %717 = arith.mulf %714, %687 : vector<2x32xf32>
    %718 = arith.mulf %713, %715 : vector<2x32xf32>
    %719 = arith.addf %717, %718 : vector<2x32xf32>
    %720 = math.tanh %719 : vector<2x32xf32>
    %721 = arith.mulf %716, %720 : vector<2x32xf32>
    %722 = vector.shape_cast %721 : vector<2x32xf32> to vector<2x1x32xf32>
    %c0_272 = arith.constant 0 : index
    %723 = arith.index_cast %c4_i32_263 : i32 to index
    %c0_273 = arith.constant 0 : index
    %724 = vector.load %arg15[%c0_272, %723, %c0_273] : memref<2x8x32xf32, #tpu.memory_space<vmem>>, vector<2x1x32xf32>
    tpu.vector_store %arg15[%c0_272, %723, %c0_273], %722 {strides = array<i32>} : memref<2x8x32xf32, #tpu.memory_space<vmem>>, vector<2x1x32xf32>,
    %c5_i32_274 = arith.constant 5 : i32
    %c0_275 = arith.constant 0 : index
    %725 = arith.index_cast %c5_i32_274 : i32 to index
    %c0_276 = arith.constant 0 : index
    %726 = vector.load %arg16[%c0_275, %725, %c0_276] : memref<2x8x128xf32, #tpu.memory_space<vmem>>, vector<2x1x128xf32>
    %727 = vector.shape_cast %726 : vector<2x1x128xf32> to vector<2x128xf32>
    %cst_277 = arith.constant dense<0.000000e+00> : vector<2x128xf32>
    %728 = tpu.matmul %721, %562, %cst_277 {dimension_numbers = #tpu.dot_dimension_numbers<[1], [0], [0], [1], [0, 0, 1, 1], [], []>} : vector<2x32xf32>, vector<32x128xf32>, vector<2x128xf32> -> vector<2x128xf32>
    %729 = arith.addf %727, %728 : vector<2x128xf32>
    %730 = tpu.iota {dimensions = array<i32: 1>} : vector<2x128xi32>
    %c64_i32_278 = arith.constant 64 : i32
    %731 = vector.broadcast %c64_i32_278 : i32 to vector<2x128xi32>
    %732 = arith.cmpi sge, %730, %731 : vector<2x128xi32>
    %c96_i32_279 = arith.constant 96 : i32
    %733 = vector.broadcast %c96_i32_279 : i32 to vector<2x128xi32>
    %734 = arith.cmpi slt, %730, %733 : vector<2x128xi32>
    %735 = arith.andi %732, %734 : vector<2x128xi1>
    %cst_280 = arith.constant 5.000000e-01 : f32
    %736 = vector.broadcast %cst_280 : f32 to vector<2x128xf32>
    %737 = arith.mulf %736, %729 : vector<2x128xf32>
    %738 = arith.select %735, %729, %737 : vector<2x128xi1>, vector<2x128xf32>
    %739 = math.tanh %738 : vector<2x128xf32>
    %cst_281 = arith.constant 5.000000e-01 : f32
    %740 = vector.broadcast %cst_281 : f32 to vector<2x128xf32>
    %741 = arith.mulf %740, %739 : vector<2x128xf32>
    %cst_282 = arith.constant 5.000000e-01 : f32
    %742 = vector.broadcast %cst_282 : f32 to vector<2x128xf32>
    %743 = arith.addf %741, %742 : vector<2x128xf32>
    %744 = arith.select %735, %739, %743 : vector<2x128xi1>, vector<2x128xf32>
    %745 = vector.extract_strided_slice %744 {offsets = [0, 0], sizes = [2, 32], strides = [1, 1]} : vector<2x128xf32> to vector<2x32xf32>
    %746 = vector.extract_strided_slice %744 {offsets = [0, 32], sizes = [2, 32], strides = [1, 1]} : vector<2x128xf32> to vector<2x32xf32>
    %747 = vector.extract_strided_slice %744 {offsets = [0, 64], sizes = [2, 32], strides = [1, 1]} : vector<2x128xf32> to vector<2x32xf32>
    %748 = vector.extract_strided_slice %744 {offsets = [0, 96], sizes = [2, 32], strides = [1, 1]} : vector<2x128xf32> to vector<2x32xf32>
    %749 = arith.mulf %746, %719 : vector<2x32xf32>
    %750 = arith.mulf %745, %747 : vector<2x32xf32>
    %751 = arith.addf %749, %750 : vector<2x32xf32>
    %752 = math.tanh %751 : vector<2x32xf32>
    %753 = arith.mulf %748, %752 : vector<2x32xf32>
    %754 = vector.shape_cast %753 : vector<2x32xf32> to vector<2x1x32xf32>
    %c0_283 = arith.constant 0 : index
    %755 = arith.index_cast %c5_i32_274 : i32 to index
    %c0_284 = arith.constant 0 : index
    %756 = vector.load %arg15[%c0_283, %755, %c0_284] : memref<2x8x32xf32, #tpu.memory_space<vmem>>, vector<2x1x32xf32>
    tpu.vector_store %arg15[%c0_283, %755, %c0_284], %754 {strides = array<i32>} : memref<2x8x32xf32, #tpu.memory_space<vmem>>, vector<2x1x32xf32>,
    %c6_i32_285 = arith.constant 6 : i32
    %c0_286 = arith.constant 0 : index
    %757 = arith.index_cast %c6_i32_285 : i32 to index
    %c0_287 = arith.constant 0 : index
    %758 = vector.load %arg16[%c0_286, %757, %c0_287] : memref<2x8x128xf32, #tpu.memory_space<vmem>>, vector<2x1x128xf32>
    %759 = vector.shape_cast %758 : vector<2x1x128xf32> to vector<2x128xf32>
    %cst_288 = arith.constant dense<0.000000e+00> : vector<2x128xf32>
    %760 = tpu.matmul %753, %562, %cst_288 {dimension_numbers = #tpu.dot_dimension_numbers<[1], [0], [0], [1], [0, 0, 1, 1], [], []>} : vector<2x32xf32>, vector<32x128xf32>, vector<2x128xf32> -> vector<2x128xf32>
    %761 = arith.addf %759, %760 : vector<2x128xf32>
    %762 = tpu.iota {dimensions = array<i32: 1>} : vector<2x128xi32>
    %c64_i32_289 = arith.constant 64 : i32
    %763 = vector.broadcast %c64_i32_289 : i32 to vector<2x128xi32>
    %764 = arith.cmpi sge, %762, %763 : vector<2x128xi32>
    %c96_i32_290 = arith.constant 96 : i32
    %765 = vector.broadcast %c96_i32_290 : i32 to vector<2x128xi32>
    %766 = arith.cmpi slt, %762, %765 : vector<2x128xi32>
    %767 = arith.andi %764, %766 : vector<2x128xi1>
    %cst_291 = arith.constant 5.000000e-01 : f32
    %768 = vector.broadcast %cst_291 : f32 to vector<2x128xf32>
    %769 = arith.mulf %768, %761 : vector<2x128xf32>
    %770 = arith.select %767, %761, %769 : vector<2x128xi1>, vector<2x128xf32>
    %771 = math.tanh %770 : vector<2x128xf32>
    %cst_292 = arith.constant 5.000000e-01 : f32
    %772 = vector.broadcast %cst_292 : f32 to vector<2x128xf32>
    %773 = arith.mulf %772, %771 : vector<2x128xf32>
    %cst_293 = arith.constant 5.000000e-01 : f32
    %774 = vector.broadcast %cst_293 : f32 to vector<2x128xf32>
    %775 = arith.addf %773, %774 : vector<2x128xf32>
    %776 = arith.select %767, %771, %775 : vector<2x128xi1>, vector<2x128xf32>
    %777 = vector.extract_strided_slice %776 {offsets = [0, 0], sizes = [2, 32], strides = [1, 1]} : vector<2x128xf32> to vector<2x32xf32>
    %778 = vector.extract_strided_slice %776 {offsets = [0, 32], sizes = [2, 32], strides = [1, 1]} : vector<2x128xf32> to vector<2x32xf32>
    %779 = vector.extract_strided_slice %776 {offsets = [0, 64], sizes = [2, 32], strides = [1, 1]} : vector<2x128xf32> to vector<2x32xf32>
    %780 = vector.extract_strided_slice %776 {offsets = [0, 96], sizes = [2, 32], strides = [1, 1]} : vector<2x128xf32> to vector<2x32xf32>
    %781 = arith.mulf %778, %751 : vector<2x32xf32>
    %782 = arith.mulf %777, %779 : vector<2x32xf32>
    %783 = arith.addf %781, %782 : vector<2x32xf32>
    %784 = math.tanh %783 : vector<2x32xf32>
    %785 = arith.mulf %780, %784 : vector<2x32xf32>
    %786 = vector.shape_cast %785 : vector<2x32xf32> to vector<2x1x32xf32>
    %c0_294 = arith.constant 0 : index
    %787 = arith.index_cast %c6_i32_285 : i32 to index
    %c0_295 = arith.constant 0 : index
    %788 = vector.load %arg15[%c0_294, %787, %c0_295] : memref<2x8x32xf32, #tpu.memory_space<vmem>>, vector<2x1x32xf32>
    tpu.vector_store %arg15[%c0_294, %787, %c0_295], %786 {strides = array<i32>} : memref<2x8x32xf32, #tpu.memory_space<vmem>>, vector<2x1x32xf32>,
    %c7_i32_296 = arith.constant 7 : i32
    %c0_297 = arith.constant 0 : index
    %789 = arith.index_cast %c7_i32_296 : i32 to index
    %c0_298 = arith.constant 0 : index
    %790 = vector.load %arg16[%c0_297, %789, %c0_298] : memref<2x8x128xf32, #tpu.memory_space<vmem>>, vector<2x1x128xf32>
    %791 = vector.shape_cast %790 : vector<2x1x128xf32> to vector<2x128xf32>
    %cst_299 = arith.constant dense<0.000000e+00> : vector<2x128xf32>
    %792 = tpu.matmul %785, %562, %cst_299 {dimension_numbers = #tpu.dot_dimension_numbers<[1], [0], [0], [1], [0, 0, 1, 1], [], []>} : vector<2x32xf32>, vector<32x128xf32>, vector<2x128xf32> -> vector<2x128xf32>
    %793 = arith.addf %791, %792 : vector<2x128xf32>
    %794 = tpu.iota {dimensions = array<i32: 1>} : vector<2x128xi32>
    %c64_i32_300 = arith.constant 64 : i32
    %795 = vector.broadcast %c64_i32_300 : i32 to vector<2x128xi32>
    %796 = arith.cmpi sge, %794, %795 : vector<2x128xi32>
    %c96_i32_301 = arith.constant 96 : i32
    %797 = vector.broadcast %c96_i32_301 : i32 to vector<2x128xi32>
    %798 = arith.cmpi slt, %794, %797 : vector<2x128xi32>
    %799 = arith.andi %796, %798 : vector<2x128xi1>
    %cst_302 = arith.constant 5.000000e-01 : f32
    %800 = vector.broadcast %cst_302 : f32 to vector<2x128xf32>
    %801 = arith.mulf %800, %793 : vector<2x128xf32>
    %802 = arith.select %799, %793, %801 : vector<2x128xi1>, vector<2x128xf32>
    %803 = math.tanh %802 : vector<2x128xf32>
    %cst_303 = arith.constant 5.000000e-01 : f32
    %804 = vector.broadcast %cst_303 : f32 to vector<2x128xf32>
    %805 = arith.mulf %804, %803 : vector<2x128xf32>
    %cst_304 = arith.constant 5.000000e-01 : f32
    %806 = vector.broadcast %cst_304 : f32 to vector<2x128xf32>
    %807 = arith.addf %805, %806 : vector<2x128xf32>
    %808 = arith.select %799, %803, %807 : vector<2x128xi1>, vector<2x128xf32>
    %809 = vector.extract_strided_slice %808 {offsets = [0, 0], sizes = [2, 32], strides = [1, 1]} : vector<2x128xf32> to vector<2x32xf32>
    %810 = vector.extract_strided_slice %808 {offsets = [0, 32], sizes = [2, 32], strides = [1, 1]} : vector<2x128xf32> to vector<2x32xf32>
    %811 = vector.extract_strided_slice %808 {offsets = [0, 64], sizes = [2, 32], strides = [1, 1]} : vector<2x128xf32> to vector<2x32xf32>
    %812 = vector.extract_strided_slice %808 {offsets = [0, 96], sizes = [2, 32], strides = [1, 1]} : vector<2x128xf32> to vector<2x32xf32>
    %813 = arith.mulf %810, %783 : vector<2x32xf32>
    %814 = arith.mulf %809, %811 : vector<2x32xf32>
    %815 = arith.addf %813, %814 : vector<2x32xf32>
    %816 = math.tanh %815 : vector<2x32xf32>
    %817 = arith.mulf %812, %816 : vector<2x32xf32>
    %818 = vector.shape_cast %817 : vector<2x32xf32> to vector<2x1x32xf32>
    %c0_305 = arith.constant 0 : index
    %819 = arith.index_cast %c7_i32_296 : i32 to index
    %c0_306 = arith.constant 0 : index
    %820 = vector.load %arg15[%c0_305, %819, %c0_306] : memref<2x8x32xf32, #tpu.memory_space<vmem>>, vector<2x1x32xf32>
    tpu.vector_store %arg15[%c0_305, %819, %c0_306], %818 {strides = array<i32>} : memref<2x8x32xf32, #tpu.memory_space<vmem>>, vector<2x1x32xf32>,
    %c8_i32_307 = arith.constant 8 : i32
    %c0_308 = arith.constant 0 : index
    %c0_309 = arith.constant 0 : index
    %c0_310 = arith.constant 0 : index
    %821 = vector.load %arg15[%c0_308, %c0_309, %c0_310] : memref<2x8x32xf32, #tpu.memory_space<vmem>>, vector<2x8x32xf32>
    %822 = vector.shape_cast %821 : vector<2x8x32xf32> to vector<16x32xf32>
    %c0_311 = arith.constant 0 : index
    %c0_312 = arith.constant 0 : index
    %823 = vector.load %arg11[%c0_311, %c0_312] : memref<32x32xf32, #tpu.memory_space<vmem>>, vector<32x32xf32>
    %cst_313 = arith.constant dense<0.000000e+00> : vector<16x32xf32>
    %824 = tpu.matmul %822, %823, %cst_313 {dimension_numbers = #tpu.dot_dimension_numbers<[1], [0], [0], [1], [0, 0, 1, 1], [], []>} : vector<16x32xf32>, vector<32x32xf32>, vector<16x32xf32> -> vector<16x32xf32>
    %c0_314 = arith.constant 0 : index
    %c0_315 = arith.constant 0 : index
    %825 = vector.load %arg12[%c0_314, %c0_315] : memref<1x32xf32, #tpu.memory_space<vmem>>, vector<1x32xf32>
    %826 = vector.broadcast %825 : vector<1x32xf32> to vector<16x32xf32>
    %827 = arith.addf %824, %826 : vector<16x32xf32>
    %828 = vector.shape_cast %827 : vector<16x32xf32> to vector<2x8x32xf32>
    %c0_316 = arith.constant 0 : index
    %c0_317 = arith.constant 0 : index
    %c0_318 = arith.constant 0 : index
    %829 = vector.load %arg17[%c0_316, %c0_317, %c0_318] : memref<2x8x32xf32, #tpu.memory_space<vmem>>, vector<2x8x32xf32>
    tpu.vector_store %arg17[%c0_316, %c0_317, %c0_318], %828 {strides = array<i32>} : memref<2x8x32xf32, #tpu.memory_space<vmem>>, vector<2x8x32xf32>,
    %cst_319 = arith.constant 0.000000e+00 : f32
    %830 = vector.broadcast %cst_319 : f32 to vector<3x2x32xf32>
    %c0_320 = arith.constant 0 : index
    %c0_321 = arith.constant 0 : index
    %c0_322 = arith.constant 0 : index
    %831 = vector.load %arg18[%c0_320, %c0_321, %c0_322] : memref<3x2x32xf32, #tpu.memory_space<vmem>>, vector<3x2x32xf32>
    tpu.vector_store %arg18[%c0_320, %c0_321, %c0_322], %830 {strides = array<i32>} : memref<3x2x32xf32, #tpu.memory_space<vmem>>, vector<3x2x32xf32>,
    %cst_323 = arith.constant 0.000000e+00 : f32
    %832 = vector.broadcast %cst_323 : f32 to vector<3x2x32xf32>
    %c0_324 = arith.constant 0 : index
    %c0_325 = arith.constant 0 : index
    %c0_326 = arith.constant 0 : index
    %833 = vector.load %arg19[%c0_324, %c0_325, %c0_326] : memref<3x2x32xf32, #tpu.memory_space<vmem>>, vector<3x2x32xf32>
    tpu.vector_store %arg19[%c0_324, %c0_325, %c0_326], %832 {strides = array<i32>} : memref<3x2x32xf32, #tpu.memory_space<vmem>>, vector<3x2x32xf32>,
    %cst_327 = arith.constant 0.000000e+00 : f32
    %834 = vector.broadcast %cst_327 : f32 to vector<2x32xf32>
    %c0_328 = arith.constant 0 : index
    %c0_329 = arith.constant 0 : index
    %835 = vector.load %arg20[%c0_328, %c0_329] : memref<2x32xf32, #tpu.memory_space<vmem>>, vector<2x32xf32>
    tpu.vector_store %arg20[%c0_328, %c0_329], %834 {strides = array<i32>} : memref<2x32xf32, #tpu.memory_space<vmem>>, vector<2x32xf32>,
    %cst_330 = arith.constant 0.000000e+00 : f32
    %836 = vector.broadcast %cst_330 : f32 to vector<2x8xf32>
    %c0_331 = arith.constant 0 : index
    %c0_332 = arith.constant 0 : index
    %837 = vector.load %arg21[%c0_331, %c0_332] : memref<2x8xf32, #tpu.memory_space<vmem>>, vector<2x8xf32>
    tpu.vector_store %arg21[%c0_331, %c0_332], %836 {strides = array<i32>} : memref<2x8xf32, #tpu.memory_space<vmem>>, vector<2x8xf32>,
    %cst_333 = arith.constant 0.000000e+00 : f32
    %838 = vector.broadcast %cst_333 : f32 to vector<2x8xf32>
    %c0_334 = arith.constant 0 : index
    %c0_335 = arith.constant 0 : index
    %839 = vector.load %arg22[%c0_334, %c0_335] : memref<2x8xf32, #tpu.memory_space<vmem>>, vector<2x8xf32>
    tpu.vector_store %arg22[%c0_334, %c0_335], %838 {strides = array<i32>} : memref<2x8xf32, #tpu.memory_space<vmem>>, vector<2x8xf32>,
    %c0_i32_336 = arith.constant 0 : i32
    %840 = vector.broadcast %c0_i32_336 : i32 to vector<2x128xi32>
    %c0_337 = arith.constant 0 : index
    %c0_338 = arith.constant 0 : index
    %841 = vector.load %arg14[%c0_337, %c0_338] : memref<2x128xi32, #tpu.memory_space<vmem>>, vector<2x128xi32>
    tpu.vector_store %arg14[%c0_337, %c0_338], %840 {strides = array<i32>} : memref<2x128xi32, #tpu.memory_space<vmem>>, vector<2x128xi32>,
    %842 = tpu.iota {dimensions = array<i32: 1>} : vector<2x8xi32>
    %843 = tpu.iota {dimensions = array<i32: 1>} : vector<2x128xi32>
    %c0_i32_339 = arith.constant 0 : i32
    %c9_i32 = arith.constant 9 : i32
    %844 = arith.addi %c0_i32_339, %c9_i32 : i32
    %c1_i32_340 = arith.constant 1 : i32
    scf.for %arg24 = %c0_i32_339 to %844 step %c1_i32_340  : i32 {
      %c1_i32_342 = arith.constant 1 : i32
      %845 = arith.muli %arg24, %c1_i32_342 : i32
      %c0_i32_343 = arith.constant 0 : i32
      %846 = arith.addi %c0_i32_343, %845 : i32
      %c0_344 = arith.constant 0 : index
      %c0_345 = arith.constant 0 : index
      %847 = vector.load %arg21[%c0_344, %c0_345] : memref<2x8xf32, #tpu.memory_space<vmem>>, vector<2x8xf32>
      %c8_i32_346 = arith.constant 8 : i32
      %848 = arith.cmpi eq, %846, %c8_i32_346 : i32
      %c0_347 = arith.constant 0 : index
      %c0_348 = arith.constant 0 : index
      %849 = vector.load %arg22[%c0_347, %c0_348] : memref<2x8xf32, #tpu.memory_space<vmem>>, vector<2x8xf32>
      %cst_349 = arith.constant 1.000000e+00 : f32
      %850 = vector.broadcast %cst_349 : f32 to vector<2x8xf32>
      %851 = arith.subf %850, %849 : vector<2x8xf32>
      %852 = arith.mulf %847, %851 : vector<2x8xf32>
      %853 = arith.select %848, %852, %847 : vector<2x8xf32>
      %c0_350 = arith.constant 0 : index
      %c0_351 = arith.constant 0 : index
      %854 = vector.load %arg20[%c0_350, %c0_351] : memref<2x32xf32, #tpu.memory_space<vmem>>, vector<2x32xf32>
      %c0_352 = arith.constant 0 : index
      %c0_353 = arith.constant 0 : index
      %855 = vector.load %arg23[%c0_352, %c0_353] : memref<2x64xf32, #tpu.memory_space<vmem>>, vector<2x32xf32>
      tpu.vector_store %arg23[%c0_352, %c0_353], %854 {strides = array<i32>} : memref<2x64xf32, #tpu.memory_space<vmem>>, vector<2x32xf32>,
      %c0_354 = arith.constant 0 : index
      %c0_355 = arith.constant 0 : index
      %c0_356 = arith.constant 0 : index
      %856 = vector.load %arg18[%c0_354, %c0_355, %c0_356] : memref<3x2x32xf32, #tpu.memory_space<vmem>>, vector<1x2x32xf32>
      %857 = vector.shape_cast %856 : vector<1x2x32xf32> to vector<2x32xf32>
      %c0_357 = arith.constant 0 : index
      %c32 = arith.constant 32 : index
      %858 = vector.load %arg23[%c0_357, %c32] : memref<2x64xf32, #tpu.memory_space<vmem>>, vector<2x32xf32>
      tpu.vector_store %arg23[%c0_357, %c32], %857 {strides = array<i32>} : memref<2x64xf32, #tpu.memory_space<vmem>>, vector<2x32xf32>,
      %c0_358 = arith.constant 0 : index
      %c0_359 = arith.constant 0 : index
      %859 = vector.load %arg23[%c0_358, %c0_359] : memref<2x64xf32, #tpu.memory_space<vmem>>, vector<2x64xf32>
      %c0_360 = arith.constant 0 : index
      %c0_361 = arith.constant 0 : index
      %c0_362 = arith.constant 0 : index
      %860 = vector.load %arg7[%c0_360, %c0_361, %c0_362] : memref<3x64x128xf32, #tpu.memory_space<vmem>>, vector<1x64x128xf32>
      %861 = vector.shape_cast %860 : vector<1x64x128xf32> to vector<64x128xf32>
      %cst_363 = arith.constant dense<0.000000e+00> : vector<2x128xf32>
      %862 = tpu.matmul %859, %861, %cst_363 {dimension_numbers = #tpu.dot_dimension_numbers<[1], [0], [0], [1], [0, 0, 1, 1], [], []>} : vector<2x64xf32>, vector<64x128xf32>, vector<2x128xf32> -> vector<2x128xf32>
      %c0_364 = arith.constant 0 : index
      %c0_365 = arith.constant 0 : index
      %863 = vector.load %arg8[%c0_364, %c0_365] : memref<3x128xf32, #tpu.memory_space<vmem>>, vector<1x128xf32>
      %864 = vector.shape_cast %863 : vector<1x128xf32> to vector<128xf32>
      %865 = vector.shape_cast %864 : vector<128xf32> to vector<1x128xf32>
      %866 = vector.broadcast %865 : vector<1x128xf32> to vector<2x128xf32>
      %867 = arith.addf %862, %866 : vector<2x128xf32>
      %c0_366 = arith.constant 0 : index
      %c0_367 = arith.constant 0 : index
      %c0_368 = arith.constant 0 : index
      %868 = vector.load %arg19[%c0_366, %c0_367, %c0_368] : memref<3x2x32xf32, #tpu.memory_space<vmem>>, vector<1x2x32xf32>
      %869 = vector.shape_cast %868 : vector<1x2x32xf32> to vector<2x32xf32>
      %870 = tpu.iota {dimensions = array<i32: 1>} : vector<2x128xi32>
      %c64_i32_369 = arith.constant 64 : i32
      %871 = vector.broadcast %c64_i32_369 : i32 to vector<2x128xi32>
      %872 = arith.cmpi sge, %870, %871 : vector<2x128xi32>
      %c96_i32_370 = arith.constant 96 : i32
      %873 = vector.broadcast %c96_i32_370 : i32 to vector<2x128xi32>
      %874 = arith.cmpi slt, %870, %873 : vector<2x128xi32>
      %875 = arith.andi %872, %874 : vector<2x128xi1>
      %cst_371 = arith.constant 5.000000e-01 : f32
      %876 = vector.broadcast %cst_371 : f32 to vector<2x128xf32>
      %877 = arith.mulf %876, %867 : vector<2x128xf32>
      %878 = arith.select %875, %867, %877 : vector<2x128xi1>, vector<2x128xf32>
      %879 = math.tanh %878 : vector<2x128xf32>
      %cst_372 = arith.constant 5.000000e-01 : f32
      %880 = vector.broadcast %cst_372 : f32 to vector<2x128xf32>
      %881 = arith.mulf %880, %879 : vector<2x128xf32>
      %cst_373 = arith.constant 5.000000e-01 : f32
      %882 = vector.broadcast %cst_373 : f32 to vector<2x128xf32>
      %883 = arith.addf %881, %882 : vector<2x128xf32>
      %884 = arith.select %875, %879, %883 : vector<2x128xi1>, vector<2x128xf32>
      %885 = vector.extract_strided_slice %884 {offsets = [0, 0], sizes = [2, 32], strides = [1, 1]} : vector<2x128xf32> to vector<2x32xf32>
      %886 = vector.extract_strided_slice %884 {offsets = [0, 32], sizes = [2, 32], strides = [1, 1]} : vector<2x128xf32> to vector<2x32xf32>
      %887 = vector.extract_strided_slice %884 {offsets = [0, 64], sizes = [2, 32], strides = [1, 1]} : vector<2x128xf32> to vector<2x32xf32>
      %888 = vector.extract_strided_slice %884 {offsets = [0, 96], sizes = [2, 32], strides = [1, 1]} : vector<2x128xf32> to vector<2x32xf32>
      %889 = arith.mulf %886, %869 : vector<2x32xf32>
      %890 = arith.mulf %885, %887 : vector<2x32xf32>
      %891 = arith.addf %889, %890 : vector<2x32xf32>
      %892 = math.tanh %891 : vector<2x32xf32>
      %893 = arith.mulf %888, %892 : vector<2x32xf32>
      %c0_374 = arith.constant 0 : index
      %c0_375 = arith.constant 0 : index
      %c0_376 = arith.constant 0 : index
      %894 = vector.load %arg18[%c0_374, %c0_375, %c0_376] : memref<3x2x32xf32, #tpu.memory_space<vmem>>, vector<1x2x32xf32>
      %895 = vector.shape_cast %894 : vector<1x2x32xf32> to vector<2x32xf32>
      %896 = vector.shape_cast %893 : vector<2x32xf32> to vector<1x2x32xf32>
      tpu.vector_store %arg18[%c0_374, %c0_375, %c0_376], %896 {strides = array<i32>} : memref<3x2x32xf32, #tpu.memory_space<vmem>>, vector<1x2x32xf32>,
      %c0_377 = arith.constant 0 : index
      %c0_378 = arith.constant 0 : index
      %c0_379 = arith.constant 0 : index
      %897 = vector.load %arg19[%c0_377, %c0_378, %c0_379] : memref<3x2x32xf32, #tpu.memory_space<vmem>>, vector<1x2x32xf32>
      %898 = vector.shape_cast %897 : vector<1x2x32xf32> to vector<2x32xf32>
      %899 = vector.shape_cast %891 : vector<2x32xf32> to vector<1x2x32xf32>
      tpu.vector_store %arg19[%c0_377, %c0_378, %c0_379], %899 {strides = array<i32>} : memref<3x2x32xf32, #tpu.memory_space<vmem>>, vector<1x2x32xf32>,
      %c0_380 = arith.constant 0 : index
      %c0_381 = arith.constant 0 : index
      %900 = vector.load %arg23[%c0_380, %c0_381] : memref<2x64xf32, #tpu.memory_space<vmem>>, vector<2x32xf32>
      tpu.vector_store %arg23[%c0_380, %c0_381], %893 {strides = array<i32>} : memref<2x64xf32, #tpu.memory_space<vmem>>, vector<2x32xf32>,
      %c1_382 = arith.constant 1 : index
      %c0_383 = arith.constant 0 : index
      %c0_384 = arith.constant 0 : index
      %901 = vector.load %arg18[%c1_382, %c0_383, %c0_384] : memref<3x2x32xf32, #tpu.memory_space<vmem>>, vector<1x2x32xf32>
      %902 = vector.shape_cast %901 : vector<1x2x32xf32> to vector<2x32xf32>
      %c0_385 = arith.constant 0 : index
      %c32_386 = arith.constant 32 : index
      %903 = vector.load %arg23[%c0_385, %c32_386] : memref<2x64xf32, #tpu.memory_space<vmem>>, vector<2x32xf32>
      tpu.vector_store %arg23[%c0_385, %c32_386], %902 {strides = array<i32>} : memref<2x64xf32, #tpu.memory_space<vmem>>, vector<2x32xf32>,
      %c0_387 = arith.constant 0 : index
      %c0_388 = arith.constant 0 : index
      %904 = vector.load %arg23[%c0_387, %c0_388] : memref<2x64xf32, #tpu.memory_space<vmem>>, vector<2x64xf32>
      %c1_389 = arith.constant 1 : index
      %c0_390 = arith.constant 0 : index
      %c0_391 = arith.constant 0 : index
      %905 = vector.load %arg7[%c1_389, %c0_390, %c0_391] : memref<3x64x128xf32, #tpu.memory_space<vmem>>, vector<1x64x128xf32>
      %906 = vector.shape_cast %905 : vector<1x64x128xf32> to vector<64x128xf32>
      %cst_392 = arith.constant dense<0.000000e+00> : vector<2x128xf32>
      %907 = tpu.matmul %904, %906, %cst_392 {dimension_numbers = #tpu.dot_dimension_numbers<[1], [0], [0], [1], [0, 0, 1, 1], [], []>} : vector<2x64xf32>, vector<64x128xf32>, vector<2x128xf32> -> vector<2x128xf32>
      %c1_393 = arith.constant 1 : index
      %c0_394 = arith.constant 0 : index
      %908 = vector.load %arg8[%c1_393, %c0_394] : memref<3x128xf32, #tpu.memory_space<vmem>>, vector<1x128xf32>
      %909 = vector.shape_cast %908 : vector<1x128xf32> to vector<128xf32>
      %910 = vector.shape_cast %909 : vector<128xf32> to vector<1x128xf32>
      %911 = vector.broadcast %910 : vector<1x128xf32> to vector<2x128xf32>
      %912 = arith.addf %907, %911 : vector<2x128xf32>
      %c1_395 = arith.constant 1 : index
      %c0_396 = arith.constant 0 : index
      %c0_397 = arith.constant 0 : index
      %913 = vector.load %arg19[%c1_395, %c0_396, %c0_397] : memref<3x2x32xf32, #tpu.memory_space<vmem>>, vector<1x2x32xf32>
      %914 = vector.shape_cast %913 : vector<1x2x32xf32> to vector<2x32xf32>
      %915 = tpu.iota {dimensions = array<i32: 1>} : vector<2x128xi32>
      %c64_i32_398 = arith.constant 64 : i32
      %916 = vector.broadcast %c64_i32_398 : i32 to vector<2x128xi32>
      %917 = arith.cmpi sge, %915, %916 : vector<2x128xi32>
      %c96_i32_399 = arith.constant 96 : i32
      %918 = vector.broadcast %c96_i32_399 : i32 to vector<2x128xi32>
      %919 = arith.cmpi slt, %915, %918 : vector<2x128xi32>
      %920 = arith.andi %917, %919 : vector<2x128xi1>
      %cst_400 = arith.constant 5.000000e-01 : f32
      %921 = vector.broadcast %cst_400 : f32 to vector<2x128xf32>
      %922 = arith.mulf %921, %912 : vector<2x128xf32>
      %923 = arith.select %920, %912, %922 : vector<2x128xi1>, vector<2x128xf32>
      %924 = math.tanh %923 : vector<2x128xf32>
      %cst_401 = arith.constant 5.000000e-01 : f32
      %925 = vector.broadcast %cst_401 : f32 to vector<2x128xf32>
      %926 = arith.mulf %925, %924 : vector<2x128xf32>
      %cst_402 = arith.constant 5.000000e-01 : f32
      %927 = vector.broadcast %cst_402 : f32 to vector<2x128xf32>
      %928 = arith.addf %926, %927 : vector<2x128xf32>
      %929 = arith.select %920, %924, %928 : vector<2x128xi1>, vector<2x128xf32>
      %930 = vector.extract_strided_slice %929 {offsets = [0, 0], sizes = [2, 32], strides = [1, 1]} : vector<2x128xf32> to vector<2x32xf32>
      %931 = vector.extract_strided_slice %929 {offsets = [0, 32], sizes = [2, 32], strides = [1, 1]} : vector<2x128xf32> to vector<2x32xf32>
      %932 = vector.extract_strided_slice %929 {offsets = [0, 64], sizes = [2, 32], strides = [1, 1]} : vector<2x128xf32> to vector<2x32xf32>
      %933 = vector.extract_strided_slice %929 {offsets = [0, 96], sizes = [2, 32], strides = [1, 1]} : vector<2x128xf32> to vector<2x32xf32>
      %934 = arith.mulf %931, %914 : vector<2x32xf32>
      %935 = arith.mulf %930, %932 : vector<2x32xf32>
      %936 = arith.addf %934, %935 : vector<2x32xf32>
      %937 = math.tanh %936 : vector<2x32xf32>
      %938 = arith.mulf %933, %937 : vector<2x32xf32>
      %c1_403 = arith.constant 1 : index
      %c0_404 = arith.constant 0 : index
      %c0_405 = arith.constant 0 : index
      %939 = vector.load %arg18[%c1_403, %c0_404, %c0_405] : memref<3x2x32xf32, #tpu.memory_space<vmem>>, vector<1x2x32xf32>
      %940 = vector.shape_cast %939 : vector<1x2x32xf32> to vector<2x32xf32>
      %941 = vector.shape_cast %938 : vector<2x32xf32> to vector<1x2x32xf32>
      tpu.vector_store %arg18[%c1_403, %c0_404, %c0_405], %941 {strides = array<i32>} : memref<3x2x32xf32, #tpu.memory_space<vmem>>, vector<1x2x32xf32>,
      %c1_406 = arith.constant 1 : index
      %c0_407 = arith.constant 0 : index
      %c0_408 = arith.constant 0 : index
      %942 = vector.load %arg19[%c1_406, %c0_407, %c0_408] : memref<3x2x32xf32, #tpu.memory_space<vmem>>, vector<1x2x32xf32>
      %943 = vector.shape_cast %942 : vector<1x2x32xf32> to vector<2x32xf32>
      %944 = vector.shape_cast %936 : vector<2x32xf32> to vector<1x2x32xf32>
      tpu.vector_store %arg19[%c1_406, %c0_407, %c0_408], %944 {strides = array<i32>} : memref<3x2x32xf32, #tpu.memory_space<vmem>>, vector<1x2x32xf32>,
      %c0_409 = arith.constant 0 : index
      %c0_410 = arith.constant 0 : index
      %945 = vector.load %arg23[%c0_409, %c0_410] : memref<2x64xf32, #tpu.memory_space<vmem>>, vector<2x32xf32>
      tpu.vector_store %arg23[%c0_409, %c0_410], %938 {strides = array<i32>} : memref<2x64xf32, #tpu.memory_space<vmem>>, vector<2x32xf32>,
      %c2_411 = arith.constant 2 : index
      %c0_412 = arith.constant 0 : index
      %c0_413 = arith.constant 0 : index
      %946 = vector.load %arg18[%c2_411, %c0_412, %c0_413] : memref<3x2x32xf32, #tpu.memory_space<vmem>>, vector<1x2x32xf32>
      %947 = vector.shape_cast %946 : vector<1x2x32xf32> to vector<2x32xf32>
      %c0_414 = arith.constant 0 : index
      %c32_415 = arith.constant 32 : index
      %948 = vector.load %arg23[%c0_414, %c32_415] : memref<2x64xf32, #tpu.memory_space<vmem>>, vector<2x32xf32>
      tpu.vector_store %arg23[%c0_414, %c32_415], %947 {strides = array<i32>} : memref<2x64xf32, #tpu.memory_space<vmem>>, vector<2x32xf32>,
      %c0_416 = arith.constant 0 : index
      %c0_417 = arith.constant 0 : index
      %949 = vector.load %arg23[%c0_416, %c0_417] : memref<2x64xf32, #tpu.memory_space<vmem>>, vector<2x64xf32>
      %c2_418 = arith.constant 2 : index
      %c0_419 = arith.constant 0 : index
      %c0_420 = arith.constant 0 : index
      %950 = vector.load %arg7[%c2_418, %c0_419, %c0_420] : memref<3x64x128xf32, #tpu.memory_space<vmem>>, vector<1x64x128xf32>
      %951 = vector.shape_cast %950 : vector<1x64x128xf32> to vector<64x128xf32>
      %cst_421 = arith.constant dense<0.000000e+00> : vector<2x128xf32>
      %952 = tpu.matmul %949, %951, %cst_421 {dimension_numbers = #tpu.dot_dimension_numbers<[1], [0], [0], [1], [0, 0, 1, 1], [], []>} : vector<2x64xf32>, vector<64x128xf32>, vector<2x128xf32> -> vector<2x128xf32>
      %c2_422 = arith.constant 2 : index
      %c0_423 = arith.constant 0 : index
      %953 = vector.load %arg8[%c2_422, %c0_423] : memref<3x128xf32, #tpu.memory_space<vmem>>, vector<1x128xf32>
      %954 = vector.shape_cast %953 : vector<1x128xf32> to vector<128xf32>
      %955 = vector.shape_cast %954 : vector<128xf32> to vector<1x128xf32>
      %956 = vector.broadcast %955 : vector<1x128xf32> to vector<2x128xf32>
      %957 = arith.addf %952, %956 : vector<2x128xf32>
      %c2_424 = arith.constant 2 : index
      %c0_425 = arith.constant 0 : index
      %c0_426 = arith.constant 0 : index
      %958 = vector.load %arg19[%c2_424, %c0_425, %c0_426] : memref<3x2x32xf32, #tpu.memory_space<vmem>>, vector<1x2x32xf32>
      %959 = vector.shape_cast %958 : vector<1x2x32xf32> to vector<2x32xf32>
      %960 = tpu.iota {dimensions = array<i32: 1>} : vector<2x128xi32>
      %c64_i32_427 = arith.constant 64 : i32
      %961 = vector.broadcast %c64_i32_427 : i32 to vector<2x128xi32>
      %962 = arith.cmpi sge, %960, %961 : vector<2x128xi32>
      %c96_i32_428 = arith.constant 96 : i32
      %963 = vector.broadcast %c96_i32_428 : i32 to vector<2x128xi32>
      %964 = arith.cmpi slt, %960, %963 : vector<2x128xi32>
      %965 = arith.andi %962, %964 : vector<2x128xi1>
      %cst_429 = arith.constant 5.000000e-01 : f32
      %966 = vector.broadcast %cst_429 : f32 to vector<2x128xf32>
      %967 = arith.mulf %966, %957 : vector<2x128xf32>
      %968 = arith.select %965, %957, %967 : vector<2x128xi1>, vector<2x128xf32>
      %969 = math.tanh %968 : vector<2x128xf32>
      %cst_430 = arith.constant 5.000000e-01 : f32
      %970 = vector.broadcast %cst_430 : f32 to vector<2x128xf32>
      %971 = arith.mulf %970, %969 : vector<2x128xf32>
      %cst_431 = arith.constant 5.000000e-01 : f32
      %972 = vector.broadcast %cst_431 : f32 to vector<2x128xf32>
      %973 = arith.addf %971, %972 : vector<2x128xf32>
      %974 = arith.select %965, %969, %973 : vector<2x128xi1>, vector<2x128xf32>
      %975 = vector.extract_strided_slice %974 {offsets = [0, 0], sizes = [2, 32], strides = [1, 1]} : vector<2x128xf32> to vector<2x32xf32>
      %976 = vector.extract_strided_slice %974 {offsets = [0, 32], sizes = [2, 32], strides = [1, 1]} : vector<2x128xf32> to vector<2x32xf32>
      %977 = vector.extract_strided_slice %974 {offsets = [0, 64], sizes = [2, 32], strides = [1, 1]} : vector<2x128xf32> to vector<2x32xf32>
      %978 = vector.extract_strided_slice %974 {offsets = [0, 96], sizes = [2, 32], strides = [1, 1]} : vector<2x128xf32> to vector<2x32xf32>
      %979 = arith.mulf %976, %959 : vector<2x32xf32>
      %980 = arith.mulf %975, %977 : vector<2x32xf32>
      %981 = arith.addf %979, %980 : vector<2x32xf32>
      %982 = math.tanh %981 : vector<2x32xf32>
      %983 = arith.mulf %978, %982 : vector<2x32xf32>
      %c2_432 = arith.constant 2 : index
      %c0_433 = arith.constant 0 : index
      %c0_434 = arith.constant 0 : index
      %984 = vector.load %arg18[%c2_432, %c0_433, %c0_434] : memref<3x2x32xf32, #tpu.memory_space<vmem>>, vector<1x2x32xf32>
      %985 = vector.shape_cast %984 : vector<1x2x32xf32> to vector<2x32xf32>
      %986 = vector.shape_cast %983 : vector<2x32xf32> to vector<1x2x32xf32>
      tpu.vector_store %arg18[%c2_432, %c0_433, %c0_434], %986 {strides = array<i32>} : memref<3x2x32xf32, #tpu.memory_space<vmem>>, vector<1x2x32xf32>,
      %c2_435 = arith.constant 2 : index
      %c0_436 = arith.constant 0 : index
      %c0_437 = arith.constant 0 : index
      %987 = vector.load %arg19[%c2_435, %c0_436, %c0_437] : memref<3x2x32xf32, #tpu.memory_space<vmem>>, vector<1x2x32xf32>
      %988 = vector.shape_cast %987 : vector<1x2x32xf32> to vector<2x32xf32>
      %989 = vector.shape_cast %981 : vector<2x32xf32> to vector<1x2x32xf32>
      tpu.vector_store %arg19[%c2_435, %c0_436, %c0_437], %989 {strides = array<i32>} : memref<3x2x32xf32, #tpu.memory_space<vmem>>, vector<1x2x32xf32>,
      %c0_438 = arith.constant 0 : index
      %c0_439 = arith.constant 0 : index
      %990 = vector.load %arg9[%c0_438, %c0_439] : memref<32x32xf32, #tpu.memory_space<vmem>>, vector<32x32xf32>
      %cst_440 = arith.constant dense<0.000000e+00> : vector<2x32xf32>
      %991 = tpu.matmul %983, %990, %cst_440 {dimension_numbers = #tpu.dot_dimension_numbers<[1], [0], [0], [1], [0, 0, 1, 1], [], []>} : vector<2x32xf32>, vector<32x32xf32>, vector<2x32xf32> -> vector<2x32xf32>
      %c0_441 = arith.constant 0 : index
      %c0_442 = arith.constant 0 : index
      %992 = vector.load %arg10[%c0_441, %c0_442] : memref<1x32xf32, #tpu.memory_space<vmem>>, vector<1x32xf32>
      %993 = vector.broadcast %992 : vector<1x32xf32> to vector<2x32xf32>
      %994 = arith.addf %991, %993 : vector<2x32xf32>
      %cst_443 = arith.constant 2.500000e-01 : f32
      %995 = vector.broadcast %cst_443 : f32 to vector<2x32xf32>
      %996 = arith.mulf %994, %995 : vector<2x32xf32>
      %c0_444 = arith.constant 0 : index
      %c0_445 = arith.constant 0 : index
      %c0_446 = arith.constant 0 : index
      %997 = vector.load %arg17[%c0_444, %c0_445, %c0_446] : memref<2x8x32xf32, #tpu.memory_space<vmem>>, vector<2x8x32xf32>
      %cst_447 = arith.constant 0.000000e+00 : f32
      %998 = vector.broadcast %cst_447 : f32 to vector<2x8xf32>
      %999 = vector.extract_strided_slice %996 {offsets = [0, 0], sizes = [2, 16], strides = [1, 1]} : vector<2x32xf32> to vector<2x16xf32>
      %1000 = vector.shape_cast %999 : vector<2x16xf32> to vector<2x1x16xf32>
      %1001 = vector.extract_strided_slice %997 {offsets = [0, 0, 0], sizes = [2, 8, 16], strides = [1, 1, 1]} : vector<2x8x32xf32> to vector<2x8x16xf32>
      "tpu.trace_start"() <{level = 10 : i32, message = "bqd,bkd->bqk"}> : () -> ()
      %cst_448 = arith.constant dense<0.000000e+00> : vector<2x1x8xf32>
      %1002 = tpu.matmul %1000, %1001, %cst_448 {dimension_numbers = #tpu.dot_dimension_numbers<[2], [2], [1], [1], [0, 0, 0, 1, 1, 1], [0], [0]>} : vector<2x1x16xf32>, vector<2x8x16xf32>, vector<2x1x8xf32> -> vector<2x1x8xf32>
      "tpu.trace_stop"() : () -> ()
      %1003 = vector.shape_cast %1002 : vector<2x1x8xf32> to vector<2x8xf32>
      %cst_449 = arith.constant 5.000000e-01 : f32
      %1004 = vector.broadcast %cst_449 : f32 to vector<2x8xf32>
      %1005 = arith.cmpf ogt, %853, %1004 : vector<2x8xf32>
      %cst_450 = arith.constant -1.000000e+30 : f32
      %1006 = vector.broadcast %cst_450 : f32 to vector<2x8xf32>
      %1007 = arith.select %1005, %1006, %1003 : vector<2x8xi1>, vector<2x8xf32>
      %cst_451 = arith.constant dense<0xFF800000> : vector<2xf32>
      %1008 = vector.multi_reduction <maximumf>, %1007, %cst_451 [1] : vector<2x8xf32> to vector<2xf32>
      %1009 = vector.shape_cast %1008 : vector<2xf32> to vector<2x1xf32>
      %1010 = vector.broadcast %1009 : vector<2x1xf32> to vector<2x8xf32>
      %1011 = arith.subf %1007, %1010 : vector<2x8xf32>
      %1012 = math.exp %1011 : vector<2x8xf32>
      %cst_452 = arith.constant dense<0.000000e+00> : vector<2xf32>
      %1013 = vector.multi_reduction <add>, %1012, %cst_452 [1] : vector<2x8xf32> to vector<2xf32>
      %1014 = vector.shape_cast %1013 : vector<2xf32> to vector<2x1xf32>
      %1015 = tpu.reciprocal %1014 {approx = true} : vector<2x1xf32> -> vector<2x1xf32>
      %1016 = vector.broadcast %1015 : vector<2x1xf32> to vector<2x8xf32>
      %1017 = arith.mulf %1012, %1016 : vector<2x8xf32>
      %1018 = arith.addf %998, %1017 : vector<2x8xf32>
      %1019 = vector.extract_strided_slice %996 {offsets = [0, 16], sizes = [2, 16], strides = [1, 1]} : vector<2x32xf32> to vector<2x16xf32>
      %1020 = vector.shape_cast %1019 : vector<2x16xf32> to vector<2x1x16xf32>
      %1021 = vector.extract_strided_slice %997 {offsets = [0, 0, 16], sizes = [2, 8, 16], strides = [1, 1, 1]} : vector<2x8x32xf32> to vector<2x8x16xf32>
      "tpu.trace_start"() <{level = 10 : i32, message = "bqd,bkd->bqk"}> : () -> ()
      %cst_453 = arith.constant dense<0.000000e+00> : vector<2x1x8xf32>
      %1022 = tpu.matmul %1020, %1021, %cst_453 {dimension_numbers = #tpu.dot_dimension_numbers<[2], [2], [1], [1], [0, 0, 0, 1, 1, 1], [0], [0]>} : vector<2x1x16xf32>, vector<2x8x16xf32>, vector<2x1x8xf32> -> vector<2x1x8xf32>
      "tpu.trace_stop"() : () -> ()
      %1023 = vector.shape_cast %1022 : vector<2x1x8xf32> to vector<2x8xf32>
      %cst_454 = arith.constant 5.000000e-01 : f32
      %1024 = vector.broadcast %cst_454 : f32 to vector<2x8xf32>
      %1025 = arith.cmpf ogt, %853, %1024 : vector<2x8xf32>
      %cst_455 = arith.constant -1.000000e+30 : f32
      %1026 = vector.broadcast %cst_455 : f32 to vector<2x8xf32>
      %1027 = arith.select %1025, %1026, %1023 : vector<2x8xi1>, vector<2x8xf32>
      %cst_456 = arith.constant dense<0xFF800000> : vector<2xf32>
      %1028 = vector.multi_reduction <maximumf>, %1027, %cst_456 [1] : vector<2x8xf32> to vector<2xf32>
      %1029 = vector.shape_cast %1028 : vector<2xf32> to vector<2x1xf32>
      %1030 = vector.broadcast %1029 : vector<2x1xf32> to vector<2x8xf32>
      %1031 = arith.subf %1027, %1030 : vector<2x8xf32>
      %1032 = math.exp %1031 : vector<2x8xf32>
      %cst_457 = arith.constant dense<0.000000e+00> : vector<2xf32>
      %1033 = vector.multi_reduction <add>, %1032, %cst_457 [1] : vector<2x8xf32> to vector<2xf32>
      %1034 = vector.shape_cast %1033 : vector<2xf32> to vector<2x1xf32>
      %1035 = tpu.reciprocal %1034 {approx = true} : vector<2x1xf32> -> vector<2x1xf32>
      %1036 = vector.broadcast %1035 : vector<2x1xf32> to vector<2x8xf32>
      %1037 = arith.mulf %1032, %1036 : vector<2x8xf32>
      %1038 = arith.addf %1018, %1037 : vector<2x8xf32>
      %cst_458 = arith.constant 5.000000e-01 : f32
      %1039 = vector.broadcast %cst_458 : f32 to vector<2x8xf32>
      %1040 = arith.mulf %1038, %1039 : vector<2x8xf32>
      %cst_459 = arith.constant 9.99999971E-10 : f32
      %1041 = vector.broadcast %cst_459 : f32 to vector<2x8xf32>
      %1042 = arith.maximumf %1040, %1041 : vector<2x8xf32>
      %cst_460 = arith.constant dense<0.000000e+00> : vector<2xf32>
      %1043 = vector.multi_reduction <add>, %1042, %cst_460 [1] : vector<2x8xf32> to vector<2xf32>
      %1044 = vector.shape_cast %1043 : vector<2xf32> to vector<2x1xf32>
      %1045 = vector.broadcast %1044 : vector<2x1xf32> to vector<2x8xf32>
      %1046 = arith.divf %1042, %1045 : vector<2x8xf32>
      %1047 = tpu.iota {dimensions = array<i32: 1>} : vector<2x8xi32>
      %cst_461 = arith.constant dense<0xFF800000> : vector<2xf32>
      %1048 = vector.multi_reduction <maximumf>, %1046, %cst_461 [1] : vector<2x8xf32> to vector<2xf32>
      %1049 = vector.shape_cast %1048 : vector<2xf32> to vector<2x1xf32>
      %1050 = vector.broadcast %1049 : vector<2x1xf32> to vector<2x8xf32>
      %1051 = arith.cmpf oge, %1046, %1050 : vector<2x8xf32>
      %c8_i32_462 = arith.constant 8 : i32
      %1052 = vector.broadcast %c8_i32_462 : i32 to vector<2x8xi32>
      %1053 = arith.select %1051, %1047, %1052 : vector<2x8xi1>, vector<2x8xi32>
      %cst_463 = arith.constant dense<2147483647> : vector<2xi32>
      %1054 = vector.multi_reduction <minsi>, %1053, %cst_463 [1] : vector<2x8xi32> to vector<2xi32>
      %1055 = vector.shape_cast %1054 : vector<2xi32> to vector<2x1xi32>
      %1056 = vector.broadcast %1055 : vector<2x1xi32> to vector<2x8xi32>
      %1057 = arith.cmpi eq, %842, %1056 : vector<2x8xi32>
      %1058 = arith.extui %1057 : vector<2x8xi1> to vector<2x8xi32>
      %1059 = arith.sitofp %1058 : vector<2x8xi32> to vector<2x8xf32>
      %c0_i32_464 = arith.constant 0 : i32
      %1060 = arith.cmpi eq, %846, %c0_i32_464 : i32
      %c0_465 = arith.constant 0 : index
      %c0_466 = arith.constant 0 : index
      %1061 = vector.load %arg22[%c0_465, %c0_466] : memref<2x8xf32, #tpu.memory_space<vmem>>, vector<2x8xf32>
      %1062 = arith.select %1060, %1059, %1061 : vector<2x8xf32>
      %c0_467 = arith.constant 0 : index
      %c0_468 = arith.constant 0 : index
      %1063 = vector.load %arg22[%c0_467, %c0_468] : memref<2x8xf32, #tpu.memory_space<vmem>>, vector<2x8xf32>
      tpu.vector_store %arg22[%c0_467, %c0_468], %1062 {strides = array<i32>} : memref<2x8xf32, #tpu.memory_space<vmem>>, vector<2x8xf32>,
      %1064 = arith.maximumf %847, %1059 : vector<2x8xf32>
      %c0_469 = arith.constant 0 : index
      %c0_470 = arith.constant 0 : index
      %1065 = vector.load %arg21[%c0_469, %c0_470] : memref<2x8xf32, #tpu.memory_space<vmem>>, vector<2x8xf32>
      tpu.vector_store %arg21[%c0_469, %c0_470], %1064 {strides = array<i32>} : memref<2x8xf32, #tpu.memory_space<vmem>>, vector<2x8xf32>,
      %1066 = vector.shape_cast %1059 : vector<2x8xf32> to vector<2x1x8xf32>
      %c0_471 = arith.constant 0 : index
      %c0_472 = arith.constant 0 : index
      %c0_473 = arith.constant 0 : index
      %1067 = vector.load %arg15[%c0_471, %c0_472, %c0_473] : memref<2x8x32xf32, #tpu.memory_space<vmem>>, vector<2x8x32xf32>
      "tpu.trace_start"() <{level = 10 : i32, message = "bqk,bkd->bqd"}> : () -> ()
      %cst_474 = arith.constant dense<0.000000e+00> : vector<2x1x32xf32>
      %1068 = tpu.matmul %1066, %1067, %cst_474 {dimension_numbers = #tpu.dot_dimension_numbers<[2], [1], [1], [2], [0, 0, 0, 1, 1, 2], [0], [0]>} : vector<2x1x8xf32>, vector<2x8x32xf32>, vector<2x1x32xf32> -> vector<2x1x32xf32>
      "tpu.trace_stop"() : () -> ()
      %1069 = vector.shape_cast %1068 : vector<2x1x32xf32> to vector<2x32xf32>
      %c0_475 = arith.constant 0 : index
      %c0_476 = arith.constant 0 : index
      %1070 = vector.load %arg20[%c0_475, %c0_476] : memref<2x32xf32, #tpu.memory_space<vmem>>, vector<2x32xf32>
      tpu.vector_store %arg20[%c0_475, %c0_476], %1069 {strides = array<i32>} : memref<2x32xf32, #tpu.memory_space<vmem>>, vector<2x32xf32>,
      %cst_477 = arith.constant 0.000000e+00 : f32
      %1071 = vector.broadcast %cst_477 : f32 to vector<2x120xf32>
      %1072 = tpu.concatenate %1046, %1071 in 1 : vector<2x8xf32>, vector<2x120xf32> -> vector<2x128xf32>
      %1073 = vector.shape_cast %1072 : vector<2x128xf32> to vector<1x2x128xf32>
      %1074 = arith.index_cast %846 : i32 to index
      %c0_478 = arith.constant 0 : index
      %c0_479 = arith.constant 0 : index
      %1075 = vector.load %arg13[%1074, %c0_478, %c0_479] : memref<9x2x128xf32, #tpu.memory_space<vmem>>, vector<1x2x128xf32>
      tpu.vector_store %arg13[%1074, %c0_478, %c0_479], %1073 {strides = array<i32>} : memref<9x2x128xf32, #tpu.memory_space<vmem>>, vector<1x2x128xf32>,
      %1076 = vector.broadcast %846 : i32 to vector<2x128xi32>
      %1077 = arith.cmpi eq, %843, %1076 : vector<2x128xi32>
      %1078 = vector.shape_cast %1055 : vector<2x1xi32> to vector<2x1xi32>
      %1079 = vector.broadcast %1078 : vector<2x1xi32> to vector<2x128xi32>
      %c0_480 = arith.constant 0 : index
      %c0_481 = arith.constant 0 : index
      %1080 = vector.load %arg14[%c0_480, %c0_481] : memref<2x128xi32, #tpu.memory_space<vmem>>, vector<2x128xi32>
      %1081 = arith.select %1077, %1079, %1080 : vector<2x128xi1>, vector<2x128xi32>
      %c0_482 = arith.constant 0 : index
      %c0_483 = arith.constant 0 : index
      %1082 = vector.load %arg14[%c0_482, %c0_483] : memref<2x128xi32, #tpu.memory_space<vmem>>, vector<2x128xi32>
      tpu.vector_store %arg14[%c0_482, %c0_483], %1081 {strides = array<i32>} : memref<2x128xi32, #tpu.memory_space<vmem>>, vector<2x128xi32>,
    }
    %c9_i32_341 = arith.constant 9 : i32
    return
  }
}

</mosaic_0001>

<bundles_post_ra>
// kernel: tspnet_forward.1
= control target key start
LH: loop header
LB: loop body
LE: loop exit
PB: predicated region body
PF: predicated region fallthrough
CT: control target
= control target key end

     0   :  { %vm64_vm0 = vcmask 1041408   ;;  %vm57_vm1 = vcmask 15360   ;;  %v6443_v12 = vmov 0.0|0.0   ;;  %vm4254_vm2 = vcmask 254976   ;;  %s6446_s17 = smov 64   ;;  %s6447_s18 = smov 32   ;;  %s7676_s0 = inlined_call_operand.<no memory space> [shape: s32[1], index: 0, kind: input, shape index: {}]   ;;  %s7677_s2 = inlined_call_operand.vmem [shape: f32[2,32], index: 2, kind: input, shape index: {}]   ;;  %s7678_s7 = inlined_call_operand.vmem [shape: f32[3,64,128], index: 7, kind: input, shape index: {}]   ;;  %s7679_s8 = inlined_call_operand.vmem [shape: f32[3,128], index: 8, kind: input, shape index: {}]   ;;  %s7680_s9 = inlined_call_operand.vmem [shape: f32[32,32], index: 9, kind: input, shape index: {}]   ;;  %s7681_s10 = inlined_call_operand.vmem [shape: f32[1,32], index: 10, kind: input, shape index: {}]   ;;  %s7682_s13 = inlined_call_operand.vmem [shape: f32[9,2,128], index: 13, kind: output, shape index: {0}]   ;;  %s7683_s1 = inlined_call_operand.vmem [shape: f32[2,8,2], index: 1, kind: input, shape index: {}]   ;;  %s7684_s4 = inlined_call_operand.vmem [shape: f32[3,32,128], index: 4, kind: input, shape index: {}]   ;;  %s7685_s5 = inlined_call_operand.vmem [shape: f32[3,32,128], index: 5, kind: input, shape index: {}]   ;;  %s7686_s3 = inlined_call_operand.vmem [shape: f32[1,32], index: 3, kind: input, shape index: {}]   ;;  %s7687_s6 = inlined_call_operand.vmem [shape: f32[3,128], index: 6, kind: input, shape index: {}]   ;;  %s7688_s11 = inlined_call_operand.vmem [shape: f32[32,32], index: 11, kind: input, shape index: {}]   ;;  %s7689_s14 = inlined_call_operand.vmem [shape: s32[2,128], index: 14, kind: output, shape index: {1}]   ;;  %s7690_s12 = inlined_call_operand.vmem [shape: f32[1,32], index: 12, kind: input, shape index: {}]  }
   0x1   :  { %v49_v0 = vld [vmem:[%s7677_s2] sm:$0x3]  ;;  %v48_v2 = vld [vmem:[%s7683_s1 + $0x8] sm:$0xff]  ;;  %v145_v6 = vld [vmem:[%s7684_s4 + $0x10] sm:$0xff]  ;;  %vm4262_vm3 = vcmask 58368   ;;  %vm6444_vm4 = vmmov 0   ;;  %v321_v29 = vlaneseq }
   0x2   :  { %v47_v1 = vld [vmem:[%s7683_s1] sm:$0xff]  ;;  %5666 = vmatprep.subr.msk.mxu0 %vm64_vm0, %v49_v0  ;;  %v144_v4 = vld [vmem:[%s7684_s4 + $0x8] sm:$0xff]  ;;  %v146_v7 = vld [vmem:[%s7684_s4 + $0x18] sm:$0xff]  ;;  %v6445_v16 = vmov 0.0   ;;  %vm152_vm5 = vcmask 261120   ;;  %vm331_vm8 = vcmask 1041409  }
   0x3   :  { %5668 = vmatprep.mubr.msk.f32.mxu0 %vm57_vm1, %v47_v1  ;;  %v143_v3 = vld [vmem:[%s7684_s4] sm:$0xff]  ;;  %5667 = vmatpush3.msk.msra.mxu0 %vm64_vm0, %v49_v0  ;;  %v6081_v8 = vpack.c.bf16 %v146_v7, %v145_v6  ;;  %v237_v10 = vld [vmem:[%s7685_s5 + $0x8] sm:$0xff]  ;;  %v238_v13 = vld [vmem:[%s7685_s5 + $0x10] sm:$0xff]  ;;  %4255 = vst.msk [vmem:[#allocation5] sm:$0x3] %vm4254_vm2, %v6445_v16  ;;  %v6617_v31 = vand.u32 127, %v321_v29 }
   0x4   :  { %v6077_v5 = vpack.c.bf16 %v144_v4, %v143_v3  ;;  %5669 = vmatmul.mubr.msk.f32.vlgmr.msra.gmra.mrb[0].mxu0 %vm57_vm1, %v48_v2  ;;  %v236_v9 = vld [vmem:[%s7685_s5] sm:$0xff]  ;;  %6085 = vmatprep.subr.bf16.mxu0 %v6443_v12  ;;  %v239_v14 = vld [vmem:[%s7685_s5 + $0x18] sm:$0xff]  ;;  %4256 = vst.msk [vmem:[#allocation5 + $0x2] sm:$0x3] %vm4254_vm2, %v6445_v16  ;;  %4257 = vst.msk [vmem:[#allocation5 + $0x4] sm:$0x3] %vm4254_vm2, %v6445_v16 }
   0x5   :  { %v6559_v11 = vpack.c.bf16 %v237_v10, %v236_v9  ;;  %v6571_v15 = vpack.c.bf16 %v239_v14, %v238_v13  ;;  %5690 = vmatprep.mubr.msk.f32.mxu0 %vm6444_vm4, %v6445_v16  ;;  %4258 = vst.msk [vmem:[#allocation6] sm:$0x3] %vm4254_vm2, %v6445_v16  ;;  %4259 = vst.msk [vmem:[#allocation6 + $0x2] sm:$0x3] %vm4254_vm2, %v6445_v16  ;;  %v5386_v17 = vld [vmem:[%s7686_s3] ss:$0 sm:$0xff] }
   0x6   :  { %6078 = vmatprep.subr.bf16.mxu1 %v6077_v5  ;;  %4260 = vst.msk [vmem:[#allocation6 + $0x4] sm:$0x3] %vm4254_vm2, %v6445_v16  ;;  %4261 = vst.msk [vmem:[#allocation7] sm:$0x3] %vm4254_vm2, %v6445_v16  ;;  %v5390_v24 = vld [vmem:[%s7687_s6] ss:$0 sm:$0xff] }
   0x7   :  { %6080 = vmatpush3.bf16.msra.mxu1 %v6077_v5  ;;  %6087 = vmatpush3.bf16.msra.mxu0 %v6559_v11  ;;  %4263 = vst.msk [vmem:[#allocation8] sm:$0x3] %vm4262_vm3, %v6445_v16  ;;  %4264 = vst.msk [vmem:[#allocation9] sm:$0x3] %vm4262_vm3, %v6445_v16  ;;  %vm323_vm6 = vcmp.ge.s32.totalorder %v6617_v31, 64  ;;  %vm324_vm7 = vcmp.lt.s32.totalorder %v6617_v31, 96 }
   0x8   :  { %6082 = vmatprep.subr.bf16.mxu1 %v6081_v8  ;;  %6088 = vmatprep.subr.bf16.mxu0 %v6443_v12  ;;  %vm6621_vm9 = vmand %vm323_vm6, %vm324_vm7  ;;  %vm398_vm10 = vcmask 253952   ;;  %s7420_s23 = smov 0  }
   0xb   :  { %6084 = vmatpush3.bf16.msra.mxu1 %v6081_v8  ;;  %6090 = vmatpush3.bf16.msra.mxu0 %v6571_v15 }
   0xc   :  { %6091 = vmatprep.subr.bf16.mxu1 %v6443_v12  ;;  %6097 = vmatprep.subr.bf16.mxu0 %v6443_v12 }
   0xe   :  { %5691 = vmatmul.mubr.f32.vlgmr.msra.gmra.mrb[2].mxu0 %v6445_v16 }
   0xf   :  { %6099 = vmatpush3.bf16.msra.mxu0 %v6559_v11  ;;  %5712 = vmatprep.mubr.msk.f32.mxu0 %vm6444_vm4, %v6445_v16 }
  0x10   :  { %6100 = vmatprep.subr.bf16.mxu0 %v6443_v12 }
  0x13   :  { %6102 = vmatpush3.bf16.msra.mxu0 %v6571_v15 }
  0x14   :  { %6109 = vmatprep.subr.bf16.mxu0 %v6443_v12 }
  0xd7   :  { %v5670_v18 = vpop.f32.mrb[0].mxu0 }
  0xd8   :  { %v134_v19 = vpop.f32.mrb[1].mxu0  ;;  %v140_v21 = vadd.f32 %v5670_v18, %v5386_v17 }
  0xd9   :  { %v135_v20 = vadd.f32 %v5386_v17, %v134_v19 }
  0xdb   :  { %5679 = vmatprep.mubr.msk.f32.mxu1 %vm152_vm5, %v135_v20 }
  0xdc   :  { %5680 = vmatmul.mubr.msk.f32.vlgmr.msra.gmra.mrb[0].mxu1 %vm152_vm5, %v140_v21 }
  0xdd   :  { %6093 = vmatpush3.bf16.msra.mxu1 %v6559_v11  ;;  %5701 = vmatprep.mubr.msk.f32.mxu1 %vm6444_vm4, %v6445_v16 }
  0xde   :  { %6094 = vmatprep.subr.bf16.mxu1 %v6443_v12 }
  0xe1   :  { %6096 = vmatpush3.bf16.msra.mxu1 %v6571_v15  ;;  %v311_v22 = vpop.f32.mrb[2].mxu0 }
  0xe2   :  { %6103 = vmatprep.subr.bf16.mxu1 %v6443_v12  ;;  %v5692_v23 = vpop.f32.mrb[3].mxu0  ;;  %v316_v30 = vrot.slane %v311_v22, 1 }
 0x1af   :  { %v5681_v25 = vpop.f32.mrb[0].mxu1 }
 0x1b0   :  { %v231_v26 = vadd.f32 %v5681_v25, %v5390_v24  ;;  %v225_v27 = vpop.f32.mrb[1].mxu1 }
 0x1b1   :  { %v226_v28 = vadd.f32 %v5390_v24, %v225_v27 }
 0x1b2   :  { %235 = vst [vmem:[#allocation3 + $0x8] sm:$0xff] %v231_v26 }
 0x1b3   :  { %234 = vst [vmem:[#allocation3] sm:$0xff] %v226_v28 }
 0x1b9   :  { %v241_v32 = vld [vmem:[#allocation3 + $0x8] sm:$0x1]  ;;  %v402_v61 = vld [vmem:[#allocation3 + $0x9] sm:$0x1]  ;;  %v557_v28 = vld [vmem:[#allocation3 + $0xa] sm:$0x1] }
 0x1ba   :  { %v240_v33 = vld [vmem:[#allocation3] sm:$0x1]  ;;  %v320_v34 = vadd.f32 %v316_v30, %v241_v32  ;;  %v401_v60 = vld [vmem:[#allocation3 + $0x1] sm:$0x1]  ;;  %v556_v27 = vld [vmem:[#allocation3 + $0x2] sm:$0x1] }
 0x1bb   :  { %v319_v35 = vadd.f32 %v311_v22, %v240_v33 }
 0x1bc   :  { %v327_v36 = vmul.f32 0.5, %v320_v34  ;;  %v330_v37 = vrot.slane %v320_v34, 7 }
 0x1bd   :  { %v326_v38 = vmul.f32 0.5, %v319_v35 }
 0x1be   :  { %v336_v40 = vrot.slane %v327_v36, 7  ;;  %v332_v41 = vsel %vm331_vm8, %v330_v37, %v319_v35 }
 0x1c0   :  { %v337_v42 = vsel %vm331_vm8, %v336_v40, %v326_v38 }
 0x1c1   :  { %v339_v43 = vsel %vm6621_vm9, %v332_v41, %v337_v42 }
 0x1c2   :  { %6317 = vtanh.f32 %v339_v43 }
 0x1cc   :  { %v6318_v44 = vpop.eup %6317 }
 0x1cd   :  { %v341_v45 = vmul.f32 0.5, %v6318_v44 }
 0x1cf   :  { %v342_v46 = vadd.f32 0.5, %v341_v45 }
 0x1d1   :  { %v343_v47 = vsel %vm6621_vm9, %v6318_v44, %v342_v46 }
 0x1d2   :  { %346 = vrot.lane.b32.xlu0 %v343_v47, %s6446_s17  ;;  %v344_v50 = vmul.f32 0.0, %v343_v47 }
 0x244   :  { %v347_v48 = vpop.permute.xlu0 %346 }
 0x245   :  { %v349_v49 = vmul.f32 %v347_v48, %v343_v47 }
 0x247   :  { %351 = vrot.lane.b32.xlu0 %v349_v49, %s6447_s18 }
 0x2b9   :  { %v352_v51 = vpop.permute.xlu0 %351 }
 0x2ba   :  { %v354_v52 = vadd.f32 %v352_v51, %v344_v50 }
 0x2bc   :  { %6319 = vtanh.f32 %v354_v52 }
 0x2c6   :  { %v6320_v53 = vpop.eup %6319 }
 0x2c7   :  { %357 = vrot.lane.b32.xlu1 %v6320_v53, %s6446_s17 }
 0x339   :  { %v358_v54 = vpop.permute.xlu1 %357 }
 0x33a   :  { %v6634_v55 = vmul.f32 %v358_v54, %v343_v47 }
 0x33c   :  { %403 = vrot.lane.b32.xlu1 %v6634_v55, %s6447_s18 }
 0x3ae   :  { %v404_v56 = vpop.permute.xlu1 %403 }
 0x3af   :  { %5702 = vmatmul.mubr.msk.f32.vlgmr.msra.gmra.mrb[2].mxu1 %vm152_vm5, %v404_v56 }
 0x3b0   :  { %6105 = vmatpush3.bf16.msra.mxu1 %v6559_v11  ;;  %5723 = vmatprep.mubr.msk.f32.mxu1 %vm6444_vm4, %v6445_v16 }
 0x3b1   :  { %6106 = vmatprep.subr.bf16.mxu1 %v6443_v12 }
 0x3b4   :  { %6108 = vmatpush3.bf16.msra.mxu1 %v6571_v15 }
 0x3b5   :  { %6115 = vmatprep.subr.bf16.mxu1 %v6443_v12 }
 0x482   :  { %v473_v57 = vpop.f32.mrb[2].mxu1 }
 0x483   :  { %v478_v58 = vrot.slane %v473_v57, 1  ;;  %v5703_v59 = vpop.f32.mrb[3].mxu1  ;;  %v481_v62 = vadd.f32 %v473_v57, %v401_v60 }
 0x484   :  { %v712_v59 = vld [vmem:[#allocation3 + $0xb] sm:$0x1] }
 0x485   :  { %v482_v63 = vadd.f32 %v478_v58, %v402_v61  ;;  %v483_v2 = vmul.f32 0.5, %v481_v62  ;;  %v711_v58 = vld [vmem:[#allocation3 + $0x3] sm:$0x1] }
 0x487   :  { %v484_v0 = vmul.f32 0.5, %v482_v63  ;;  %v487_v1 = vrot.slane %v482_v63, 7 }
 0x489   :  { %v492_v3 = vrot.slane %v484_v0, 7  ;;  %v488_v4 = vsel %vm331_vm8, %v487_v1, %v481_v62 }
 0x48b   :  { %v493_v5 = vsel %vm331_vm8, %v492_v3, %v483_v2 }
 0x48c   :  { %v495_v6 = vsel %vm6621_vm9, %v488_v4, %v493_v5 }
 0x48d   :  { %6321 = vtanh.f32 %v495_v6 }
 0x497   :  { %v6322_v7 = vpop.eup %6321 }
 0x498   :  { %v497_v8 = vmul.f32 0.5, %v6322_v7 }
 0x49a   :  { %v498_v9 = vadd.f32 0.5, %v497_v8 }
 0x49c   :  { %v499_v10 = vsel %vm6621_vm9, %v6322_v7, %v498_v9 }
 0x49d   :  { %502 = vrot.lane.b32.xlu0 %v499_v10, %s6446_s17  ;;  %v500_v17 = vmul.f32 %v499_v10, %v354_v52 }
 0x50f   :  { %v503_v13 = vpop.permute.xlu0 %502 }
 0x510   :  { %v505_v14 = vmul.f32 %v503_v13, %v499_v10 }
 0x512   :  { %507 = vrot.lane.b32.xlu1 %v505_v14, %s6447_s18 }
 0x584   :  { %v508_v18 = vpop.permute.xlu1 %507 }
 0x585   :  { %v510_v19 = vadd.f32 %v508_v18, %v500_v17 }
 0x587   :  { %6323 = vtanh.f32 %v510_v19 }
 0x591   :  { %v6324_v20 = vpop.eup %6323 }
 0x592   :  { %513 = vrot.lane.b32.xlu0 %v6324_v20, %s6446_s17 }
 0x604   :  { %v514_v21 = vpop.permute.xlu0 %513 }
 0x605   :  { %v6654_v22 = vmul.f32 %v514_v21, %v499_v10 }
 0x607   :  { %558 = vrot.lane.b32.xlu1 %v6654_v22, %s6447_s18 }
 0x679   :  { %v559_v23 = vpop.permute.xlu1 %558 }
 0x67a   :  { %5713 = vmatmul.mubr.msk.f32.vlgmr.msra.gmra.mrb[4].mxu0 %vm152_vm5, %v559_v23 }
 0x67b   :  { %6111 = vmatpush3.bf16.msra.mxu0 %v6559_v11  ;;  %5734 = vmatprep.mubr.msk.f32.mxu0 %vm6444_vm4, %v6445_v16 }
 0x67c   :  { %6112 = vmatprep.subr.bf16.mxu0 %v6443_v12 }
 0x67f   :  { %6114 = vmatpush3.bf16.msra.mxu0 %v6571_v15 }
 0x680   :  { %6121 = vmatprep.subr.bf16.mxu0 %v6443_v12 }
 0x74d   :  { %v628_v24 = vpop.f32.mrb[4].mxu0 }
 0x74e   :  { %v633_v25 = vrot.slane %v628_v24, 1  ;;  %v5714_v26 = vpop.f32.mrb[5].mxu0  ;;  %v636_v30 = vadd.f32 %v628_v24, %v556_v27  ;;  %v867_v27 = vld [vmem:[#allocation3 + $0xc] sm:$0x1] }
 0x74f   :  { %v866_v26 = vld [vmem:[#allocation3 + $0x4] sm:$0x1] }
 0x750   :  { %v637_v32 = vadd.f32 %v633_v25, %v557_v28  ;;  %v638_v35 = vmul.f32 0.5, %v636_v30 }
 0x752   :  { %v639_v33 = vmul.f32 0.5, %v637_v32  ;;  %v642_v34 = vrot.slane %v637_v32, 7 }
 0x754   :  { %v647_v36 = vrot.slane %v639_v33, 7  ;;  %v643_v37 = vsel %vm331_vm8, %v642_v34, %v636_v30 }
 0x756   :  { %v648_v38 = vsel %vm331_vm8, %v647_v36, %v638_v35 }
 0x757   :  { %v650_v40 = vsel %vm6621_vm9, %v643_v37, %v648_v38 }
 0x758   :  { %6325 = vtanh.f32 %v650_v40 }
 0x762   :  { %v6326_v41 = vpop.eup %6325 }
 0x763   :  { %v652_v42 = vmul.f32 0.5, %v6326_v41 }
 0x765   :  { %v653_v43 = vadd.f32 0.5, %v652_v42 }
 0x767   :  { %v654_v44 = vsel %vm6621_vm9, %v6326_v41, %v653_v43 }
 0x768   :  { %657 = vrot.lane.b32.xlu0 %v654_v44, %s6446_s17  ;;  %v655_v47 = vmul.f32 %v654_v44, %v510_v19 }
 0x7da   :  { %v658_v45 = vpop.permute.xlu0 %657 }
 0x7db   :  { %v660_v46 = vmul.f32 %v658_v45, %v654_v44 }
 0x7dd   :  { %662 = vrot.lane.b32.xlu1 %v660_v46, %s6447_s18 }
 0x84f   :  { %v663_v48 = vpop.permute.xlu1 %662 }
 0x850   :  { %v665_v49 = vadd.f32 %v663_v48, %v655_v47 }
 0x852   :  { %6327 = vtanh.f32 %v665_v49 }
 0x85c   :  { %v6328_v50 = vpop.eup %6327 }
 0x85d   :  { %668 = vrot.lane.b32.xlu0 %v6328_v50, %s6446_s17 }
 0x8cf   :  { %v669_v51 = vpop.permute.xlu0 %668 }
 0x8d0   :  { %v6674_v52 = vmul.f32 %v669_v51, %v654_v44 }
 0x8d2   :  { %713 = vrot.lane.b32.xlu1 %v6674_v52, %s6447_s18 }
 0x944   :  { %v714_v53 = vpop.permute.xlu1 %713 }
 0x945   :  { %5724 = vmatmul.mubr.msk.f32.vlgmr.msra.gmra.mrb[4].mxu1 %vm152_vm5, %v714_v53 }
 0x946   :  { %6117 = vmatpush3.bf16.msra.mxu1 %v6559_v11  ;;  %5745 = vmatprep.mubr.msk.f32.mxu1 %vm6444_vm4, %v6445_v16 }
 0x947   :  { %6118 = vmatprep.subr.bf16.mxu1 %v6443_v12 }
 0x94a   :  { %6120 = vmatpush3.bf16.msra.mxu1 %v6571_v15 }
 0x94b   :  { %6127 = vmatprep.subr.bf16.mxu1 %v6443_v12 }
 0xa18   :  { %v783_v54 = vpop.f32.mrb[4].mxu1 }
 0xa19   :  { %v788_v56 = vrot.slane %v783_v54, 1  ;;  %v5725_v57 = vpop.f32.mrb[5].mxu1  ;;  %v791_v60 = vadd.f32 %v783_v54, %v711_v58  ;;  %v1021_v58 = vld [vmem:[#allocation3 + $0x5] sm:$0x1] }
 0xa1b   :  { %v792_v61 = vadd.f32 %v788_v56, %v712_v59  ;;  %v793_v0 = vmul.f32 0.5, %v791_v60  ;;  %v1022_v59 = vld [vmem:[#allocation3 + $0xd] sm:$0x1] }
 0xa1d   :  { %v794_v62 = vmul.f32 0.5, %v792_v61  ;;  %v797_v63 = vrot.slane %v792_v61, 7 }
 0xa1f   :  { %v802_v1 = vrot.slane %v794_v62, 7  ;;  %v798_v2 = vsel %vm331_vm8, %v797_v63, %v791_v60 }
 0xa21   :  { %v803_v3 = vsel %vm331_vm8, %v802_v1, %v793_v0 }
 0xa22   :  { %v805_v4 = vsel %vm6621_vm9, %v798_v2, %v803_v3 }
 0xa23   :  { %6329 = vtanh.f32 %v805_v4 }
 0xa2d   :  { %v6330_v5 = vpop.eup %6329 }
 0xa2e   :  { %v807_v6 = vmul.f32 0.5, %v6330_v5 }
 0xa30   :  { %v808_v7 = vadd.f32 0.5, %v807_v6 }
 0xa32   :  { %v809_v8 = vsel %vm6621_vm9, %v6330_v5, %v808_v7 }
 0xa33   :  { %812 = vrot.lane.b32.xlu0 %v809_v8, %s6446_s17  ;;  %v810_v13 = vmul.f32 %v809_v8, %v665_v49 }
 0xaa5   :  { %v813_v9 = vpop.permute.xlu0 %812 }
 0xaa6   :  { %v815_v10 = vmul.f32 %v813_v9, %v809_v8 }
 0xaa8   :  { %817 = vrot.lane.b32.xlu1 %v815_v10, %s6447_s18 }
 0xb1a   :  { %v818_v14 = vpop.permute.xlu1 %817 }
 0xb1b   :  { %v820_v17 = vadd.f32 %v818_v14, %v810_v13 }
 0xb1d   :  { %6331 = vtanh.f32 %v820_v17 }
 0xb27   :  { %v6332_v18 = vpop.eup %6331 }
 0xb28   :  { %823 = vrot.lane.b32.xlu0 %v6332_v18, %s6446_s17 }
 0xb9a   :  { %v824_v19 = vpop.permute.xlu0 %823 }
 0xb9b   :  { %v6694_v20 = vmul.f32 %v824_v19, %v809_v8 }
 0xb9d   :  { %868 = vrot.lane.b32.xlu1 %v6694_v20, %s6447_s18 }
 0xc0f   :  { %v869_v21 = vpop.permute.xlu1 %868 }
 0xc10   :  { %5735 = vmatmul.mubr.msk.f32.vlgmr.msra.gmra.mrb[6].mxu0 %vm152_vm5, %v869_v21 }
 0xc11   :  { %6123 = vmatpush3.bf16.msra.mxu0 %v6559_v11  ;;  %5756 = vmatprep.mubr.msk.f32.mxu0 %vm6444_vm4, %v6445_v16 }
 0xc12   :  { %6124 = vmatprep.subr.bf16.mxu0 %v6443_v12 }
 0xc15   :  { %6126 = vmatpush3.bf16.msra.mxu0 %v6571_v15 }
 0xce3   :  { %v938_v23 = vpop.f32.mrb[6].mxu0 }
 0xce4   :  { %v943_v24 = vrot.slane %v938_v23, 1  ;;  %v5736_v25 = vpop.f32.mrb[7].mxu0  ;;  %v946_v28 = vadd.f32 %v938_v23, %v866_v26  ;;  %v1177_v26 = vld [vmem:[#allocation3 + $0xe] sm:$0x1] }
 0xce5   :  { %v1176_v25 = vld [vmem:[#allocation3 + $0x6] sm:$0x1] }
 0xce6   :  { %v947_v30 = vadd.f32 %v943_v24, %v867_v27  ;;  %v948_v34 = vmul.f32 0.5, %v946_v28 }
 0xce8   :  { %v949_v32 = vmul.f32 0.5, %v947_v30  ;;  %v952_v33 = vrot.slane %v947_v30, 7 }
 0xcea   :  { %v957_v35 = vrot.slane %v949_v32, 7  ;;  %v953_v36 = vsel %vm331_vm8, %v952_v33, %v946_v28 }
 0xcec   :  { %v958_v37 = vsel %vm331_vm8, %v957_v35, %v948_v34 }
 0xced   :  { %v960_v38 = vsel %vm6621_vm9, %v953_v36, %v958_v37 }
 0xcee   :  { %6333 = vtanh.f32 %v960_v38 }
 0xcf8   :  { %v6334_v40 = vpop.eup %6333 }
 0xcf9   :  { %v962_v41 = vmul.f32 0.5, %v6334_v40 }
 0xcfb   :  { %v963_v42 = vadd.f32 0.5, %v962_v41 }
 0xcfd   :  { %v964_v43 = vsel %vm6621_vm9, %v6334_v40, %v963_v42 }
 0xcfe   :  { %967 = vrot.lane.b32.xlu0 %v964_v43, %s6446_s17  ;;  %v965_v46 = vmul.f32 %v964_v43, %v820_v17 }
 0xd70   :  { %v968_v44 = vpop.permute.xlu0 %967 }
 0xd71   :  { %v970_v45 = vmul.f32 %v968_v44, %v964_v43 }
 0xd73   :  { %972 = vrot.lane.b32.xlu1 %v970_v45, %s6447_s18 }
 0xde5   :  { %v973_v47 = vpop.permute.xlu1 %972 }
 0xde6   :  { %v975_v48 = vadd.f32 %v973_v47, %v965_v46 }
 0xde8   :  { %6335 = vtanh.f32 %v975_v48 }
 0xdf2   :  { %v6336_v49 = vpop.eup %6335 }
 0xdf3   :  { %978 = vrot.lane.b32.xlu0 %v6336_v49, %s6446_s17 }
 0xe65   :  { %v979_v50 = vpop.permute.xlu0 %978 }
 0xe66   :  { %v6713_v51 = vmul.f32 %v979_v50, %v964_v43 }
 0xe68   :  { %1023 = vrot.lane.b32.xlu1 %v6713_v51, %s6447_s18 }
 0xeda   :  { %v1024_v53 = vpop.permute.xlu1 %1023 }
 0xedb   :  { %5746 = vmatmul.mubr.msk.f32.vlgmr.msra.gmra.mrb[6].mxu1 %vm152_vm5, %v1024_v53 }
 0xedc   :  { %6129 = vmatpush3.bf16.msra.mxu1 %v6559_v11  ;;  %5767 = vmatprep.mubr.msk.f32.mxu1 %vm6444_vm4, %v6445_v16 }
 0xedd   :  { %6130 = vmatprep.subr.bf16.mxu1 %v6443_v12 }
 0xee0   :  { %6132 = vmatpush3.bf16.msra.mxu1 %v6571_v15 }
 0xee1   :  { %6141 = vmatprep.subr.bf16.mxu1 %v6443_v12 }
 0xfae   :  { %v1093_v54 = vpop.f32.mrb[6].mxu1 }
 0xfaf   :  { %v1098_v56 = vrot.slane %v1093_v54, 1  ;;  %v5747_v57 = vpop.f32.mrb[7].mxu1  ;;  %v1101_v60 = vadd.f32 %v1093_v54, %v1021_v58  ;;  %v1331_v58 = vld [vmem:[#allocation3 + $0x7] sm:$0x1] }
 0xfb1   :  { %v1102_v61 = vadd.f32 %v1098_v56, %v1022_v59  ;;  %v1103_v0 = vmul.f32 0.5, %v1101_v60  ;;  %v1332_v59 = vld [vmem:[#allocation3 + $0xf] sm:$0x1] }
 0xfb3   :  { %v1104_v62 = vmul.f32 0.5, %v1102_v61  ;;  %v1107_v63 = vrot.slane %v1102_v61, 7 }
 0xfb5   :  { %v1112_v11 = vrot.slane %v1104_v62, 7  ;;  %v1108_v1 = vsel %vm331_vm8, %v1107_v63, %v1101_v60 }
 0xfb7   :  { %v1113_v2 = vsel %vm331_vm8, %v1112_v11, %v1103_v0 }
 0xfb8   :  { %v1115_v15 = vsel %vm6621_vm9, %v1108_v1, %v1113_v2 }
 0xfb9   :  { %6337 = vtanh.f32 %v1115_v15 }
 0xfc3   :  { %v6338_v3 = vpop.eup %6337 }
 0xfc4   :  { %v1117_v4 = vmul.f32 0.5, %v6338_v3 }
 0xfc6   :  { %v1118_v5 = vadd.f32 0.5, %v1117_v4 }
 0xfc8   :  { %v1119_v6 = vsel %vm6621_vm9, %v6338_v3, %v1118_v5 }
 0xfc9   :  { %1122 = vrot.lane.b32.xlu0 %v1119_v6, %s6446_s17  ;;  %v1120_v9 = vmul.f32 %v1119_v6, %v975_v48 }
0x103b   :  { %v1123_v7 = vpop.permute.xlu0 %1122 }
0x103c   :  { %v1125_v8 = vmul.f32 %v1123_v7, %v1119_v6  ;;  %v6448_v7 = vmov 1966171168  }
0x103e   :  { %1127 = vrot.lane.b32.xlu1 %v1125_v8, %s6447_s18  ;;  %v363_v8 = vunpack.c.l.s4 %v6448_v7 }
0x10b0   :  { %v1128_v10 = vpop.permute.xlu1 %1127 }
0x10b1   :  { %v1130_v13 = vadd.f32 %v1128_v10, %v1120_v9  ;;  %v364_v9 = vunpack.c.0.s8 %v363_v8  ;;  %v366_v10 = vshrl.u32 %v321_v29, 7 }
0x10b3   :  { %6339 = vtanh.f32 %v1130_v13 }
0x10bd   :  { %v6340_v14 = vpop.eup %6339 }
0x10be   :  { %1133 = vrot.lane.b32.xlu0 %v6340_v14, %s6446_s17 }
0x1130   :  { %v1134_v17 = vpop.permute.xlu0 %1133 }
0x1131   :  { %v6733_v18 = vmul.f32 %v1134_v17, %v1119_v6 }
0x1133   :  { %1178 = vrot.lane.b32.xlu1 %v6733_v18, %s6447_s18 }
0x11a5   :  { %v1179_v19 = vpop.permute.xlu1 %1178 }
0x11a6   :  { %5757 = vmatmul.mubr.msk.f32.vlgmr.msra.gmra.mrb[8].mxu0 %vm152_vm5, %v1179_v19  ;;  %v6769_v19 = vsub.s32 0, %v366_v10 }
0x1279   :  { %v1248_v21 = vpop.f32.mrb[8].mxu0 }
0x127a   :  { %v1253_v23 = vrot.slane %v1248_v21, 1  ;;  %v5758_v24 = vpop.f32.mrb[9].mxu0  ;;  %v1256_v27 = vadd.f32 %v1248_v21, %v1176_v25 }
0x127c   :  { %v1257_v28 = vadd.f32 %v1253_v23, %v1177_v26  ;;  %v1258_v33 = vmul.f32 0.5, %v1256_v27 }
0x127e   :  { %v1259_v30 = vmul.f32 0.5, %v1257_v28  ;;  %v1262_v32 = vrot.slane %v1257_v28, 7 }
0x1280   :  { %v1267_v34 = vrot.slane %v1259_v30, 7  ;;  %v1263_v35 = vsel %vm331_vm8, %v1262_v32, %v1256_v27 }
0x1282   :  { %v1268_v36 = vsel %vm331_vm8, %v1267_v34, %v1258_v33 }
0x1283   :  { %v1270_v37 = vsel %vm6621_vm9, %v1263_v35, %v1268_v36 }
0x1284   :  { %6341 = vtanh.f32 %v1270_v37 }
0x128e   :  { %v6342_v38 = vpop.eup %6341 }
0x128f   :  { %v1272_v40 = vmul.f32 0.5, %v6342_v38 }
0x1291   :  { %v1273_v41 = vadd.f32 0.5, %v1272_v40 }
0x1293   :  { %v1274_v42 = vsel %vm6621_vm9, %v6342_v38, %v1273_v41 }
0x1294   :  { %1277 = vrot.lane.b32.xlu0 %v1274_v42, %s6446_s17  ;;  %v1275_v45 = vmul.f32 %v1274_v42, %v1130_v13  ;;  %v6765_v13 = vsub.s32 %v364_v9, %v366_v10 }
0x1296   :  { %v368_v14 = vrot.slane %v6634_v55, %v6765_v13  ;;  %v679_v23 = vrot.slane %v6674_v52, %v6765_v13  ;;  %v989_v29 = vrot.slane %v6713_v51, %v6765_v13 }
0x1298   :  { %v376_v21 = vrot.slane %v368_v14, %v6765_v13  ;;  %v687_v25 = vrot.slane %v679_v23, %v6765_v13  ;;  %v997_v55 = vrot.slane %v989_v29, %v6765_v13  ;;  %v369_v52 = vcombine.high %v368_v14, %v368_v14 }
0x1299   :  { %v680_v51 = vcombine.high %v679_v23, %v679_v23  ;;  %v990_v35 = vcombine.high %v989_v29, %v989_v29  ;;  %v5401_v23 = vld [vmem:[%s7684_s4 + $0x28] sm:$0xff] }
0x129a   :  { %v387_v26 = vrot.slane %v376_v21, %v6769_v19  ;;  %v698_v28 = vrot.slane %v687_v25, %v6769_v19  ;;  %v1008_v32 = vrot.slane %v997_v55, %v6769_v19  ;;  %v383_v34 = vrot.slane %v369_v52, %v6765_v13  ;;  %v5400_v21 = vld [vmem:[%s7684_s4 + $0x20] sm:$0xff] }
0x129b   :  { %v694_v37 = vrot.slane %v680_v51, %v6765_v13  ;;  %v1004_v41 = vrot.slane %v990_v35, %v6765_v13  ;;  %v6133_v25 = vpack.c.bf16 %v5401_v23, %v5400_v21  ;;  %v5408_v51 = vld [vmem:[%s7685_s5 + $0x28] sm:$0xff]  ;;  %v5410_v35 = vld [vmem:[%s7685_s5 + $0x38] sm:$0xff] }
0x129c   :  { %v391_v36 = vrot.slane %v383_v34, %v6769_v19 }
0x129d   :  { %v702_v40 = vrot.slane %v694_v37, %v6769_v19  ;;  %6134 = vmatprep.subr.bf16.mxu0 %v6133_v25 }
0x129e   :  { %6136 = vmatpush3.bf16.msra.mxu0 %v6133_v25 }
0x1306   :  { %v1278_v43 = vpop.permute.xlu0 %1277 }
0x1307   :  { %v1280_v44 = vmul.f32 %v1278_v43, %v1274_v42 }
0x1309   :  { %1282 = vrot.lane.b32.xlu1 %v1280_v44, %s6447_s18 }
0x137b   :  { %v1283_v46 = vpop.permute.xlu1 %1282 }
0x137c   :  { %v6746_v47 = vadd.f32 %v1283_v46, %v1275_v45 }
0x137e   :  { %6343 = vtanh.f32 %v6746_v47 }
0x1388   :  { %v6344_v48 = vpop.eup %6343 }
0x1389   :  { %1288 = vrot.lane.b32.xlu0 %v6344_v48, %s6446_s17 }
0x13fb   :  { %v1289_v49 = vpop.permute.xlu0 %1288 }
0x13fc   :  { %v1291_v50 = vmul.f32 %v1289_v49, %v1274_v42  ;;  %v1012_v42 = vrot.slane %v1004_v41, %v6769_v19 }
0x13fe   :  { %1333 = vrot.lane.b32.xlu1 %v1291_v50, %s6447_s18  ;;  %v1299_v27 = vrot.slane %v1291_v50, %v6765_v13  ;;  %v524_v50 = vrot.slane %v6654_v22, %v6765_v13 }
0x1400   :  { %v1307_v30 = vrot.slane %v1299_v27, %v6765_v13  ;;  %v1300_v38 = vcombine.high %v1299_v27, %v1299_v27  ;;  %v5402_v27 = vld [vmem:[%s7684_s4 + $0x30] sm:$0xff] }
0x1402   :  { %v1318_v33 = vrot.slane %v1307_v30, %v6769_v19  ;;  %v1314_v43 = vrot.slane %v1300_v38, %v6765_v13 }
0x1404   :  { %v1322_v44 = vrot.slane %v1314_v43, %v6769_v19 }
0x1470   :  { %v1334_v53 = vpop.permute.xlu1 %1333 }
0x1471   :  { %5768 = vmatmul.mubr.msk.f32.vlgmr.msra.gmra.mrb[8].mxu1 %vm152_vm5, %v1334_v53 }
0x1472   :  { %5789 = vmatprep.mubr.msk.f32.mxu1 %vm6444_vm4, %v6445_v16 }
0x1544   :  { %v1403_v54 = vpop.f32.mrb[8].mxu1 }
0x1545   :  { %v1408_v56 = vrot.slane %v1403_v54, 1  ;;  %v5769_v57 = vpop.f32.mrb[9].mxu1  ;;  %v1411_v60 = vadd.f32 %v1403_v54, %v1331_v58  ;;  %v532_v54 = vrot.slane %v524_v50, %v6765_v13 }
0x1547   :  { %v1412_v61 = vadd.f32 %v1408_v56, %v1332_v59  ;;  %v1413_v0 = vmul.f32 0.5, %v1411_v60  ;;  %v834_v56 = vrot.slane %v6694_v20, %v6765_v13  ;;  %v1144_v59 = vrot.slane %v6733_v18, %v6765_v13 }
0x1549   :  { %v1414_v62 = vmul.f32 0.5, %v1412_v61  ;;  %v1417_v63 = vrot.slane %v1412_v61, 7  ;;  %v842_v58 = vrot.slane %v834_v56, %v6765_v13  ;;  %v525_v61 = vcombine.high %v524_v50, %v524_v50  ;;  %v5404_v50 = vld [vmem:[%s7687_s6 + $0x1] ss:$0 sm:$0xff] }
0x154a   :  { %v1152_v20 = vrot.slane %v1144_v59, %v6765_v13 }
0x154b   :  { %v1422_v11 = vrot.slane %v1414_v62, 7  ;;  %v1418_v1 = vsel %vm331_vm8, %v1417_v63, %v1411_v60  ;;  %v543_v60 = vrot.slane %v532_v54, %v6769_v19  ;;  %v853_v63 = vrot.slane %v842_v58, %v6769_v19 }
0x154c   :  { %v1163_v18 = vrot.slane %v1152_v20, %v6769_v19 }
0x154d   :  { %v1423_v2 = vsel %vm331_vm8, %v1422_v11, %v1413_v0  ;;  %v835_v0 = vcombine.high %v834_v56, %v834_v56 }
0x154e   :  { %v1425_v15 = vsel %vm6621_vm9, %v1418_v1, %v1423_v2  ;;  %v539_v1 = vrot.slane %v525_v61, %v6765_v13  ;;  %v1145_v2 = vcombine.high %v1144_v59, %v1144_v59 }
0x154f   :  { %6345 = vtanh.f32 %v1425_v15 }
0x1550   :  { %v1159_v8 = vrot.slane %v1145_v2, %v6765_v13 }
0x1552   :  { %v1167_v9 = vrot.slane %v1159_v8, %v6769_v19 }
0x1559   :  { %v6346_v3 = vpop.eup %6345 }
0x155a   :  { %v1427_v4 = vmul.f32 0.5, %v6346_v3 }
0x155c   :  { %v1428_v5 = vadd.f32 0.5, %v1427_v4  ;;  %v849_v4 = vrot.slane %v835_v0, %v6765_v13 }
0x155e   :  { %v6760_v6 = vsel %vm6621_vm9, %v6346_v3, %v1428_v5  ;;  %v547_v3 = vrot.slane %v539_v1, %v6769_v19  ;;  %v857_v7 = vrot.slane %v849_v4, %v6769_v19 }
0x155f   :  { %1432 = vrot.lane.b32.xlu0 %v6760_v6, %s6446_s17  ;;  %v1430_v45 = vmul.f32 %v6760_v6, %v6746_v47 }
0x15d1   :  { %v1433_v17 = vpop.permute.xlu0 %1432 }
0x15d2   :  { %v1435_v24 = vmul.f32 %v1433_v17, %v6760_v6 }
0x15d4   :  { %1437 = vrot.lane.b32.xlu1 %v1435_v24, %s6447_s18 }
0x15d8   :  { %392 = vrot.lane.b32.xlu1 %v387_v26, %s6447_s18 }
0x15dc   :  { %703 = vrot.lane.b32.xlu1 %v698_v28, %s6447_s18  ;;  %v5403_v28 = vld [vmem:[%s7684_s4 + $0x38] sm:$0xff] }
0x15dd   :  { %v6137_v30 = vpack.c.bf16 %v5403_v28, %v5402_v27 }
0x15df   :  { %6138 = vmatprep.subr.bf16.mxu0 %v6137_v30 }
0x15e0   :  { %1013 = vrot.lane.b32.xlu1 %v1008_v32, %s6447_s18  ;;  %v5407_v32 = vld [vmem:[%s7685_s5 + $0x20] sm:$0xff]  ;;  %6140 = vmatpush3.bf16.msra.mxu0 %v6137_v30 }
0x15e1   :  { %v6866_v34 = vpack.c.bf16 %v5408_v51, %v5407_v32  ;;  %6147 = vmatprep.subr.bf16.mxu0 %v6443_v12 }
0x15e3   :  { %6143 = vmatpush3.bf16.msra.mxu1 %v6866_v34 }
0x15e4   :  { %1323 = vrot.lane.b32.xlu1 %v1318_v33, %s6447_s18  ;;  %v5409_v33 = vld [vmem:[%s7685_s5 + $0x30] sm:$0xff]  ;;  %6144 = vmatprep.subr.bf16.mxu1 %v6443_v12 }
0x15e5   :  { %v6873_v37 = vpack.c.bf16 %v5410_v35, %v5409_v33 }
0x15e7   :  { %6146 = vmatpush3.bf16.msra.mxu1 %v6873_v37 }
0x15e8   :  { %394 = vrot.lane.b32.xlu1 %v391_v36, %s6447_s18  ;;  %6153 = vmatprep.subr.bf16.mxu1 %v6443_v12 }
0x15ea   :  { %5790 = vmatmul.mubr.f32.vlgmr.msra.gmra.mrb[10].mxu1 %v6445_v16 }
0x15eb   :  { %6155 = vmatpush3.bf16.msra.mxu1 %v6866_v34  ;;  %5811 = vmatprep.mubr.msk.f32.mxu1 %vm6444_vm4, %v6445_v16 }
0x15ec   :  { %705 = vrot.lane.b32.xlu1 %v702_v40, %s6447_s18  ;;  %6156 = vmatprep.subr.bf16.mxu1 %v6443_v12 }
0x15ef   :  { %6158 = vmatpush3.bf16.msra.mxu1 %v6873_v37 }
0x15f0   :  { %1015 = vrot.lane.b32.xlu1 %v1012_v42, %s6447_s18  ;;  %6165 = vmatprep.subr.bf16.mxu1 %v6443_v12 }
0x15f4   :  { %1325 = vrot.lane.b32.xlu1 %v1322_v44, %s6447_s18 }
0x1646   :  { %v1438_v46 = vpop.permute.xlu1 %1437 }
0x1647   :  { %v1440_v48 = vadd.f32 %v1438_v46, %v1430_v45 }
0x1649   :  { %6347 = vtanh.f32 %v1440_v48 }
0x164a   :  { %v393_v49 = vpop.permute.xlu1 %392 }
0x164b   :  { %399 = vst.msk [vmem:[#allocation2] sm:$0x1] %vm398_vm10, %v393_v49 }
0x164e   :  { %v704_v53 = vpop.permute.xlu1 %703 }
0x164f   :  { %709 = vst.msk [vmem:[#allocation2 + $0x2] sm:$0x1] %vm398_vm10, %v704_v53 }
0x1652   :  { %v1014_v57 = vpop.permute.xlu1 %1013 }
0x1653   :  { %v6348_v47 = vpop.eup %6347  ;;  %1019 = vst.msk [vmem:[#allocation2 + $0x4] sm:$0x1] %vm398_vm10, %v1014_v57 }
0x1654   :  { %1443 = vrot.lane.b32.xlu0 %v6348_v47, %s6446_s17 }
0x1656   :  { %v1324_v22 = vpop.permute.xlu1 %1323 }
0x1657   :  { %1329 = vst.msk [vmem:[#allocation2 + $0x6] sm:$0x1] %vm398_vm10, %v1324_v22 }
0x1658   :  { %548 = vrot.lane.b32.xlu0 %v543_v60, %s6447_s18 }
0x165a   :  { %v395_v62 = vpop.permute.xlu1 %394 }
0x165b   :  { %400 = vst.msk [vmem:[#allocation2 + $0x8] sm:$0x1] %vm398_vm10, %v395_v62 }
0x165c   :  { %858 = vrot.lane.b32.xlu0 %v853_v63, %s6447_s18 }
0x165e   :  { %v706_v11 = vpop.permute.xlu1 %705 }
0x165f   :  { %710 = vst.msk [vmem:[#allocation2 + $0xa] sm:$0x1] %vm398_vm10, %v706_v11 }
0x1660   :  { %1168 = vrot.lane.b32.xlu0 %v1163_v18, %s6447_s18 }
0x1662   :  { %v1016_v15 = vpop.permute.xlu1 %1015 }
0x1663   :  { %1020 = vst.msk [vmem:[#allocation2 + $0xc] sm:$0x1] %vm398_vm10, %v1016_v15 }
0x1664   :  { %550 = vrot.lane.b32.xlu0 %v547_v3, %s6447_s18 }
0x1666   :  { %v1326_v5 = vpop.permute.xlu1 %1325 }
0x1667   :  { %1330 = vst.msk [vmem:[#allocation2 + $0xe] sm:$0x1] %vm398_vm10, %v1326_v5 }
0x1668   :  { %860 = vrot.lane.b32.xlu0 %v857_v7, %s6447_s18 }
0x166c   :  { %1170 = vrot.lane.b32.xlu0 %v1167_v9, %s6447_s18 }
0x16bd   :  { %v1654_v48 = vpop.f32.mrb[10].mxu1 }
0x16be   :  { %v5791_v49 = vpop.f32.mrb[11].mxu1  ;;  %v1659_v47 = vrot.slane %v1654_v48, 1 }
0x16c6   :  { %v1444_v10 = vpop.permute.xlu0 %1443 }
0x16c7   :  { %v1446_v14 = vmul.f32 %v1444_v10, %v6760_v6 }
0x16c9   :  { %v1454_v17 = vrot.slane %v1446_v14, %v6765_v13 }
0x16ca   :  { %v549_v24 = vpop.permute.xlu0 %548 }
0x16cb   :  { %v1455_v29 = vcombine.high %v1454_v17, %v1454_v17  ;;  %v1462_v26 = vrot.slane %v1454_v17, %v6765_v13  ;;  %554 = vst.msk [vmem:[#allocation2 + $0x1] sm:$0x1] %vm398_vm10, %v549_v24 }
0x16cd   :  { %v1473_v6 = vrot.slane %v1462_v26, %v6769_v19  ;;  %v1469_v55 = vrot.slane %v1455_v29, %v6765_v13 }
0x16ce   :  { %v859_v52 = vpop.permute.xlu0 %858 }
0x16cf   :  { %864 = vst.msk [vmem:[#allocation2 + $0x3] sm:$0x1] %vm398_vm10, %v859_v52  ;;  %1478 = vrot.lane.b32.xlu0 %v1473_v6, %s6447_s18  ;;  %v1477_v36 = vrot.slane %v1469_v55, %v6769_v19 }
0x16d2   :  { %v1169_v38 = vpop.permute.xlu0 %1168 }
0x16d3   :  { %1174 = vst.msk [vmem:[#allocation2 + $0x5] sm:$0x1] %vm398_vm10, %v1169_v38  ;;  %1480 = vrot.lane.b32.xlu0 %v1477_v36, %s6447_s18 }
0x16d6   :  { %v551_v40 = vpop.permute.xlu0 %550 }
0x16d7   :  { %555 = vst.msk [vmem:[#allocation2 + $0x9] sm:$0x1] %vm398_vm10, %v551_v40 }
0x16da   :  { %v861_v41 = vpop.permute.xlu0 %860 }
0x16db   :  { %865 = vst.msk [vmem:[#allocation2 + $0xb] sm:$0x1] %vm398_vm10, %v861_v41 }
0x16de   :  { %v1171_v42 = vpop.permute.xlu0 %1170 }
0x16df   :  { %1175 = vst.msk [vmem:[#allocation2 + $0xd] sm:$0x1] %vm398_vm10, %v1171_v42 }
0x1741   :  { %v1479_v43 = vpop.permute.xlu0 %1478 }
0x1742   :  { %1484 = vst.msk [vmem:[#allocation2 + $0x7] sm:$0x1] %vm398_vm10, %v1479_v43 }
0x1745   :  { %v1481_v44 = vpop.permute.xlu0 %1480 }
0x1746   :  { %1485 = vst.msk [vmem:[#allocation2 + $0xf] sm:$0x1] %vm398_vm10, %v1481_v44 }
0x1749   :  { %v1486_v45 = vld [vmem:[#allocation2] sm:$0xff] }
0x174a   :  { %5778 = vmatprep.mubr.msk.f32.mxu0 %vm152_vm5, %v1486_v45 }
0x174d   :  { %v1487_v46 = vld [vmem:[#allocation2 + $0x8] sm:$0xff] }
0x174e   :  { %5779 = vmatmul.mubr.msk.f32.vlgmr.msra.gmra.mrb[10].mxu0 %vm152_vm5, %v1487_v46 }
0x174f   :  { %6149 = vmatpush3.bf16.msra.mxu0 %v6866_v34  ;;  %5800 = vmatprep.mubr.msk.f32.mxu0 %vm6444_vm4, %v6445_v16 }
0x1750   :  { %6150 = vmatprep.subr.bf16.mxu0 %v6443_v12 }
0x1753   :  { %6152 = vmatpush3.bf16.msra.mxu0 %v6873_v37 }
0x1754   :  { %6159 = vmatprep.subr.bf16.mxu0 %v6443_v12 }
0x1821   :  { %v5780_v53 = vpop.f32.mrb[10].mxu0 }
0x1822   :  { %v1576_v54 = vadd.f32 %v5780_v53, %v5404_v50  ;;  %v1570_v56 = vpop.f32.mrb[11].mxu0 }
0x1823   :  { %v1571_v57 = vadd.f32 %v5404_v50, %v1570_v56 }
0x1824   :  { %1580 = vst [vmem:[#allocation3 + $0x8] sm:$0xff] %v1576_v54 }
0x1825   :  { %1579 = vst [vmem:[#allocation3] sm:$0xff] %v1571_v57 }
0x182b   :  { %v1587_v58 = vld [vmem:[#allocation3 + $0x8] sm:$0x1]  ;;  %v1738_v26 = vld [vmem:[#allocation3 + $0x9] sm:$0x1] }
0x182c   :  { %v1586_v59 = vld [vmem:[#allocation3] sm:$0x1]  ;;  %v1663_v22 = vadd.f32 %v1659_v47, %v1587_v58  ;;  %v1737_v29 = vld [vmem:[#allocation3 + $0x1] sm:$0x1]  ;;  %v1892_v57 = vld [vmem:[#allocation3 + $0x2] sm:$0x1] }
0x182d   :  { %v1662_v60 = vadd.f32 %v1654_v48, %v1586_v59  ;;  %v1893_v47 = vld [vmem:[#allocation3 + $0xa] sm:$0x1] }
0x182e   :  { %v1665_v61 = vmul.f32 0.5, %v1663_v22  ;;  %v1668_v20 = vrot.slane %v1663_v22, 7 }
0x182f   :  { %v1664_v62 = vmul.f32 0.5, %v1662_v60 }
0x1830   :  { %v1673_v63 = vrot.slane %v1665_v61, 7  ;;  %v1669_v0 = vsel %vm331_vm8, %v1668_v20, %v1662_v60 }
0x1832   :  { %v1674_v11 = vsel %vm331_vm8, %v1673_v63, %v1664_v62 }
0x1833   :  { %v1676_v18 = vsel %vm6621_vm9, %v1669_v0, %v1674_v11 }
0x1834   :  { %6349 = vtanh.f32 %v1676_v18 }
0x183e   :  { %v6350_v1 = vpop.eup %6349 }
0x183f   :  { %v1678_v2 = vmul.f32 0.5, %v6350_v1 }
0x1841   :  { %v1679_v15 = vadd.f32 0.5, %v1678_v2 }
0x1843   :  { %v1680_v3 = vsel %vm6621_vm9, %v6350_v1, %v1679_v15 }
0x1844   :  { %1683 = vrot.lane.b32.xlu1 %v1680_v3, %s6446_s17  ;;  %v1681_v7 = vmul.f32 0.0, %v1680_v3 }
0x18b6   :  { %v1684_v4 = vpop.permute.xlu1 %1683 }
0x18b7   :  { %v1686_v5 = vmul.f32 %v1684_v4, %v1680_v3 }
0x18b9   :  { %1688 = vrot.lane.b32.xlu0 %v1686_v5, %s6447_s18 }
0x192b   :  { %v1689_v8 = vpop.permute.xlu0 %1688 }
0x192c   :  { %v1691_v9 = vadd.f32 %v1689_v8, %v1681_v7 }
0x192e   :  { %6351 = vtanh.f32 %v1691_v9 }
0x1938   :  { %v6352_v10 = vpop.eup %6351 }
0x1939   :  { %1694 = vrot.lane.b32.xlu1 %v6352_v10, %s6446_s17 }
0x19ab   :  { %v1695_v14 = vpop.permute.xlu1 %1694 }
0x19ac   :  { %v6913_v17 = vmul.f32 %v1695_v14, %v1680_v3 }
0x19ae   :  { %1739 = vrot.lane.b32.xlu0 %v6913_v17, %s6447_s18 }
0x1a20   :  { %v1740_v21 = vpop.permute.xlu0 %1739 }
0x1a21   :  { %5801 = vmatmul.mubr.msk.f32.vlgmr.msra.gmra.mrb[12].mxu0 %vm152_vm5, %v1740_v21 }
0x1a22   :  { %6161 = vmatpush3.bf16.msra.mxu0 %v6866_v34  ;;  %5822 = vmatprep.mubr.msk.f32.mxu0 %vm6444_vm4, %v6445_v16 }
0x1a23   :  { %6162 = vmatprep.subr.bf16.mxu0 %v6443_v12 }
0x1a26   :  { %6164 = vmatpush3.bf16.msra.mxu0 %v6873_v37 }
0x1a27   :  { %6171 = vmatprep.subr.bf16.mxu0 %v6443_v12 }
0x1af4   :  { %v1809_v23 = vpop.f32.mrb[12].mxu0 }
0x1af5   :  { %v1814_v24 = vrot.slane %v1809_v23, 1  ;;  %v5802_v25 = vpop.f32.mrb[13].mxu0  ;;  %v1817_v6 = vadd.f32 %v1809_v23, %v1737_v29  ;;  %v2048_v29 = vld [vmem:[#allocation3 + $0xb] sm:$0x1] }
0x1af6   :  { %v2047_v25 = vld [vmem:[#allocation3 + $0x3] sm:$0x1] }
0x1af7   :  { %v1818_v55 = vadd.f32 %v1814_v24, %v1738_v26  ;;  %v1819_v52 = vmul.f32 0.5, %v1817_v6 }
0x1af9   :  { %v1820_v27 = vmul.f32 0.5, %v1818_v55  ;;  %v1823_v28 = vrot.slane %v1818_v55, 7 }
0x1afb   :  { %v1828_v30 = vrot.slane %v1820_v27, 7  ;;  %v1824_v32 = vsel %vm331_vm8, %v1823_v28, %v1817_v6 }
0x1afd   :  { %v1829_v51 = vsel %vm331_vm8, %v1828_v30, %v1819_v52 }
0x1afe   :  { %v1831_v33 = vsel %vm6621_vm9, %v1824_v32, %v1829_v51 }
0x1aff   :  { %6353 = vtanh.f32 %v1831_v33 }
0x1b09   :  { %v6354_v35 = vpop.eup %6353 }
0x1b0a   :  { %v1833_v36 = vmul.f32 0.5, %v6354_v35 }
0x1b0c   :  { %v1834_v38 = vadd.f32 0.5, %v1833_v36 }
0x1b0e   :  { %v1835_v40 = vsel %vm6621_vm9, %v6354_v35, %v1834_v38 }
0x1b0f   :  { %1838 = vrot.lane.b32.xlu1 %v1835_v40, %s6446_s17  ;;  %v1836_v43 = vmul.f32 %v1835_v40, %v1691_v9 }
0x1b81   :  { %v1839_v41 = vpop.permute.xlu1 %1838 }
0x1b82   :  { %v1841_v42 = vmul.f32 %v1839_v41, %v1835_v40 }
0x1b84   :  { %1843 = vrot.lane.b32.xlu0 %v1841_v42, %s6447_s18 }
0x1bf6   :  { %v1844_v44 = vpop.permute.xlu0 %1843 }
0x1bf7   :  { %v1846_v45 = vadd.f32 %v1844_v44, %v1836_v43 }
0x1bf9   :  { %6355 = vtanh.f32 %v1846_v45 }
0x1c03   :  { %v6356_v46 = vpop.eup %6355 }
0x1c04   :  { %1849 = vrot.lane.b32.xlu1 %v6356_v46, %s6446_s17 }
0x1c76   :  { %v1850_v48 = vpop.permute.xlu1 %1849 }
0x1c77   :  { %v6933_v49 = vmul.f32 %v1850_v48, %v1835_v40 }
0x1c79   :  { %1894 = vrot.lane.b32.xlu0 %v6933_v49, %s6447_s18 }
0x1ceb   :  { %v1895_v50 = vpop.permute.xlu0 %1894 }
0x1cec   :  { %5812 = vmatmul.mubr.msk.f32.vlgmr.msra.gmra.mrb[12].mxu1 %vm152_vm5, %v1895_v50 }
0x1ced   :  { %6167 = vmatpush3.bf16.msra.mxu1 %v6866_v34  ;;  %5833 = vmatprep.mubr.msk.f32.mxu1 %vm6444_vm4, %v6445_v16 }
0x1cee   :  { %6168 = vmatprep.subr.bf16.mxu1 %v6443_v12 }
0x1cf1   :  { %6170 = vmatpush3.bf16.msra.mxu1 %v6873_v37 }
0x1cf2   :  { %6177 = vmatprep.subr.bf16.mxu1 %v6443_v12 }
0x1dbf   :  { %v1964_v53 = vpop.f32.mrb[12].mxu1 }
0x1dc0   :  { %v1969_v54 = vrot.slane %v1964_v53, 1  ;;  %v5813_v56 = vpop.f32.mrb[13].mxu1  ;;  %v1972_v58 = vadd.f32 %v1964_v53, %v1892_v57  ;;  %v2202_v57 = vld [vmem:[#allocation3 + $0x4] sm:$0x1] }
0x1dc2   :  { %v1973_v59 = vadd.f32 %v1969_v54, %v1893_v47  ;;  %v1974_v61 = vmul.f32 0.5, %v1972_v58  ;;  %v2203_v47 = vld [vmem:[#allocation3 + $0xc] sm:$0x1] }
0x1dc4   :  { %v1975_v22 = vmul.f32 0.5, %v1973_v59  ;;  %v1978_v60 = vrot.slane %v1973_v59, 7 }
0x1dc6   :  { %v1983_v20 = vrot.slane %v1975_v22, 7  ;;  %v1979_v62 = vsel %vm331_vm8, %v1978_v60, %v1972_v58 }
0x1dc8   :  { %v1984_v63 = vsel %vm331_vm8, %v1983_v20, %v1974_v61 }
0x1dc9   :  { %v1986_v0 = vsel %vm6621_vm9, %v1979_v62, %v1984_v63 }
0x1dca   :  { %6357 = vtanh.f32 %v1986_v0 }
0x1dd4   :  { %v6358_v11 = vpop.eup %6357 }
0x1dd5   :  { %v1988_v18 = vmul.f32 0.5, %v6358_v11 }
0x1dd7   :  { %v1989_v1 = vadd.f32 0.5, %v1988_v18 }
0x1dd9   :  { %v1990_v2 = vsel %vm6621_vm9, %v6358_v11, %v1989_v1 }
0x1dda   :  { %1993 = vrot.lane.b32.xlu1 %v1990_v2, %s6446_s17  ;;  %v1991_v4 = vmul.f32 %v1990_v2, %v1846_v45 }
0x1e4c   :  { %v1994_v15 = vpop.permute.xlu1 %1993 }
0x1e4d   :  { %v1996_v3 = vmul.f32 %v1994_v15, %v1990_v2 }
0x1e4f   :  { %1998 = vrot.lane.b32.xlu0 %v1996_v3, %s6447_s18 }
0x1ec1   :  { %v1999_v5 = vpop.permute.xlu0 %1998 }
0x1ec2   :  { %v2001_v7 = vadd.f32 %v1999_v5, %v1991_v4 }
0x1ec4   :  { %6359 = vtanh.f32 %v2001_v7 }
0x1ece   :  { %v6360_v8 = vpop.eup %6359 }
0x1ecf   :  { %2004 = vrot.lane.b32.xlu1 %v6360_v8, %s6446_s17 }
0x1f41   :  { %v2005_v9 = vpop.permute.xlu1 %2004 }
0x1f42   :  { %v6953_v10 = vmul.f32 %v2005_v9, %v1990_v2 }
0x1f44   :  { %2049 = vrot.lane.b32.xlu0 %v6953_v10, %s6447_s18 }
0x1fb6   :  { %v2050_v14 = vpop.permute.xlu0 %2049 }
0x1fb7   :  { %5823 = vmatmul.mubr.msk.f32.vlgmr.msra.gmra.mrb[14].mxu0 %vm152_vm5, %v2050_v14 }
0x1fb8   :  { %6173 = vmatpush3.bf16.msra.mxu0 %v6866_v34  ;;  %5844 = vmatprep.mubr.msk.f32.mxu0 %vm6444_vm4, %v6445_v16 }
0x1fb9   :  { %6174 = vmatprep.subr.bf16.mxu0 %v6443_v12 }
0x1fbc   :  { %6176 = vmatpush3.bf16.msra.mxu0 %v6873_v37 }
0x1fbd   :  { %6183 = vmatprep.subr.bf16.mxu0 %v6443_v12 }
0x208a   :  { %v2119_v21 = vpop.f32.mrb[14].mxu0 }
0x208b   :  { %v2124_v23 = vrot.slane %v2119_v21, 1  ;;  %v5824_v24 = vpop.f32.mrb[15].mxu0  ;;  %v2127_v26 = vadd.f32 %v2119_v21, %v2047_v25 }
0x208d   :  { %v2128_v6 = vadd.f32 %v2124_v23, %v2048_v29  ;;  %v2129_v28 = vmul.f32 0.5, %v2127_v26  ;;  %v2357_v29 = vld [vmem:[#allocation3 + $0x5] sm:$0x1] }
0x208f   :  { %v2130_v55 = vmul.f32 0.5, %v2128_v6  ;;  %v2133_v27 = vrot.slane %v2128_v6, 7 }
0x2091   :  { %v2138_v52 = vrot.slane %v2130_v55, 7  ;;  %v2134_v30 = vsel %vm331_vm8, %v2133_v27, %v2127_v26  ;;  %v2358_v26 = vld [vmem:[#allocation3 + $0xd] sm:$0x1] }
0x2093   :  { %v2139_v32 = vsel %vm331_vm8, %v2138_v52, %v2129_v28 }
0x2094   :  { %v2141_v51 = vsel %vm6621_vm9, %v2134_v30, %v2139_v32 }
0x2095   :  { %6361 = vtanh.f32 %v2141_v51 }
0x209f   :  { %v6362_v33 = vpop.eup %6361 }
0x20a0   :  { %v2143_v35 = vmul.f32 0.5, %v6362_v33 }
0x20a2   :  { %v2144_v36 = vadd.f32 0.5, %v2143_v35 }
0x20a4   :  { %v2145_v38 = vsel %vm6621_vm9, %v6362_v33, %v2144_v36 }
0x20a5   :  { %2148 = vrot.lane.b32.xlu1 %v2145_v38, %s6446_s17  ;;  %v2146_v42 = vmul.f32 %v2145_v38, %v2001_v7 }
0x2117   :  { %v2149_v40 = vpop.permute.xlu1 %2148 }
0x2118   :  { %v2151_v41 = vmul.f32 %v2149_v40, %v2145_v38 }
0x211a   :  { %2153 = vrot.lane.b32.xlu0 %v2151_v41, %s6447_s18 }
0x218c   :  { %v2154_v43 = vpop.permute.xlu0 %2153 }
0x218d   :  { %v2156_v44 = vadd.f32 %v2154_v43, %v2146_v42 }
0x218f   :  { %6363 = vtanh.f32 %v2156_v44 }
0x2199   :  { %v6364_v45 = vpop.eup %6363 }
0x219a   :  { %2159 = vrot.lane.b32.xlu1 %v6364_v45, %s6446_s17 }
0x220c   :  { %v2160_v46 = vpop.permute.xlu1 %2159 }
0x220d   :  { %v6973_v48 = vmul.f32 %v2160_v46, %v2145_v38 }
0x220f   :  { %2204 = vrot.lane.b32.xlu0 %v6973_v48, %s6447_s18 }
0x2281   :  { %v2205_v50 = vpop.permute.xlu0 %2204 }
0x2282   :  { %5834 = vmatmul.mubr.msk.f32.vlgmr.msra.gmra.mrb[14].mxu1 %vm152_vm5, %v2205_v50 }
0x2283   :  { %6179 = vmatpush3.bf16.msra.mxu1 %v6866_v34  ;;  %5855 = vmatprep.mubr.msk.f32.mxu1 %vm6444_vm4, %v6445_v16 }
0x2284   :  { %6180 = vmatprep.subr.bf16.mxu1 %v6443_v12 }
0x2287   :  { %6182 = vmatpush3.bf16.msra.mxu1 %v6873_v37 }
0x2355   :  { %v2274_v53 = vpop.f32.mrb[14].mxu1 }
0x2356   :  { %v2279_v54 = vrot.slane %v2274_v53, 1  ;;  %v5835_v56 = vpop.f32.mrb[15].mxu1  ;;  %v2282_v58 = vadd.f32 %v2274_v53, %v2202_v57  ;;  %v2512_v57 = vld [vmem:[#allocation3 + $0x6] sm:$0x1] }
0x2358   :  { %v2283_v59 = vadd.f32 %v2279_v54, %v2203_v47  ;;  %v2284_v61 = vmul.f32 0.5, %v2282_v58  ;;  %v2513_v47 = vld [vmem:[#allocation3 + $0xe] sm:$0x1] }
0x235a   :  { %v2285_v22 = vmul.f32 0.5, %v2283_v59  ;;  %v2288_v60 = vrot.slane %v2283_v59, 7 }
0x235c   :  { %v2293_v20 = vrot.slane %v2285_v22, 7  ;;  %v2289_v62 = vsel %vm331_vm8, %v2288_v60, %v2282_v58 }
0x235e   :  { %v2294_v63 = vsel %vm331_vm8, %v2293_v20, %v2284_v61 }
0x235f   :  { %v2296_v0 = vsel %vm6621_vm9, %v2289_v62, %v2294_v63 }
0x2360   :  { %6365 = vtanh.f32 %v2296_v0 }
0x236a   :  { %v6366_v11 = vpop.eup %6365 }
0x236b   :  { %v2298_v18 = vmul.f32 0.5, %v6366_v11 }
0x236d   :  { %v2299_v1 = vadd.f32 0.5, %v2298_v18 }
0x236f   :  { %v2300_v2 = vsel %vm6621_vm9, %v6366_v11, %v2299_v1 }
0x2370   :  { %2303 = vrot.lane.b32.xlu1 %v2300_v2, %s6446_s17  ;;  %v2301_v4 = vmul.f32 %v2300_v2, %v2156_v44 }
0x23e2   :  { %v2304_v15 = vpop.permute.xlu1 %2303 }
0x23e3   :  { %v2306_v3 = vmul.f32 %v2304_v15, %v2300_v2 }
0x23e5   :  { %2308 = vrot.lane.b32.xlu0 %v2306_v3, %s6447_s18 }
0x2457   :  { %v2309_v5 = vpop.permute.xlu0 %2308 }
0x2458   :  { %v2311_v7 = vadd.f32 %v2309_v5, %v2301_v4 }
0x245a   :  { %6367 = vtanh.f32 %v2311_v7 }
0x2464   :  { %v6368_v8 = vpop.eup %6367 }
0x2465   :  { %2314 = vrot.lane.b32.xlu1 %v6368_v8, %s6446_s17 }
0x24d7   :  { %v2315_v9 = vpop.permute.xlu1 %2314 }
0x24d8   :  { %v6992_v14 = vmul.f32 %v2315_v9, %v2300_v2 }
0x24da   :  { %2359 = vrot.lane.b32.xlu0 %v6992_v14, %s6447_s18 }
0x254c   :  { %v2360_v21 = vpop.permute.xlu0 %2359 }
0x254d   :  { %5845 = vmatmul.mubr.msk.f32.vlgmr.msra.gmra.mrb[16].mxu0 %vm152_vm5, %v2360_v21 }
0x254e   :  { %6185 = vmatpush3.bf16.msra.mxu0 %v6866_v34  ;;  %5866 = vmatprep.mubr.msk.f32.mxu0 %vm6444_vm4, %v6445_v16 }
0x254f   :  { %6186 = vmatprep.subr.bf16.mxu0 %v6443_v12 }
0x2552   :  { %6188 = vmatpush3.bf16.msra.mxu0 %v6873_v37 }
0x2553   :  { %6197 = vmatprep.subr.bf16.mxu0 %v6443_v12 }
0x2620   :  { %v2429_v23 = vpop.f32.mrb[16].mxu0 }
0x2621   :  { %v2434_v24 = vrot.slane %v2429_v23, 1  ;;  %v5846_v25 = vpop.f32.mrb[17].mxu0  ;;  %v2437_v6 = vadd.f32 %v2429_v23, %v2357_v29 }
0x2623   :  { %v2438_v55 = vadd.f32 %v2434_v24, %v2358_v26  ;;  %v2439_v52 = vmul.f32 0.5, %v2437_v6  ;;  %v2667_v26 = vld [vmem:[#allocation3 + $0x7] sm:$0x1] }
0x2625   :  { %v2440_v27 = vmul.f32 0.5, %v2438_v55  ;;  %v2443_v28 = vrot.slane %v2438_v55, 7 }
0x2627   :  { %v2448_v34 = vrot.slane %v2440_v27, 7  ;;  %v2444_v30 = vsel %vm331_vm8, %v2443_v28, %v2437_v6  ;;  %v2668_v6 = vld [vmem:[#allocation3 + $0xf] sm:$0x1] }
0x2629   :  { %v2449_v32 = vsel %vm331_vm8, %v2448_v34, %v2439_v52 }
0x262a   :  { %v2451_v37 = vsel %vm6621_vm9, %v2444_v30, %v2449_v32 }
0x262b   :  { %6369 = vtanh.f32 %v2451_v37 }
0x2635   :  { %v6370_v51 = vpop.eup %6369 }
0x2636   :  { %v2453_v33 = vmul.f32 0.5, %v6370_v51 }
0x2638   :  { %v2454_v35 = vadd.f32 0.5, %v2453_v33 }
0x263a   :  { %v2455_v36 = vsel %vm6621_vm9, %v6370_v51, %v2454_v35 }
0x263b   :  { %2458 = vrot.lane.b32.xlu1 %v2455_v36, %s6446_s17  ;;  %v2456_v41 = vmul.f32 %v2455_v36, %v2311_v7 }
0x26ad   :  { %v2459_v38 = vpop.permute.xlu1 %2458 }
0x26ae   :  { %v2461_v40 = vmul.f32 %v2459_v38, %v2455_v36 }
0x26b0   :  { %2463 = vrot.lane.b32.xlu0 %v2461_v40, %s6447_s18  ;;  %v1705_v40 = vrot.slane %v6913_v17, %v6765_v13 }
0x2722   :  { %v2464_v42 = vpop.permute.xlu0 %2463 }
0x2723   :  { %v2466_v43 = vadd.f32 %v2464_v42, %v2456_v41  ;;  %v1713_v42 = vrot.slane %v1705_v40, %v6765_v13 }
0x2725   :  { %6371 = vtanh.f32 %v2466_v43 }
0x272f   :  { %v6372_v44 = vpop.eup %6371 }
0x2730   :  { %2469 = vrot.lane.b32.xlu1 %v6372_v44, %s6446_s17 }
0x27a2   :  { %v2470_v45 = vpop.permute.xlu1 %2469 }
0x27a3   :  { %v7012_v46 = vmul.f32 %v2470_v45, %v2455_v36 }
0x27a5   :  { %2514 = vrot.lane.b32.xlu0 %v7012_v46, %s6447_s18 }
0x2817   :  { %v2515_v50 = vpop.permute.xlu0 %2514 }
0x2818   :  { %5856 = vmatmul.mubr.msk.f32.vlgmr.msra.gmra.mrb[16].mxu1 %vm152_vm5, %v2515_v50  ;;  %v2325_v50 = vrot.slane %v6992_v14, %v6765_v13 }
0x281a   :  { %v2333_v17 = vrot.slane %v2325_v50, %v6765_v13 }
0x28eb   :  { %v2584_v53 = vpop.f32.mrb[16].mxu1 }
0x28ec   :  { %v2589_v54 = vrot.slane %v2584_v53, 1  ;;  %v5857_v56 = vpop.f32.mrb[17].mxu1  ;;  %v2592_v58 = vadd.f32 %v2584_v53, %v2512_v57  ;;  %v1724_v53 = vrot.slane %v1713_v42, %v6769_v19  ;;  %v5420_v42 = vld [vmem:[%s7684_s4 + $0x50] sm:$0xff] }
0x28ee   :  { %v2593_v59 = vadd.f32 %v2589_v54, %v2513_v47  ;;  %v2594_v61 = vmul.f32 0.5, %v2592_v58  ;;  %v2344_v47 = vrot.slane %v2333_v17, %v6769_v19 }
0x28f0   :  { %v2595_v22 = vmul.f32 0.5, %v2593_v59  ;;  %v2598_v60 = vrot.slane %v2593_v59, 7 }
0x28f2   :  { %v2603_v20 = vrot.slane %v2595_v22, 7  ;;  %v2599_v62 = vsel %vm331_vm8, %v2598_v60, %v2592_v58  ;;  %v2326_v22 = vcombine.high %v2325_v50, %v2325_v50 }
0x28f4   :  { %v2604_v63 = vsel %vm331_vm8, %v2603_v20, %v2594_v61 }
0x28f5   :  { %v2606_v0 = vsel %vm6621_vm9, %v2599_v62, %v2604_v63  ;;  %v2340_v63 = vrot.slane %v2326_v22, %v6765_v13  ;;  %v5428_v22 = vld [vmem:[%s7685_s5 + $0x58] sm:$0xff] }
0x28f6   :  { %6373 = vtanh.f32 %v2606_v0 }
0x28f7   :  { %v2348_v0 = vrot.slane %v2340_v63, %v6769_v19 }
0x2900   :  { %v6374_v11 = vpop.eup %6373 }
0x2901   :  { %v2608_v18 = vmul.f32 0.5, %v6374_v11 }
0x2903   :  { %v2609_v1 = vadd.f32 0.5, %v2608_v18 }
0x2905   :  { %v2610_v2 = vsel %vm6621_vm9, %v6374_v11, %v2609_v1 }
0x2906   :  { %2613 = vrot.lane.b32.xlu1 %v2610_v2, %s6446_s17  ;;  %v2611_v4 = vmul.f32 %v2610_v2, %v2466_v43  ;;  %v2015_v43 = vrot.slane %v6953_v10, %v6765_v13  ;;  %v1706_v10 = vcombine.high %v1705_v40, %v1705_v40  ;;  %v5418_v40 = vld [vmem:[%s7684_s4 + $0x40] sm:$0xff] }
0x2908   :  { %v2023_v45 = vrot.slane %v2015_v43, %v6765_v13  ;;  %v2016_v14 = vcombine.high %v2015_v43, %v2015_v43  ;;  %v1720_v59 = vrot.slane %v1706_v10, %v6765_v13 }
0x290a   :  { %v2034_v56 = vrot.slane %v2023_v45, %v6769_v19  ;;  %v1728_v60 = vrot.slane %v1720_v59, %v6769_v19  ;;  %v2030_v61 = vrot.slane %v2016_v14, %v6765_v13  ;;  %v5421_v45 = vld [vmem:[%s7684_s4 + $0x58] sm:$0xff]  ;;  %v5426_v14 = vld [vmem:[%s7685_s5 + $0x48] sm:$0xff] }
0x290b   :  { %v6193_v50 = vpack.c.bf16 %v5421_v45, %v5420_v42 }
0x290c   :  { %v2038_v62 = vrot.slane %v2030_v61, %v6769_v19 }
0x2978   :  { %v2614_v15 = vpop.permute.xlu1 %2613 }
0x2979   :  { %v2616_v3 = vmul.f32 %v2614_v15, %v2610_v2 }
0x297b   :  { %2618 = vrot.lane.b32.xlu0 %v2616_v3, %s6447_s18 }
0x29ed   :  { %v2619_v5 = vpop.permute.xlu0 %2618 }
0x29ee   :  { %v7025_v7 = vadd.f32 %v2619_v5, %v2611_v4  ;;  %v1860_v4 = vrot.slane %v6933_v49, %v6765_v13 }
0x29f0   :  { %6375 = vtanh.f32 %v7025_v7 }
0x29fa   :  { %v6376_v8 = vpop.eup %6375 }
0x29fb   :  { %2624 = vrot.lane.b32.xlu1 %v6376_v8, %s6446_s17  ;;  %v1868_v8 = vrot.slane %v1860_v4, %v6765_v13 }
0x2a6d   :  { %v2625_v9 = vpop.permute.xlu1 %2624 }
0x2a6e   :  { %v2627_v21 = vmul.f32 %v2625_v9, %v2610_v2  ;;  %v2170_v9 = vrot.slane %v6973_v48, %v6765_v13 }
0x2a70   :  { %2669 = vrot.lane.b32.xlu0 %v2627_v21, %s6447_s18  ;;  %v2635_v54 = vrot.slane %v2627_v21, %v6765_v13 }
0x2a72   :  { %v2643_v57 = vrot.slane %v2635_v54, %v6765_v13  ;;  %v2636_v20 = vcombine.high %v2635_v54, %v2635_v54 }
0x2a74   :  { %v2654_v58 = vrot.slane %v2643_v57, %v6769_v19  ;;  %v2650_v11 = vrot.slane %v2636_v20, %v6765_v13 }
0x2a76   :  { %v2658_v18 = vrot.slane %v2650_v11, %v6769_v19 }
0x2ae2   :  { %v2670_v23 = vpop.permute.xlu0 %2669 }
0x2ae3   :  { %5867 = vmatmul.mubr.msk.f32.vlgmr.msra.gmra.mrb[18].mxu0 %vm152_vm5, %v2670_v23 }
0x2ae4   :  { %5888 = vmatprep.mubr.msk.f32.mxu0 %vm6444_vm4, %v6445_v16 }
0x2bb6   :  { %v2739_v24 = vpop.f32.mrb[18].mxu0 }
0x2bb7   :  { %v2744_v25 = vrot.slane %v2739_v24, 1  ;;  %v5868_v29 = vpop.f32.mrb[19].mxu0  ;;  %v2747_v55 = vadd.f32 %v2739_v24, %v2667_v26  ;;  %v2480_v24 = vrot.slane %v7012_v46, %v6765_v13 }
0x2bb8   :  { %v1861_v29 = vcombine.high %v1860_v4, %v1860_v4  ;;  %v5422_v4 = vld [vmem:[%s7687_s6 + $0x2] ss:$0 sm:$0xff] }
0x2bb9   :  { %v2748_v27 = vadd.f32 %v2744_v25, %v2668_v6  ;;  %v2749_v34 = vmul.f32 0.5, %v2747_v55  ;;  %v1879_v25 = vrot.slane %v1868_v8, %v6769_v19  ;;  %v2488_v48 = vrot.slane %v2480_v24, %v6765_v13 }
0x2bbb   :  { %v2750_v28 = vmul.f32 0.5, %v2748_v27  ;;  %v2753_v52 = vrot.slane %v2748_v27, 7  ;;  %v2499_v46 = vrot.slane %v2488_v48, %v6769_v19 }
0x2bbd   :  { %v2758_v30 = vrot.slane %v2750_v28, 7  ;;  %v2754_v32 = vsel %vm331_vm8, %v2753_v52, %v2747_v55  ;;  %v2171_v55 = vcombine.high %v2170_v9, %v2170_v9  ;;  %v1875_v28 = vrot.slane %v1861_v29, %v6765_v13 }
0x2bbe   :  { %v2481_v52 = vcombine.high %v2480_v24, %v2480_v24 }
0x2bbf   :  { %v2759_v37 = vsel %vm331_vm8, %v2758_v30, %v2749_v34  ;;  %v1883_v30 = vrot.slane %v1875_v28, %v6769_v19 }
0x2bc0   :  { %v2761_v51 = vsel %vm6621_vm9, %v2754_v32, %v2759_v37  ;;  %v2185_v32 = vrot.slane %v2171_v55, %v6765_v13 }
0x2bc1   :  { %6377 = vtanh.f32 %v2761_v51 }
0x2bc2   :  { %v2193_v51 = vrot.slane %v2185_v32, %v6769_v19 }
0x2bcb   :  { %v6378_v33 = vpop.eup %6377 }
0x2bcc   :  { %v2763_v35 = vmul.f32 0.5, %v6378_v33 }
0x2bce   :  { %v2764_v36 = vadd.f32 0.5, %v2763_v35 }
0x2bd0   :  { %v7039_v38 = vsel %vm6621_vm9, %v6378_v33, %v2764_v36  ;;  %v2495_v33 = vrot.slane %v2481_v52, %v6765_v13 }
0x2bd1   :  { %2768 = vrot.lane.b32.xlu1 %v7039_v38, %s6446_s17  ;;  %v2766_v1 = vmul.f32 %v7039_v38, %v7025_v7  ;;  %v2178_v7 = vrot.slane %v2170_v9, %v6765_v13 }
0x2bd2   :  { %v2503_v35 = vrot.slane %v2495_v33, %v6769_v19 }
0x2bd3   :  { %v2189_v6 = vrot.slane %v2178_v7, %v6769_v19 }
0x2c43   :  { %v2769_v41 = vpop.permute.xlu1 %2768 }
0x2c44   :  { %v2771_v44 = vmul.f32 %v2769_v41, %v7039_v38  ;;  %v5419_v41 = vld [vmem:[%s7684_s4 + $0x48] sm:$0xff] }
0x2c46   :  { %2773 = vrot.lane.b32.xlu0 %v2771_v44, %s6447_s18  ;;  %v6189_v44 = vpack.c.bf16 %v5419_v41, %v5418_v40 }
0x2c48   :  { %6190 = vmatprep.subr.bf16.mxu1 %v6189_v44 }
0x2c49   :  { %6192 = vmatpush3.bf16.msra.mxu1 %v6189_v44 }
0x2c4a   :  { %1729 = vrot.lane.b32.xlu0 %v1724_v53, %s6447_s18  ;;  %6194 = vmatprep.subr.bf16.mxu1 %v6193_v50 }
0x2c4d   :  { %6196 = vmatpush3.bf16.msra.mxu1 %v6193_v50 }
0x2c4e   :  { %2039 = vrot.lane.b32.xlu0 %v2034_v56, %s6447_s18  ;;  %6203 = vmatprep.subr.bf16.mxu1 %v6443_v12 }
0x2c52   :  { %2349 = vrot.lane.b32.xlu0 %v2344_v47, %s6447_s18  ;;  %v5425_v47 = vld [vmem:[%s7685_s5 + $0x40] sm:$0xff] }
0x2c53   :  { %v7140_v59 = vpack.c.bf16 %v5426_v14, %v5425_v47 }
0x2c55   :  { %6199 = vmatpush3.bf16.msra.mxu0 %v7140_v59 }
0x2c56   :  { %2659 = vrot.lane.b32.xlu0 %v2654_v58, %s6447_s18  ;;  %v5427_v58 = vld [vmem:[%s7685_s5 + $0x50] sm:$0xff]  ;;  %6200 = vmatprep.subr.bf16.mxu0 %v6443_v12 }
0x2c57   :  { %v7148_v61 = vpack.c.bf16 %v5428_v22, %v5427_v58 }
0x2c59   :  { %6202 = vmatpush3.bf16.msra.mxu0 %v7148_v61 }
0x2c5a   :  { %1731 = vrot.lane.b32.xlu0 %v1728_v60, %s6447_s18  ;;  %6209 = vmatprep.subr.bf16.mxu0 %v6443_v12 }
0x2c5c   :  { %5889 = vmatmul.mubr.f32.vlgmr.msra.gmra.mrb[20].mxu0 %v6445_v16 }
0x2c5d   :  { %6211 = vmatpush3.bf16.msra.mxu0 %v7140_v59  ;;  %5910 = vmatprep.mubr.msk.f32.mxu0 %vm6444_vm4, %v6445_v16 }
0x2c5e   :  { %2041 = vrot.lane.b32.xlu0 %v2038_v62, %s6447_s18  ;;  %6212 = vmatprep.subr.bf16.mxu0 %v6443_v12 }
0x2c61   :  { %6214 = vmatpush3.bf16.msra.mxu0 %v7148_v61 }
0x2c62   :  { %2351 = vrot.lane.b32.xlu0 %v2348_v0, %s6447_s18  ;;  %6221 = vmatprep.subr.bf16.mxu0 %v6443_v12 }
0x2c66   :  { %2661 = vrot.lane.b32.xlu0 %v2658_v18, %s6447_s18 }
0x2cb8   :  { %v2774_v2 = vpop.permute.xlu0 %2773 }
0x2cb9   :  { %v2776_v15 = vadd.f32 %v2774_v2, %v2766_v1 }
0x2cbb   :  { %6379 = vtanh.f32 %v2776_v15 }
0x2cbc   :  { %v1730_v3 = vpop.permute.xlu0 %1729 }
0x2cbd   :  { %1735 = vst.msk [vmem:[#allocation2] sm:$0x1] %vm398_vm10, %v1730_v3 }
0x2cc0   :  { %v2040_v5 = vpop.permute.xlu0 %2039 }
0x2cc1   :  { %2045 = vst.msk [vmem:[#allocation2 + $0x2] sm:$0x1] %vm398_vm10, %v2040_v5 }
0x2cc4   :  { %v2350_v21 = vpop.permute.xlu0 %2349 }
0x2cc5   :  { %v6380_v23 = vpop.eup %6379  ;;  %2355 = vst.msk [vmem:[#allocation2 + $0x4] sm:$0x1] %vm398_vm10, %v2350_v21 }
0x2cc6   :  { %2779 = vrot.lane.b32.xlu1 %v6380_v23, %s6446_s17 }
0x2cc8   :  { %v2660_v49 = vpop.permute.xlu0 %2659 }
0x2cc9   :  { %2665 = vst.msk [vmem:[#allocation2 + $0x6] sm:$0x1] %vm398_vm10, %v2660_v49 }
0x2cca   :  { %1884 = vrot.lane.b32.xlu1 %v1879_v25, %s6447_s18 }
0x2ccc   :  { %v1732_v26 = vpop.permute.xlu0 %1731 }
0x2ccd   :  { %1736 = vst.msk [vmem:[#allocation2 + $0x8] sm:$0x1] %vm398_vm10, %v1732_v26 }
0x2cce   :  { %2194 = vrot.lane.b32.xlu1 %v2189_v6, %s6447_s18 }
0x2cd0   :  { %v2042_v27 = vpop.permute.xlu0 %2041 }
0x2cd1   :  { %2046 = vst.msk [vmem:[#allocation2 + $0xa] sm:$0x1] %vm398_vm10, %v2042_v27 }
0x2cd2   :  { %2504 = vrot.lane.b32.xlu1 %v2499_v46, %s6447_s18 }
0x2cd4   :  { %v2352_v34 = vpop.permute.xlu0 %2351 }
0x2cd5   :  { %2356 = vst.msk [vmem:[#allocation2 + $0xc] sm:$0x1] %vm398_vm10, %v2352_v34 }
0x2cd6   :  { %1886 = vrot.lane.b32.xlu1 %v1883_v30, %s6447_s18 }
0x2cd8   :  { %v2662_v37 = vpop.permute.xlu0 %2661 }
0x2cd9   :  { %2666 = vst.msk [vmem:[#allocation2 + $0xe] sm:$0x1] %vm398_vm10, %v2662_v37 }
0x2cda   :  { %2196 = vrot.lane.b32.xlu1 %v2193_v51, %s6447_s18 }
0x2cde   :  { %2506 = vrot.lane.b32.xlu1 %v2503_v35, %s6447_s18 }
0x2d2f   :  { %v2990_v15 = vpop.f32.mrb[20].mxu0 }
0x2d30   :  { %v5890_v3 = vpop.f32.mrb[21].mxu0  ;;  %v2995_v23 = vrot.slane %v2990_v15, 1 }
0x2d38   :  { %v2780_v36 = vpop.permute.xlu1 %2779 }
0x2d39   :  { %v2782_v43 = vmul.f32 %v2780_v36, %v7039_v38 }
0x2d3b   :  { %v2790_v53 = vrot.slane %v2782_v43, %v6765_v13 }
0x2d3c   :  { %v1885_v17 = vpop.permute.xlu1 %1884 }
0x2d3d   :  { %v2791_v54 = vcombine.high %v2790_v53, %v2790_v53  ;;  %v2798_v56 = vrot.slane %v2790_v53, %v6765_v13  ;;  %1890 = vst.msk [vmem:[#allocation2 + $0x1] sm:$0x1] %vm398_vm10, %v1885_v17 }
0x2d3f   :  { %v2809_v10 = vrot.slane %v2798_v56, %v6769_v19  ;;  %v2805_v38 = vrot.slane %v2791_v54, %v6765_v13 }
0x2d40   :  { %v2195_v57 = vpop.permute.xlu1 %2194 }
0x2d41   :  { %2200 = vst.msk [vmem:[#allocation2 + $0x3] sm:$0x1] %vm398_vm10, %v2195_v57  ;;  %2814 = vrot.lane.b32.xlu1 %v2809_v10, %s6447_s18  ;;  %v2813_v60 = vrot.slane %v2805_v38, %v6769_v19 }
0x2d44   :  { %v2505_v20 = vpop.permute.xlu1 %2504 }
0x2d45   :  { %2510 = vst.msk [vmem:[#allocation2 + $0x5] sm:$0x1] %vm398_vm10, %v2505_v20  ;;  %2816 = vrot.lane.b32.xlu1 %v2813_v60, %s6447_s18 }
0x2d48   :  { %v1887_v62 = vpop.permute.xlu1 %1886 }
0x2d49   :  { %1891 = vst.msk [vmem:[#allocation2 + $0x9] sm:$0x1] %vm398_vm10, %v1887_v62 }
0x2d4c   :  { %v2197_v63 = vpop.permute.xlu1 %2196 }
0x2d4d   :  { %2201 = vst.msk [vmem:[#allocation2 + $0xb] sm:$0x1] %vm398_vm10, %v2197_v63 }
0x2d50   :  { %v2507_v0 = vpop.permute.xlu1 %2506 }
0x2d51   :  { %2511 = vst.msk [vmem:[#allocation2 + $0xd] sm:$0x1] %vm398_vm10, %v2507_v0 }
0x2db3   :  { %v2815_v11 = vpop.permute.xlu1 %2814 }
0x2db4   :  { %2820 = vst.msk [vmem:[#allocation2 + $0x7] sm:$0x1] %vm398_vm10, %v2815_v11 }
0x2db7   :  { %v2817_v18 = vpop.permute.xlu1 %2816 }
0x2db8   :  { %2821 = vst.msk [vmem:[#allocation2 + $0xf] sm:$0x1] %vm398_vm10, %v2817_v18 }
0x2dbb   :  { %v2822_v1 = vld [vmem:[#allocation2] sm:$0xff] }
0x2dbc   :  { %5877 = vmatprep.mubr.msk.f32.mxu1 %vm152_vm5, %v2822_v1 }
0x2dbf   :  { %v2823_v2 = vld [vmem:[#allocation2 + $0x8] sm:$0xff] }
0x2dc0   :  { %5878 = vmatmul.mubr.msk.f32.vlgmr.msra.gmra.mrb[18].mxu1 %vm152_vm5, %v2823_v2 }
0x2dc1   :  { %6205 = vmatpush3.bf16.msra.mxu1 %v7140_v59  ;;  %5899 = vmatprep.mubr.msk.f32.mxu1 %vm6444_vm4, %v6445_v16 }
0x2dc2   :  { %6206 = vmatprep.subr.bf16.mxu1 %v6443_v12 }
0x2dc5   :  { %6208 = vmatpush3.bf16.msra.mxu1 %v7148_v61 }
0x2dc6   :  { %6215 = vmatprep.subr.bf16.mxu1 %v6443_v12 }
0x2e93   :  { %v5879_v5 = vpop.f32.mrb[18].mxu1 }
0x2e94   :  { %v2912_v8 = vadd.f32 %v5879_v5, %v5422_v4  ;;  %v2906_v9 = vpop.f32.mrb[19].mxu1 }
0x2e95   :  { %v2907_v21 = vadd.f32 %v5422_v4, %v2906_v9 }
0x2e96   :  { %2916 = vst [vmem:[#allocation3 + $0x8] sm:$0xff] %v2912_v8 }
0x2e97   :  { %2915 = vst [vmem:[#allocation3] sm:$0xff] %v2907_v21 }
0x2e9d   :  { %v2923_v7 = vld [vmem:[#allocation3 + $0x8] sm:$0x1]  ;;  %v3074_v53 = vld [vmem:[#allocation3 + $0x9] sm:$0x1] }
0x2e9e   :  { %v2922_v24 = vld [vmem:[#allocation3] sm:$0x1]  ;;  %v2999_v49 = vadd.f32 %v2995_v23, %v2923_v7  ;;  %v3073_v50 = vld [vmem:[#allocation3 + $0x1] sm:$0x1]  ;;  %v3228_v21 = vld [vmem:[#allocation3 + $0x2] sm:$0x1] }
0x2e9f   :  { %v2998_v25 = vadd.f32 %v2990_v15, %v2922_v24  ;;  %v3229_v23 = vld [vmem:[#allocation3 + $0xa] sm:$0x1] }
0x2ea0   :  { %v3001_v29 = vmul.f32 0.5, %v2999_v49  ;;  %v3004_v48 = vrot.slane %v2999_v49, 7 }
0x2ea1   :  { %v3000_v26 = vmul.f32 0.5, %v2998_v25 }
0x2ea2   :  { %v3009_v6 = vrot.slane %v3001_v29, 7  ;;  %v3005_v55 = vsel %vm331_vm8, %v3004_v48, %v2998_v25 }
0x2ea4   :  { %v3010_v27 = vsel %vm331_vm8, %v3009_v6, %v3000_v26 }
0x2ea5   :  { %v3012_v46 = vsel %vm6621_vm9, %v3005_v55, %v3010_v27 }
0x2ea6   :  { %6381 = vtanh.f32 %v3012_v46 }
0x2eb0   :  { %v6382_v28 = vpop.eup %6381 }
0x2eb1   :  { %v3014_v52 = vmul.f32 0.5, %v6382_v28 }
0x2eb3   :  { %v3015_v34 = vadd.f32 0.5, %v3014_v52 }
0x2eb5   :  { %v3016_v30 = vsel %vm6621_vm9, %v6382_v28, %v3015_v34 }
0x2eb6   :  { %3019 = vrot.lane.b32.xlu0 %v3016_v30, %s6446_s17  ;;  %v3017_v51 = vmul.f32 0.0, %v3016_v30 }
0x2f28   :  { %v3020_v32 = vpop.permute.xlu0 %3019 }
0x2f29   :  { %v3022_v37 = vmul.f32 %v3020_v32, %v3016_v30 }
0x2f2b   :  { %3024 = vrot.lane.b32.xlu1 %v3022_v37, %s6447_s18 }
0x2f9d   :  { %v3025_v33 = vpop.permute.xlu1 %3024 }
0x2f9e   :  { %v3027_v35 = vadd.f32 %v3025_v33, %v3017_v51 }
0x2fa0   :  { %6383 = vtanh.f32 %v3027_v35 }
0x2faa   :  { %v6384_v36 = vpop.eup %6383 }
0x2fab   :  { %3030 = vrot.lane.b32.xlu0 %v6384_v36, %s6446_s17 }
0x301d   :  { %v3031_v40 = vpop.permute.xlu0 %3030 }
0x301e   :  { %v7187_v41 = vmul.f32 %v3031_v40, %v3016_v30 }
0x3020   :  { %3075 = vrot.lane.b32.xlu1 %v7187_v41, %s6447_s18 }
0x3092   :  { %v3076_v42 = vpop.permute.xlu1 %3075 }
0x3093   :  { %5900 = vmatmul.mubr.msk.f32.vlgmr.msra.gmra.mrb[20].mxu1 %vm152_vm5, %v3076_v42 }
0x3094   :  { %6217 = vmatpush3.bf16.msra.mxu1 %v7140_v59  ;;  %5921 = vmatprep.mubr.msk.f32.mxu1 %vm6444_vm4, %v6445_v16 }
0x3095   :  { %6218 = vmatprep.subr.bf16.mxu1 %v6443_v12 }
0x3098   :  { %6220 = vmatpush3.bf16.msra.mxu1 %v7148_v61 }
0x3099   :  { %6227 = vmatprep.subr.bf16.mxu1 %v6443_v12 }
0x3166   :  { %v3145_v43 = vpop.f32.mrb[20].mxu1 }
0x3167   :  { %v3150_v44 = vrot.slane %v3145_v43, 1  ;;  %v5901_v45 = vpop.f32.mrb[21].mxu1  ;;  %v3153_v17 = vadd.f32 %v3145_v43, %v3073_v50  ;;  %v3384_v50 = vld [vmem:[#allocation3 + $0xb] sm:$0x1] }
0x3168   :  { %v3383_v45 = vld [vmem:[#allocation3 + $0x3] sm:$0x1] }
0x3169   :  { %v3154_v54 = vadd.f32 %v3150_v44, %v3074_v53  ;;  %v3155_v38 = vmul.f32 0.5, %v3153_v17 }
0x316b   :  { %v3156_v56 = vmul.f32 0.5, %v3154_v54  ;;  %v3159_v10 = vrot.slane %v3154_v54, 7 }
0x316d   :  { %v3164_v57 = vrot.slane %v3156_v56, 7  ;;  %v3160_v47 = vsel %vm331_vm8, %v3159_v10, %v3153_v17 }
0x316f   :  { %v3165_v14 = vsel %vm331_vm8, %v3164_v57, %v3155_v38 }
0x3170   :  { %v3167_v58 = vsel %vm6621_vm9, %v3160_v47, %v3165_v14 }
0x3171   :  { %6385 = vtanh.f32 %v3167_v58 }
0x317b   :  { %v6386_v22 = vpop.eup %6385 }
0x317c   :  { %v3169_v60 = vmul.f32 0.5, %v6386_v22 }
0x317e   :  { %v3170_v20 = vadd.f32 0.5, %v3169_v60 }
0x3180   :  { %v3171_v62 = vsel %vm6621_vm9, %v6386_v22, %v3170_v20 }
0x3181   :  { %3174 = vrot.lane.b32.xlu0 %v3171_v62, %s6446_s17  ;;  %v3172_v11 = vmul.f32 %v3171_v62, %v3027_v35 }
0x31f3   :  { %v3175_v63 = vpop.permute.xlu0 %3174 }
0x31f4   :  { %v3177_v0 = vmul.f32 %v3175_v63, %v3171_v62 }
0x31f6   :  { %3179 = vrot.lane.b32.xlu1 %v3177_v0, %s6447_s18 }
0x3268   :  { %v3180_v18 = vpop.permute.xlu1 %3179 }
0x3269   :  { %v3182_v1 = vadd.f32 %v3180_v18, %v3172_v11 }
0x326b   :  { %6387 = vtanh.f32 %v3182_v1 }
0x3275   :  { %v6388_v2 = vpop.eup %6387 }
0x3276   :  { %3185 = vrot.lane.b32.xlu0 %v6388_v2, %s6446_s17 }
0x32e8   :  { %v3186_v15 = vpop.permute.xlu0 %3185 }
0x32e9   :  { %v7207_v3 = vmul.f32 %v3186_v15, %v3171_v62 }
0x32eb   :  { %3230 = vrot.lane.b32.xlu1 %v7207_v3, %s6447_s18 }
0x335d   :  { %v3231_v4 = vpop.permute.xlu1 %3230 }
0x335e   :  { %5911 = vmatmul.mubr.msk.f32.vlgmr.msra.gmra.mrb[22].mxu0 %vm152_vm5, %v3231_v4 }
0x335f   :  { %6223 = vmatpush3.bf16.msra.mxu0 %v7140_v59  ;;  %5932 = vmatprep.mubr.msk.f32.mxu0 %vm6444_vm4, %v6445_v16 }
0x3360   :  { %6224 = vmatprep.subr.bf16.mxu0 %v6443_v12 }
0x3363   :  { %6226 = vmatpush3.bf16.msra.mxu0 %v7148_v61 }
0x3364   :  { %6233 = vmatprep.subr.bf16.mxu0 %v6443_v12 }
0x3431   :  { %v3300_v5 = vpop.f32.mrb[22].mxu0 }
0x3432   :  { %v3305_v8 = vrot.slane %v3300_v5, 1  ;;  %v5912_v9 = vpop.f32.mrb[23].mxu0  ;;  %v3308_v7 = vadd.f32 %v3300_v5, %v3228_v21  ;;  %v3538_v21 = vld [vmem:[#allocation3 + $0x4] sm:$0x1] }
0x3434   :  { %v3309_v24 = vadd.f32 %v3305_v8, %v3229_v23  ;;  %v3310_v29 = vmul.f32 0.5, %v3308_v7  ;;  %v3539_v23 = vld [vmem:[#allocation3 + $0xc] sm:$0x1] }
0x3436   :  { %v3311_v49 = vmul.f32 0.5, %v3309_v24  ;;  %v3314_v25 = vrot.slane %v3309_v24, 7 }
0x3438   :  { %v3319_v48 = vrot.slane %v3311_v49, 7  ;;  %v3315_v26 = vsel %vm331_vm8, %v3314_v25, %v3308_v7 }
0x343a   :  { %v3320_v6 = vsel %vm331_vm8, %v3319_v48, %v3310_v29 }
0x343b   :  { %v3322_v55 = vsel %vm6621_vm9, %v3315_v26, %v3320_v6 }
0x343c   :  { %6389 = vtanh.f32 %v3322_v55 }
0x3446   :  { %v6390_v27 = vpop.eup %6389 }
0x3447   :  { %v3324_v46 = vmul.f32 0.5, %v6390_v27 }
0x3449   :  { %v3325_v28 = vadd.f32 0.5, %v3324_v46 }
0x344b   :  { %v3326_v52 = vsel %vm6621_vm9, %v6390_v27, %v3325_v28 }
0x344c   :  { %3329 = vrot.lane.b32.xlu0 %v3326_v52, %s6446_s17  ;;  %v3327_v32 = vmul.f32 %v3326_v52, %v3182_v1 }
0x34be   :  { %v3330_v34 = vpop.permute.xlu0 %3329 }
0x34bf   :  { %v3332_v30 = vmul.f32 %v3330_v34, %v3326_v52 }
0x34c1   :  { %3334 = vrot.lane.b32.xlu1 %v3332_v30, %s6447_s18 }
0x3533   :  { %v3335_v37 = vpop.permute.xlu1 %3334 }
0x3534   :  { %v3337_v51 = vadd.f32 %v3335_v37, %v3327_v32 }
0x3536   :  { %6391 = vtanh.f32 %v3337_v51 }
0x3540   :  { %v6392_v33 = vpop.eup %6391 }
0x3541   :  { %3340 = vrot.lane.b32.xlu0 %v6392_v33, %s6446_s17 }
0x35b3   :  { %v3341_v35 = vpop.permute.xlu0 %3340 }
0x35b4   :  { %v7227_v36 = vmul.f32 %v3341_v35, %v3326_v52 }
0x35b6   :  { %3385 = vrot.lane.b32.xlu1 %v7227_v36, %s6447_s18 }
0x3628   :  { %v3386_v40 = vpop.permute.xlu1 %3385 }
0x3629   :  { %5922 = vmatmul.mubr.msk.f32.vlgmr.msra.gmra.mrb[22].mxu1 %vm152_vm5, %v3386_v40 }
0x362a   :  { %6229 = vmatpush3.bf16.msra.mxu1 %v7140_v59  ;;  %5943 = vmatprep.mubr.msk.f32.mxu1 %vm6444_vm4, %v6445_v16 }
0x362b   :  { %6230 = vmatprep.subr.bf16.mxu1 %v6443_v12 }
0x362e   :  { %6232 = vmatpush3.bf16.msra.mxu1 %v7148_v61 }
0x362f   :  { %6239 = vmatprep.subr.bf16.mxu1 %v6443_v12 }
0x36fc   :  { %v3455_v42 = vpop.f32.mrb[22].mxu1 }
0x36fd   :  { %v3460_v43 = vrot.slane %v3455_v42, 1  ;;  %v5923_v44 = vpop.f32.mrb[23].mxu1  ;;  %v3463_v53 = vadd.f32 %v3455_v42, %v3383_v45 }
0x36ff   :  { %v3464_v17 = vadd.f32 %v3460_v43, %v3384_v50  ;;  %v3465_v10 = vmul.f32 0.5, %v3463_v53  ;;  %v3693_v50 = vld [vmem:[#allocation3 + $0x5] sm:$0x1] }
0x3701   :  { %v3466_v54 = vmul.f32 0.5, %v3464_v17  ;;  %v3469_v56 = vrot.slane %v3464_v17, 7 }
0x3703   :  { %v3474_v38 = vrot.slane %v3466_v54, 7  ;;  %v3470_v57 = vsel %vm331_vm8, %v3469_v56, %v3463_v53  ;;  %v3694_v53 = vld [vmem:[#allocation3 + $0xd] sm:$0x1] }
0x3705   :  { %v3475_v47 = vsel %vm331_vm8, %v3474_v38, %v3465_v10 }
0x3706   :  { %v3477_v14 = vsel %vm6621_vm9, %v3470_v57, %v3475_v47 }
0x3707   :  { %6393 = vtanh.f32 %v3477_v14 }
0x3711   :  { %v6394_v58 = vpop.eup %6393 }
0x3712   :  { %v3479_v22 = vmul.f32 0.5, %v6394_v58 }
0x3714   :  { %v3480_v60 = vadd.f32 0.5, %v3479_v22 }
0x3716   :  { %v3481_v20 = vsel %vm6621_vm9, %v6394_v58, %v3480_v60 }
0x3717   :  { %3484 = vrot.lane.b32.xlu0 %v3481_v20, %s6446_s17  ;;  %v3482_v0 = vmul.f32 %v3481_v20, %v3337_v51 }
0x3789   :  { %v3485_v62 = vpop.permute.xlu0 %3484 }
0x378a   :  { %v3487_v63 = vmul.f32 %v3485_v62, %v3481_v20 }
0x378c   :  { %3489 = vrot.lane.b32.xlu1 %v3487_v63, %s6447_s18 }
0x37fe   :  { %v3490_v11 = vpop.permute.xlu1 %3489 }
0x37ff   :  { %v3492_v18 = vadd.f32 %v3490_v11, %v3482_v0 }
0x3801   :  { %6395 = vtanh.f32 %v3492_v18 }
0x380b   :  { %v6396_v1 = vpop.eup %6395 }
0x380c   :  { %3495 = vrot.lane.b32.xlu0 %v6396_v1, %s6446_s17 }
0x387e   :  { %v3496_v2 = vpop.permute.xlu0 %3495 }
0x387f   :  { %v7247_v15 = vmul.f32 %v3496_v2, %v3481_v20 }
0x3881   :  { %3540 = vrot.lane.b32.xlu1 %v7247_v15, %s6447_s18 }
0x38f3   :  { %v3541_v4 = vpop.permute.xlu1 %3540 }
0x38f4   :  { %5933 = vmatmul.mubr.msk.f32.vlgmr.msra.gmra.mrb[24].mxu0 %vm152_vm5, %v3541_v4 }
0x38f5   :  { %6235 = vmatpush3.bf16.msra.mxu0 %v7140_v59  ;;  %5954 = vmatprep.mubr.msk.f32.mxu0 %vm6444_vm4, %v6445_v16 }
0x38f6   :  { %6236 = vmatprep.subr.bf16.mxu0 %v6443_v12 }
0x38f9   :  { %6238 = vmatpush3.bf16.msra.mxu0 %v7148_v61 }
0x39c7   :  { %v3610_v5 = vpop.f32.mrb[24].mxu0 }
0x39c8   :  { %v3615_v8 = vrot.slane %v3610_v5, 1  ;;  %v5934_v9 = vpop.f32.mrb[25].mxu0  ;;  %v3618_v7 = vadd.f32 %v3610_v5, %v3538_v21 }
0x39c9   :  { %v3849_v9 = vld [vmem:[#allocation3 + $0xe] sm:$0x1] }
0x39ca   :  { %v3619_v24 = vadd.f32 %v3615_v8, %v3539_v23  ;;  %v3620_v29 = vmul.f32 0.5, %v3618_v7  ;;  %v3848_v8 = vld [vmem:[#allocation3 + $0x6] sm:$0x1] }
0x39cc   :  { %v3621_v49 = vmul.f32 0.5, %v3619_v24  ;;  %v3624_v25 = vrot.slane %v3619_v24, 7 }
0x39ce   :  { %v3629_v48 = vrot.slane %v3621_v49, 7  ;;  %v3625_v26 = vsel %vm331_vm8, %v3624_v25, %v3618_v7 }
0x39d0   :  { %v3630_v6 = vsel %vm331_vm8, %v3629_v48, %v3620_v29 }
0x39d1   :  { %v3632_v55 = vsel %vm6621_vm9, %v3625_v26, %v3630_v6 }
0x39d2   :  { %6397 = vtanh.f32 %v3632_v55 }
0x39dc   :  { %v6398_v27 = vpop.eup %6397 }
0x39dd   :  { %v3634_v46 = vmul.f32 0.5, %v6398_v27 }
0x39df   :  { %v3635_v28 = vadd.f32 0.5, %v3634_v46 }
0x39e1   :  { %v3636_v52 = vsel %vm6621_vm9, %v6398_v27, %v3635_v28 }
0x39e2   :  { %3639 = vrot.lane.b32.xlu0 %v3636_v52, %s6446_s17  ;;  %v3637_v32 = vmul.f32 %v3636_v52, %v3492_v18 }
0x3a54   :  { %v3640_v34 = vpop.permute.xlu0 %3639 }
0x3a55   :  { %v3642_v30 = vmul.f32 %v3640_v34, %v3636_v52 }
0x3a57   :  { %3644 = vrot.lane.b32.xlu1 %v3642_v30, %s6447_s18 }
0x3ac9   :  { %v3645_v37 = vpop.permute.xlu1 %3644 }
0x3aca   :  { %v3647_v51 = vadd.f32 %v3645_v37, %v3637_v32 }
0x3acc   :  { %6399 = vtanh.f32 %v3647_v51 }
0x3ad6   :  { %v6400_v33 = vpop.eup %6399 }
0x3ad7   :  { %3650 = vrot.lane.b32.xlu0 %v6400_v33, %s6446_s17 }
0x3b49   :  { %v3651_v35 = vpop.permute.xlu0 %3650 }
0x3b4a   :  { %v7266_v40 = vmul.f32 %v3651_v35, %v3636_v52 }
0x3b4c   :  { %3695 = vrot.lane.b32.xlu1 %v7266_v40, %s6447_s18 }
0x3bbe   :  { %v3696_v42 = vpop.permute.xlu1 %3695 }
0x3bbf   :  { %5944 = vmatmul.mubr.msk.f32.vlgmr.msra.gmra.mrb[24].mxu1 %vm152_vm5, %v3696_v42 }
0x3bc0   :  { %6241 = vmatpush3.bf16.msra.mxu1 %v7140_v59  ;;  %5965 = vmatprep.mubr.msk.f32.mxu1 %vm6444_vm4, %v6445_v16 }
0x3bc1   :  { %6242 = vmatprep.subr.bf16.mxu1 %v6443_v12 }
0x3bc4   :  { %6244 = vmatpush3.bf16.msra.mxu1 %v7148_v61 }
0x3c92   :  { %v3765_v43 = vpop.f32.mrb[24].mxu1 }
0x3c93   :  { %v3770_v44 = vrot.slane %v3765_v43, 1  ;;  %v5945_v45 = vpop.f32.mrb[25].mxu1  ;;  %v3773_v17 = vadd.f32 %v3765_v43, %v3693_v50  ;;  %v4004_v50 = vld [vmem:[#allocation3 + $0xf] sm:$0x1] }
0x3c94   :  { %v4003_v45 = vld [vmem:[#allocation3 + $0x7] sm:$0x1] }
0x3c95   :  { %v3774_v54 = vadd.f32 %v3770_v44, %v3694_v53  ;;  %v3775_v38 = vmul.f32 0.5, %v3773_v17 }
0x3c97   :  { %v3776_v56 = vmul.f32 0.5, %v3774_v54  ;;  %v3779_v10 = vrot.slane %v3774_v54, 7 }
0x3c99   :  { %v3784_v57 = vrot.slane %v3776_v56, 7  ;;  %v3780_v59 = vsel %vm331_vm8, %v3779_v10, %v3773_v17 }
0x3c9b   :  { %v3785_v47 = vsel %vm331_vm8, %v3784_v57, %v3775_v38 }
0x3c9c   :  { %v3787_v12 = vsel %vm6621_vm9, %v3780_v59, %v3785_v47 }
0x3c9d   :  { %6401 = vtanh.f32 %v3787_v12 }
0x3ca7   :  { %v6402_v16 = vpop.eup %6401 }
0x3ca8   :  { %v3789_v61 = vmul.f32 0.5, %v6402_v16 }
0x3caa   :  { %v3790_v14 = vadd.f32 0.5, %v3789_v61 }
0x3cac   :  { %v3791_v58 = vsel %vm6621_vm9, %v6402_v16, %v3790_v14 }
0x3cad   :  { %3794 = vrot.lane.b32.xlu0 %v3791_v58, %s6446_s17  ;;  %v3792_v20 = vmul.f32 %v3791_v58, %v3647_v51 }
0x3d1f   :  { %v3795_v22 = vpop.permute.xlu0 %3794 }
0x3d20   :  { %v3797_v60 = vmul.f32 %v3795_v22, %v3791_v58 }
0x3d22   :  { %3799 = vrot.lane.b32.xlu1 %v3797_v60, %s6447_s18 }
0x3d94   :  { %v3800_v62 = vpop.permute.xlu1 %3799 }
0x3d95   :  { %v3802_v63 = vadd.f32 %v3800_v62, %v3792_v20  ;;  %v3351_v20 = vrot.slane %v7227_v36, %v6765_v13 }
0x3d97   :  { %6403 = vtanh.f32 %v3802_v63 }
0x3da1   :  { %v6404_v0 = vpop.eup %6403 }
0x3da2   :  { %3805 = vrot.lane.b32.xlu0 %v6404_v0, %s6446_s17  ;;  %v3359_v0 = vrot.slane %v3351_v20, %v6765_v13 }
0x3e14   :  { %v3806_v11 = vpop.permute.xlu0 %3805 }
0x3e15   :  { %v7285_v18 = vmul.f32 %v3806_v11, %v3791_v58  ;;  %v3041_v58 = vrot.slane %v7187_v41, %v6765_v13  ;;  %v3661_v11 = vrot.slane %v7266_v40, %v6765_v13  ;;  %v3370_v41 = vrot.slane %v3359_v0, %v6769_v19 }
0x3e16   :  { %v3352_v40 = vcombine.high %v3351_v20, %v3351_v20  ;;  %v4163_v20 = vld [vmem:[%s7688_s11 + $0x18] sm:$0xff] }
0x3e17   :  { %3850 = vrot.lane.b32.xlu1 %v7285_v18, %s6447_s18  ;;  %v3049_v60 = vrot.slane %v3041_v58, %v6765_v13  ;;  %v3042_v36 = vcombine.high %v3041_v58, %v3041_v58  ;;  %v4161_v58 = vld [vmem:[%s7688_s11 + $0x8] sm:$0xff] }
0x3e89   :  { %v3851_v1 = vpop.permute.xlu1 %3850 }
0x3e8a   :  { %5955 = vmatmul.mubr.msk.f32.vlgmr.msra.gmra.mrb[26].mxu0 %vm152_vm5, %v3851_v1  ;;  %v3669_v1 = vrot.slane %v3661_v11, %v6765_v13 }
0x3f5d   :  { %v3920_v2 = vpop.f32.mrb[26].mxu0 }
0x3f5e   :  { %v3925_v4 = vrot.slane %v3920_v2, 1  ;;  %v5956_v5 = vpop.f32.mrb[27].mxu0  ;;  %v3928_v21 = vadd.f32 %v3920_v2, %v3848_v8  ;;  %v3056_v8 = vrot.slane %v3042_v36, %v6765_v13 }
0x3f60   :  { %v3929_v23 = vadd.f32 %v3925_v4, %v3849_v9  ;;  %v3930_v49 = vmul.f32 0.5, %v3928_v21  ;;  %v3680_v4 = vrot.slane %v3669_v1, %v6769_v19 }
0x3f62   :  { %v3931_v7 = vmul.f32 0.5, %v3929_v23  ;;  %v3934_v24 = vrot.slane %v3929_v23, 7  ;;  %v3662_v23 = vcombine.high %v3661_v11, %v3661_v11 }
0x3f64   :  { %v3939_v25 = vrot.slane %v3931_v7, 7  ;;  %v3935_v29 = vsel %vm331_vm8, %v3934_v24, %v3928_v21  ;;  %v3366_v21 = vrot.slane %v3352_v40, %v6765_v13  ;;  %v3064_v7 = vrot.slane %v3056_v8, %v6769_v19 }
0x3f65   :  { %v3676_v24 = vrot.slane %v3662_v23, %v6765_v13 }
0x3f66   :  { %v3940_v48 = vsel %vm331_vm8, %v3939_v25, %v3930_v49  ;;  %v3374_v25 = vrot.slane %v3366_v21, %v6769_v19 }
0x3f67   :  { %v3942_v26 = vsel %vm6621_vm9, %v3935_v29, %v3940_v48  ;;  %v3684_v48 = vrot.slane %v3676_v24, %v6769_v19  ;;  %v6449_v24 = vmov 0  }
0x3f68   :  { %6405 = vtanh.f32 %v3942_v26  ;;  %4265 = vst [vmem:[%s7689_s14] sm:$0x3] %v6449_v24 }
0x3f72   :  { %v6406_v6 = vpop.eup %6405 }
0x3f73   :  { %v3944_v55 = vmul.f32 0.5, %v6406_v6 }
0x3f75   :  { %v3945_v27 = vadd.f32 0.5, %v3944_v55 }
0x3f77   :  { %v3946_v46 = vsel %vm6621_vm9, %v6406_v6, %v3945_v27 }
0x3f78   :  { %3949 = vrot.lane.b32.xlu0 %v3946_v46, %s6446_s17  ;;  %v3947_v34 = vmul.f32 %v3946_v46, %v3802_v63  ;;  %v3060_v63 = vrot.slane %v3049_v60, %v6769_v19 }
0x3fea   :  { %v3950_v28 = vpop.permute.xlu0 %3949 }
0x3feb   :  { %v3952_v52 = vmul.f32 %v3950_v28, %v3946_v46  ;;  %v3196_v28 = vrot.slane %v7207_v3, %v6765_v13  ;;  %v3816_v3 = vrot.slane %v7285_v18, %v6765_v13 }
0x3fed   :  { %3954 = vrot.lane.b32.xlu1 %v3952_v52, %s6447_s18 }
0x405f   :  { %v3955_v30 = vpop.permute.xlu1 %3954 }
0x4060   :  { %v7298_v32 = vadd.f32 %v3955_v30, %v3947_v34  ;;  %v3204_v34 = vrot.slane %v3196_v28, %v6765_v13  ;;  %v3506_v30 = vrot.slane %v7247_v15, %v6765_v13 }
0x4062   :  { %6407 = vtanh.f32 %v7298_v32 }
0x406c   :  { %v6408_v37 = vpop.eup %6407 }
0x406d   :  { %3960 = vrot.lane.b32.xlu0 %v6408_v37, %s6446_s17 }
0x40df   :  { %v3961_v51 = vpop.permute.xlu0 %3960 }
0x40e0   :  { %v3963_v33 = vmul.f32 %v3961_v51, %v3946_v46 }
0x40e2   :  { %4005 = vrot.lane.b32.xlu1 %v3963_v33, %s6447_s18  ;;  %v3971_v2 = vrot.slane %v3963_v33, %v6765_v13  ;;  %v3514_v33 = vrot.slane %v3506_v30, %v6765_v13 }
0x40e4   :  { %v3979_v5 = vrot.slane %v3971_v2, %v6765_v13  ;;  %v3972_v49 = vcombine.high %v3971_v2, %v3971_v2  ;;  %v3525_v15 = vrot.slane %v3514_v33, %v6769_v19 }
0x40e6   :  { %v3990_v9 = vrot.slane %v3979_v5, %v6769_v19  ;;  %v3986_v29 = vrot.slane %v3972_v49, %v6765_v13  ;;  %v5436_v49 = vld [vmem:[%s7690_s12] ss:$0 sm:$0xff] }
0x40e8   :  { %v3994_v26 = vrot.slane %v3986_v29, %v6769_v19 }
0x4154   :  { %v4006_v35 = vpop.permute.xlu1 %4005 }
0x4155   :  { %5966 = vmatmul.mubr.msk.f32.vlgmr.msra.gmra.mrb[26].mxu1 %vm152_vm5, %v4006_v35 }
0x4228   :  { %v4075_v42 = vpop.f32.mrb[26].mxu1 }
0x4229   :  { %v4080_v43 = vrot.slane %v4075_v42, 1  ;;  %v5967_v44 = vpop.f32.mrb[27].mxu1  ;;  %v4083_v53 = vadd.f32 %v4075_v42, %v4003_v45  ;;  %v3197_v42 = vcombine.high %v3196_v28, %v3196_v28 }
0x422b   :  { %v4084_v17 = vadd.f32 %v4080_v43, %v4004_v50  ;;  %v4085_v10 = vmul.f32 0.5, %v4083_v53  ;;  %v3824_v43 = vrot.slane %v3816_v3, %v6765_v13  ;;  %v3211_v45 = vrot.slane %v3197_v42, %v6765_v13 }
0x422c   :  { %v3507_v50 = vcombine.high %v3506_v30, %v3506_v30 }
0x422d   :  { %v4086_v54 = vmul.f32 0.5, %v4084_v17  ;;  %v4089_v56 = vrot.slane %v4084_v17, 7  ;;  %v3835_v18 = vrot.slane %v3824_v43, %v6769_v19 }
0x422e   :  { %v3521_v17 = vrot.slane %v3507_v50, %v6765_v13 }
0x422f   :  { %v4094_v38 = vrot.slane %v4086_v54, 7  ;;  %v4090_v57 = vsel %vm331_vm8, %v4089_v56, %v4083_v53  ;;  %v3817_v54 = vcombine.high %v3816_v3, %v3816_v3 }
0x4231   :  { %v4095_v59 = vsel %vm331_vm8, %v4094_v38, %v4085_v10  ;;  %v3219_v10 = vrot.slane %v3211_v45, %v6769_v19  ;;  %v3831_v38 = vrot.slane %v3817_v54, %v6765_v13 }
0x4232   :  { %v4097_v47 = vsel %vm6621_vm9, %v4090_v57, %v4095_v59  ;;  %v3529_v59 = vrot.slane %v3521_v17, %v6769_v19 }
0x4233   :  { %6409 = vtanh.f32 %v4097_v47  ;;  %v3839_v47 = vrot.slane %v3831_v38, %v6769_v19 }
0x423d   :  { %v6410_v12 = vpop.eup %6409 }
0x423e   :  { %v4099_v16 = vmul.f32 0.5, %v6410_v12 }
0x4240   :  { %v4100_v61 = vadd.f32 0.5, %v4099_v16 }
0x4242   :  { %v7310_v14 = vsel %vm6621_vm9, %v6410_v12, %v4100_v61  ;;  %v4160_v61 = vld [vmem:[%s7688_s11] sm:$0xff] }
0x4243   :  { %4104 = vrot.lane.b32.xlu0 %v7310_v14, %s6446_s17  ;;  %v4102_v6 = vmul.f32 %v7310_v14, %v7298_v32  ;;  %v3215_v32 = vrot.slane %v3204_v34, %v6769_v19  ;;  %v6245_v60 = vpack.c.bf16 %v4161_v58, %v4160_v61 }
0x4245   :  { %6246 = vmatprep.subr.bf16.mxu0 %v6245_v60 }
0x4246   :  { %6248 = vmatpush3.bf16.msra.mxu0 %v6245_v60 }
0x42b5   :  { %v4105_v22 = vpop.permute.xlu0 %4104 }
0x42b6   :  { %v4107_v62 = vmul.f32 %v4105_v22, %v7310_v14  ;;  %v4162_v22 = vld [vmem:[%s7688_s11 + $0x10] sm:$0xff] }
0x42b8   :  { %4109 = vrot.lane.b32.xlu1 %v4107_v62, %s6447_s18 }
0x42bc   :  { %3065 = vrot.lane.b32.xlu1 %v3060_v63, %s6447_s18 }
0x42c0   :  { %3375 = vrot.lane.b32.xlu1 %v3370_v41, %s6447_s18 }
0x42c4   :  { %3685 = vrot.lane.b32.xlu1 %v3680_v4, %s6447_s18 }
0x42c8   :  { %3995 = vrot.lane.b32.xlu1 %v3990_v9, %s6447_s18 }
0x42cc   :  { %3067 = vrot.lane.b32.xlu1 %v3064_v7, %s6447_s18 }
0x42d0   :  { %3377 = vrot.lane.b32.xlu1 %v3374_v25, %s6447_s18 }
0x42d4   :  { %3687 = vrot.lane.b32.xlu1 %v3684_v48, %s6447_s18 }
0x42d8   :  { %3997 = vrot.lane.b32.xlu1 %v3994_v26, %s6447_s18 }
0x432a   :  { %v4110_v55 = vpop.permute.xlu1 %4109 }
0x432b   :  { %v4112_v27 = vadd.f32 %v4110_v55, %v4102_v6 }
0x432d   :  { %6411 = vtanh.f32 %v4112_v27 }
0x432e   :  { %v3066_v46 = vpop.permute.xlu1 %3065 }
0x432f   :  { %3071 = vst.msk [vmem:[#allocation2] sm:$0x1] %vm398_vm10, %v3066_v46 }
0x4332   :  { %v3376_v52 = vpop.permute.xlu1 %3375 }
0x4333   :  { %3381 = vst.msk [vmem:[#allocation2 + $0x2] sm:$0x1] %vm398_vm10, %v3376_v52 }
0x4336   :  { %v3686_v37 = vpop.permute.xlu1 %3685 }
0x4337   :  { %v6412_v51 = vpop.eup %6411  ;;  %3691 = vst.msk [vmem:[#allocation2 + $0x4] sm:$0x1] %vm398_vm10, %v3686_v37 }
0x4338   :  { %4115 = vrot.lane.b32.xlu0 %v6412_v51, %s6446_s17 }
0x433a   :  { %v3996_v35 = vpop.permute.xlu1 %3995 }
0x433b   :  { %4001 = vst.msk [vmem:[#allocation2 + $0x6] sm:$0x1] %vm398_vm10, %v3996_v35 }
0x433c   :  { %3220 = vrot.lane.b32.xlu0 %v3215_v32, %s6447_s18 }
0x433e   :  { %v3068_v44 = vpop.permute.xlu1 %3067 }
0x433f   :  { %3072 = vst.msk [vmem:[#allocation2 + $0x8] sm:$0x1] %vm398_vm10, %v3068_v44 }
0x4340   :  { %3530 = vrot.lane.b32.xlu0 %v3525_v15, %s6447_s18 }
0x4342   :  { %v3378_v53 = vpop.permute.xlu1 %3377 }
0x4343   :  { %3382 = vst.msk [vmem:[#allocation2 + $0xa] sm:$0x1] %vm398_vm10, %v3378_v53 }
0x4344   :  { %3840 = vrot.lane.b32.xlu0 %v3835_v18, %s6447_s18 }
0x4346   :  { %v3688_v56 = vpop.permute.xlu1 %3687 }
0x4347   :  { %3692 = vst.msk [vmem:[#allocation2 + $0xc] sm:$0x1] %vm398_vm10, %v3688_v56 }
0x4348   :  { %3222 = vrot.lane.b32.xlu0 %v3219_v10, %s6447_s18 }
0x434a   :  { %v3998_v57 = vpop.permute.xlu1 %3997 }
0x434b   :  { %4002 = vst.msk [vmem:[#allocation2 + $0xe] sm:$0x1] %vm398_vm10, %v3998_v57 }
0x434c   :  { %3532 = vrot.lane.b32.xlu0 %v3529_v59, %s6447_s18 }
0x4350   :  { %3842 = vrot.lane.b32.xlu0 %v3839_v47, %s6447_s18 }
0x43aa   :  { %v4116_v12 = vpop.permute.xlu0 %4115 }
0x43ab   :  { %v4118_v16 = vmul.f32 %v4116_v12, %v7310_v14  ;;  %v6249_v14 = vpack.c.bf16 %v4163_v20, %v4162_v22 }
0x43ad   :  { %v4126_v62 = vrot.slane %v4118_v16, %v6765_v13  ;;  %6250 = vmatprep.subr.bf16.mxu0 %v6249_v14 }
0x43ae   :  { %v3221_v63 = vpop.permute.xlu0 %3220  ;;  %6252 = vmatpush3.bf16.msra.mxu0 %v6249_v14 }
0x43af   :  { %v4127_v0 = vcombine.high %v4126_v62, %v4126_v62  ;;  %v4134_v11 = vrot.slane %v4126_v62, %v6765_v13  ;;  %3226 = vst.msk [vmem:[#allocation2 + $0x1] sm:$0x1] %vm398_vm10, %v3221_v63 }
0x43b1   :  { %v4141_v41 = vrot.slane %v4127_v0, %v6765_v13  ;;  %v4145_v1 = vrot.slane %v4134_v11, %v6769_v19 }
0x43b2   :  { %v3531_v2 = vpop.permute.xlu0 %3530 }
0x43b3   :  { %3536 = vst.msk [vmem:[#allocation2 + $0x3] sm:$0x1] %vm398_vm10, %v3531_v2  ;;  %4150 = vrot.lane.b32.xlu0 %v4145_v1, %s6447_s18  ;;  %v4149_v36 = vrot.slane %v4141_v41, %v6769_v19 }
0x43b6   :  { %v3841_v4 = vpop.permute.xlu0 %3840 }
0x43b7   :  { %3846 = vst.msk [vmem:[#allocation2 + $0x5] sm:$0x1] %vm398_vm10, %v3841_v4  ;;  %4152 = vrot.lane.b32.xlu0 %v4149_v36, %s6447_s18 }
0x43ba   :  { %v3223_v5 = vpop.permute.xlu0 %3222 }
0x43bb   :  { %3227 = vst.msk [vmem:[#allocation2 + $0x9] sm:$0x1] %vm398_vm10, %v3223_v5 }
0x43be   :  { %v3533_v8 = vpop.permute.xlu0 %3532 }
0x43bf   :  { %3537 = vst.msk [vmem:[#allocation2 + $0xb] sm:$0x1] %vm398_vm10, %v3533_v8 }
0x43c2   :  { %v3843_v40 = vpop.permute.xlu0 %3842 }
0x43c3   :  { %3847 = vst.msk [vmem:[#allocation2 + $0xd] sm:$0x1] %vm398_vm10, %v3843_v40 }
0x4425   :  { %v4151_v9 = vpop.permute.xlu0 %4150 }
0x4426   :  { %4156 = vst.msk [vmem:[#allocation2 + $0x7] sm:$0x1] %vm398_vm10, %v4151_v9 }
0x4429   :  { %v4153_v21 = vpop.permute.xlu0 %4152 }
0x442a   :  { %4157 = vst.msk [vmem:[#allocation2 + $0xf] sm:$0x1] %vm398_vm10, %v4153_v21 }
0x442d   :  { %v4158_v23 = vld [vmem:[#allocation2] sm:$0xff] }
0x442e   :  { %5976 = vmatprep.mubr.msk.f32.mxu0 %vm152_vm5, %v4158_v23 }
0x4431   :  { %v4159_v7 = vld [vmem:[#allocation2 + $0x8] sm:$0xff] }
0x4432   :  { %5977 = vmatmul.mubr.msk.f32.vlgmr.msra.gmra.mrb[28].mxu0 %vm152_vm5, %v4159_v7 }
0x4505   :  { %v5978_v25 = vpop.f32.mrb[28].mxu0 }
0x4506   :  { %v4249_v29 = vadd.f32 %v5978_v25, %v5436_v49  ;;  %v4243_v48 = vpop.f32.mrb[29].mxu0 }
0x4507   :  { %v4244_v26 = vadd.f32 %v5436_v49, %v4243_v48 }
0x4508   :  { %4253 = vst.msk [vmem:[#allocation4 + $0x8] sm:$0xff] %vm152_vm5, %v4249_v29 }
0x4509   :  { %4252 = vst.msk [vmem:[#allocation4] sm:$0xff] %vm152_vm5, %v4244_v26 }
0x450a LB: > { %v4283_v6 = vld [vmem:[#allocation5] sm:$0x3]  ;;  %v4291_v55 = vld [vmem:[%s7678_s7] sm:$0xff]  ;;  %v4292_v27 = vld [vmem:[%s7678_s7 + $0x8] sm:$0xff]  ;;  %s6450_s26 = smov 32   ;;  %v6451_v46 = vmov 0.0|0.0   ;;  %s6441_s23 = sphi %s7420_s23, %s4271_s23  }
0x450b   : > { %4285 = vrot.lane.b32.xlu0 %v4283_v6, %s6450_s26  ;;  %6253 = vmatprep.subr.bf16.mxu0 %v6451_v46  ;;  %v6254_v28 = vpack.c.bf16 %v4292_v27, %v4291_v55  ;;  %v4293_v52 = vld [vmem:[%s7678_s7 + $0x10] sm:$0xff]  ;;  %v4294_v34 = vld [vmem:[%s7678_s7 + $0x18] sm:$0xff]  ;;  %vm6452_vm11 = vmmov 0   ;;  %v6453_v51 = vmov 0.0   ;;  %v4295_v33 = vld [vmem:[%s7678_s7 + $0x20] sm:$0xff]  ;;  %vm4288_vm12 = vcmask 517376  }
0x450c   : > { %v4281_v30 = vld [vmem:[#allocation7] sm:$0x3]  ;;  %6265 = vmatprep.subr.bf16.mxu1 %v6451_v46  ;;  %v6257_v37 = vpack.c.bf16 %v4294_v34, %v4293_v52  ;;  %5995 = vmatprep.mubr.msk.f32.mxu0 %vm6452_vm11, %v6453_v51  ;;  %v4378_v32 = vld [vmem:[#allocation6] sm:$0x3]  ;;  %v4296_v3 = vld [vmem:[%s7678_s7 + $0x28] sm:$0xff]  ;;  %vm4304_vm13 = vcmask 523264  }
0x450d   : > { %4282 = vst.msk [vmem:[#allocation10] sm:$0x3] %vm4254_vm2, %v4281_v30  ;;  %6255 = vmatpush3.bf16.msra.mxu0 %v6254_v28  ;;  %4386 = vrot.lane.b32.xlu1 %v4378_v32, %s6450_s26  ;;  %v6260_v35 = vpack.c.bf16 %v4296_v3, %v4295_v33  ;;  %v4297_v42 = vld [vmem:[%s7678_s7 + $0x30] sm:$0xff]  ;;  %v4298_v15 = vld [vmem:[%s7678_s7 + $0x38] sm:$0xff]  ;;  %v5439_v50 = vld [vmem:[%s7679_s8] ss:$0 sm:$0xff] }
0x450e   : > { %6256 = vmatprep.subr.bf16.mxu0 %v6451_v46  ;;  %6014 = vmatprep.mubr.msk.f32.mxu1 %vm6452_vm11, %v6453_v51  ;;  %v6263_v43 = vpack.c.bf16 %v4298_v15, %v4297_v42  ;;  %s6454_s21 = smov 64   ;;  %v5441_v60 = vld [vmem:[%s7678_s7 + $0x40] sm:$0xff]  ;;  %v5442_v20 = vld [vmem:[%s7678_s7 + $0x48] sm:$0xff]  ;;  %v5443_v14 = vld [vmem:[%s7678_s7 + $0x50] sm:$0xff]  ;;  %vm4795_vm14 = vcmask 130048   ;;  %s6455_s11 = smov 112  }
0x450f   : > { %v6266_v62 = vpack.c.bf16 %v5442_v20, %v5441_v60  ;;  %v5444_v63 = vld [vmem:[%s7678_s7 + $0x58] sm:$0xff]  ;;  %v4418_v41 = vld [vmem:[#allocation5 + $0x2] sm:$0x3]  ;;  %v5445_v1 = vld [vmem:[%s7678_s7 + $0x60] sm:$0xff]  ;;  %p4273_p0 = scmp.eq.s32.totalorder %s6441_s23, 8  ;;  %s5474_s1 = sshll.u32 %s6441_s23, 1 }
0x4510   : > { %v6269_v0 = vpack.c.bf16 %v5444_v63, %v5443_v14  ;;  %v5446_v2 = vld [vmem:[%s7678_s7 + $0x68] sm:$0xff]  ;;  %v5447_v4 = vld [vmem:[%s7678_s7 + $0x70] sm:$0xff]  ;;  %v5448_v5 = vld [vmem:[%s7678_s7 + $0x78] sm:$0xff]  ;;  %vm5211_vm1 = vcmask 64512   ;;  %s5364_s25 = scalar_lea.vmem %s7682_s13, %s5474_s1  ;;  %s6456_s12 = smov 96  }
0x4511   : > { %6258 = vmatpush3.bf16.msra.mxu0 %v6257_v37  ;;  %6267 = vmatpush3.bf16.msra.mxu1 %v6266_v62  ;;  %v6272_v36 = vpack.c.bf16 %v5446_v2, %v5445_v1  ;;  %v6275_v8 = vpack.c.bf16 %v5448_v5, %v5447_v4  ;;  %v4513_v40 = vld [vmem:[#allocation6 + $0x2] sm:$0x3]  ;;  %v5449_v49 = vld [vmem:[%s7679_s8 + $0x1] ss:$0 sm:$0xff]  ;;  %v5452_v42 = vld [vmem:[%s7678_s7 + $0x88] sm:$0xff]  ;;  %p5177_p1 = scmp.eq.s32.totalorder %s6441_s23, 0 }
0x4512   : > { %6259 = vmatprep.subr.bf16.mxu0 %v6451_v46  ;;  %6268 = vmatprep.subr.bf16.mxu1 %v6451_v46  ;;  %s4277_s18 = scalar_select %p4273_p0, 1, 0 }
0x4513   : > { %s5179_s4 = scalar_select %p5177_p1, 1, 0 }
0x4515   : > { %6261 = vmatpush3.bf16.msra.mxu0 %v6260_v35  ;;  %6270 = vmatpush3.bf16.msra.mxu1 %v6269_v0  ;;  %v5451_v35 = vld [vmem:[%s7678_s7 + $0x80] sm:$0xff] }
0x4516   : > { %6262 = vmatprep.subr.bf16.mxu0 %v6451_v46  ;;  %6271 = vmatprep.subr.bf16.mxu1 %v6451_v46  ;;  %v6278_v15 = vpack.c.bf16 %v5452_v42, %v5451_v35 }
0x4519   : > { %6264 = vmatpush3.bf16.msra.mxu0 %v6263_v43  ;;  %6273 = vmatpush3.bf16.msra.mxu1 %v6272_v36  ;;  %v5453_v43 = vld [vmem:[%s7678_s7 + $0x90] sm:$0xff] }
0x451a   : > { %6277 = vmatprep.subr.bf16.mxu0 %v6451_v46  ;;  %6274 = vmatprep.subr.bf16.mxu1 %v6451_v46 }
0x451d   : > { %6276 = vmatpush3.bf16.msra.mxu1 %v6275_v8 }
0x451e   : > { %6289 = vmatprep.subr.bf16.mxu1 %v6451_v46 }
0x457d   : > { %v4286_v44 = vpop.permute.xlu0 %4285 }
0x457e   : > { %4289 = vst.msk [vmem:[#allocation10] sm:$0x3] %vm4288_vm12, %v4286_v44  ;;  %v5454_v44 = vld [vmem:[%s7678_s7 + $0x98] sm:$0xff] }
0x457f   : > { %v4387_v16 = vpop.permute.xlu1 %4386 }
0x4585   : > { %v4290_v45 = vld [vmem:[#allocation10] sm:$0x3] }
0x4586   : > { %5996 = vmatmul.mubr.msk.f32.vlgmr.msra.gmra.mrb[0].mxu0 %vm4304_vm13, %v4290_v45  ;;  %v6281_v45 = vpack.c.bf16 %v5454_v44, %v5453_v43 }
0x4587   : > { %6033 = vmatprep.mubr.msk.f32.mxu0 %vm6452_vm11, %v6453_v51  ;;  %6279 = vmatpush3.bf16.msra.mxu0 %v6278_v15 }
0x4588   : > { %6280 = vmatprep.subr.bf16.mxu0 %v6451_v46 }
0x458b   : > { %6282 = vmatpush3.bf16.msra.mxu0 %v6281_v45 }
0x458c   : > { %6283 = vmatprep.subr.bf16.mxu0 %v6451_v46 }
0x4659   : > { %v4374_v18 = vpop.f32.mrb[0].mxu0 }
0x465a   : > { %v4375_v53 = vadd.f32 %v5439_v50, %v4374_v18  ;;  %v5997_v17 = vpop.f32.mrb[1].mxu0  ;;  %v4553_v18 = vld [vmem:[#allocation5 + $0x4] sm:$0x3] }
0x465b   : > { %v5456_v17 = vld [vmem:[%s7678_s7 + $0xa8] sm:$0xff] }
0x465c   : > { %v4379_v54 = vmul.f32 0.5, %v4375_v53 }
0x465e   : > { %v4380_v56 = vsel %vm6621_vm9, %v4375_v53, %v4379_v54  ;;  %v5455_v53 = vld [vmem:[%s7678_s7 + $0xa0] sm:$0xff] }
0x465f   : > { %6413 = vtanh.f32 %v4380_v56  ;;  %v6284_v54 = vpack.c.bf16 %v5456_v17, %v5455_v53  ;;  %v5457_v56 = vld [vmem:[%s7678_s7 + $0xb0] sm:$0xff]  ;;  %v7627_v53 = vld [vmem:[#allocation8] sm:$0x3]  ;;  %v4278_v17 = vstv %s4277_s18 }
0x4660   : > { %vm4279_vm15 = vcmp.eq.s32.totalorder %v4278_v17, 1  ;;  %v5209_v17 = vld [vmem:[#allocation2] sm:$0xff] }
0x4661   : > { %6285 = vmatpush3.bf16.msra.mxu0 %v6284_v54 }
0x4662   : > { %6286 = vmatprep.subr.bf16.mxu0 %v6451_v46 }
0x4669   : > { %v6414_v10 = vpop.eup %6413 }
0x466a   : > { %v4382_v38 = vmul.f32 0.5, %v6414_v10 }
0x466c   : > { %v4383_v57 = vadd.f32 0.5, %v4382_v38 }
0x466e   : > { %v4384_v59 = vsel %vm6621_vm9, %v6414_v10, %v4383_v57  ;;  %v5458_v10 = vld [vmem:[%s7678_s7 + $0xb8] sm:$0xff] }
0x466f   : > { %4391 = vrot.lane.b32.xlu0 %v4384_v59, %s6454_s21  ;;  %v4389_v61 = vmul.f32 %v4387_v16, %v4384_v59  ;;  %v6287_v38 = vpack.c.bf16 %v5458_v10, %v5457_v56  ;;  %v4648_v57 = vld [vmem:[#allocation6 + $0x4] sm:$0x3] }
0x4671   : > { %6288 = vmatpush3.bf16.msra.mxu0 %v6287_v38 }
0x4672   : > { %6057 = vmatprep.subr.mxu0 %v6453_v51 }
0x46e1   : > { %v4392_v47 = vpop.permute.xlu0 %4391 }
0x46e2   : > { %v4394_v12 = vmul.f32 %v4392_v47, %v4384_v59 }
0x46e4   : > { %4396 = vrot.lane.b32.xlu1 %v4394_v12, %s6450_s26 }
0x4756   : > { %v4397_v58 = vpop.permute.xlu1 %4396 }
0x4757   : > { %v7475_v22 = vadd.f32 %v4397_v58, %v4389_v61  ;;  %v5459_v58 = vld [vmem:[%s7679_s8 + $0x2] ss:$0 sm:$0xff] }
0x4759   : > { %6415 = vtanh.f32 %v7475_v22 }
0x4763   : > { %v6416_v11 = vpop.eup %6415 }
0x4764   : > { %4402 = vrot.lane.b32.xlu0 %v6416_v11, %s6454_s21 }
0x4768   : > { %4420 = vrot.lane.b32.xlu0 %v4418_v41, %s6450_s26 }
0x476c   : > { %4521 = vrot.lane.b32.xlu0 %v4513_v40, %s6450_s26 }
0x47d6   : > { %v4403_v9 = vpop.permute.xlu0 %4402 }
0x47d7   : > { %v4405_v21 = vmul.f32 %v4403_v9, %v4384_v59  ;;  %v4686_v9 = vld [vmem:[%s7680_s9] sm:$0xff] }
0x47d9   : > { %4407 = vrot.lane.b32.xlu1 %v4405_v21, %s6450_s26  ;;  %v4687_v21 = vld [vmem:[%s7680_s9 + $0x8] sm:$0xff] }
0x47da   : > { %v4421_v23 = vpop.permute.xlu0 %4420 }
0x47de   : > { %v4522_v37 = vpop.permute.xlu0 %4521 }
0x484b   : > { %v4408_v7 = vpop.permute.xlu1 %4407 }
0x484c   : > { %4410 = vst.msk [vmem:[#allocation5] sm:$0x3] %vm4254_vm2, %v4408_v7  ;;  %4416 = vst.msk [vmem:[#allocation10] sm:$0x3] %vm4254_vm2, %v4408_v7  ;;  %v6290_v7 = vpack.c.bf16 %v4687_v21, %v4686_v9 }
0x484d   : > { %4423 = vst.msk [vmem:[#allocation10] sm:$0x3] %vm4288_vm12, %v4421_v23  ;;  %v4688_v23 = vld [vmem:[%s7680_s9 + $0x10] sm:$0xff] }
0x4854   : > { %v4424_v24 = vld [vmem:[#allocation10] sm:$0x3] }
0x4855   : > { %6015 = vmatmul.mubr.msk.f32.vlgmr.msra.gmra.mrb[0].mxu1 %vm4304_vm13, %v4424_v24  ;;  %v4689_v24 = vld [vmem:[%s7680_s9 + $0x18] sm:$0xff] }
0x4856   : > { %6044 = vmatprep.mubr.msk.f32.mxu1 %vm6452_vm11, %v6453_v51  ;;  %6291 = vmatpush3.bf16.msra.mxu1 %v6290_v7 }
0x4857   : > { %6292 = vmatprep.subr.bf16.mxu1 %v6451_v46  ;;  %v4771_v46 = vld [vmem:[#allocation4 + $0x8] sm:$0xff] }
0x4928   : > { %v4508_v25 = vpop.f32.mrb[0].mxu1 }
0x4929   : > { %v4509_v29 = vadd.f32 %v5449_v49, %v4508_v25  ;;  %v6016_v48 = vpop.f32.mrb[1].mxu1  ;;  %v6293_v49 = vpack.c.bf16 %v4689_v24, %v4688_v23 }
0x492b   : > { %v4514_v26 = vmul.f32 0.5, %v4509_v29  ;;  %6294 = vmatpush3.bf16.msra.mxu1 %v6293_v49 }
0x492c   : > { %6047 = vmatprep.subr.mxu1 %v6453_v51 }
0x492d   : > { %v4515_v6 = vsel %vm6621_vm9, %v4509_v29, %v4514_v26 }
0x492e   : > { %6417 = vtanh.f32 %v4515_v6  ;;  %v4770_v6 = vld [vmem:[#allocation4] sm:$0xff] }
0x4938   : > { %v6418_v55 = vpop.eup %6417 }
0x4939   : > { %v4517_v27 = vmul.f32 0.5, %v6418_v55 }
0x493b   : > { %v4518_v28 = vadd.f32 0.5, %v4517_v27  ;;  %v5461_v27 = vld [vmem:[%s7681_s10] ss:$0 sm:$0xff] }
0x493d   : > { %v4519_v52 = vsel %vm6621_vm9, %v6418_v55, %v4518_v28 }
0x493e   : > { %4526 = vrot.lane.b32.xlu1 %v4519_v52, %s6454_s21  ;;  %v4524_v32 = vmul.f32 %v4522_v37, %v4519_v52 }
0x49b0   : > { %v4527_v34 = vpop.permute.xlu1 %4526 }
0x49b1   : > { %v4529_v30 = vmul.f32 %v4527_v34, %v4519_v52 }
0x49b3   : > { %4531 = vrot.lane.b32.xlu1 %v4529_v30, %s6450_s26 }
0x4a25   : > { %v4532_v33 = vpop.permute.xlu1 %4531 }
0x4a26   : > { %v7525_v3 = vadd.f32 %v4532_v33, %v4524_v32 }
0x4a28   : > { %6419 = vtanh.f32 %v7525_v3 }
0x4a32   : > { %v6420_v50 = vpop.eup %6419 }
0x4a33   : > { %4537 = vrot.lane.b32.xlu0 %v6420_v50, %s6454_s21  ;;  %v4274_v50 = vld [vmem:[#allocation9] sm:$0x3] }
0x4a37   : > { %4555 = vrot.lane.b32.xlu0 %v4553_v18, %s6450_s26  ;;  %v4275_v18 = vsub.f32 1.0, %v4274_v50 }
0x4a39   : > { %v4276_v54 = vmul.f32 %v4275_v18, %v7627_v53 }
0x4a3b   : > { %4656 = vrot.lane.b32.xlu0 %v4648_v57, %s6450_s26  ;;  %v4280_v38 = vsel %vm4279_vm15, %v4276_v54, %v7627_v53  ;;  %v5366_v54 = vstv %s6441_s23  ;;  %s4271_s23 = sadd.s32 1, %s6441_s23  }
0x4a3c   : > { %vm4946_vm0 = vcmp.gt.f32.partialorder %v4280_v38, 0.5  ;;  %v5180_v38 = vstv %s5179_s4  ;;  %vm5367_vm7 = vcmp.eq.s32.totalorder %v6617_v31, %v5366_v54  ;;  %p4268_p2 = scmp.ge.s32.totalorder %s4271_s23, 9  }
0x4a3d   : > { %vm5181_vm10 = vcmp.eq.s32.totalorder %v5180_v38, 1 }
0x4aa5   : > { %v4538_v59 = vpop.permute.xlu0 %4537 }
0x4aa6   : > { %v4540_v47 = vmul.f32 %v4538_v59, %v4519_v52 }
0x4aa8   : > { %4542 = vrot.lane.b32.xlu1 %v4540_v47, %s6450_s26 }
0x4aa9   : > { %v4556_v12 = vpop.permute.xlu0 %4555 }
0x4aad   : > { %v4657_v4 = vpop.permute.xlu0 %4656 }
0x4b1a   : > { %v4543_v16 = vpop.permute.xlu1 %4542 }
0x4b1b   : > { %4545 = vst.msk [vmem:[#allocation5 + $0x2] sm:$0x3] %vm4254_vm2, %v4543_v16  ;;  %4551 = vst.msk [vmem:[#allocation10] sm:$0x3] %vm4254_vm2, %v4543_v16 }
0x4b1c   : > { %4558 = vst.msk [vmem:[#allocation10] sm:$0x3] %vm4288_vm12, %v4556_v12 }
0x4b23   : > { %v4559_v61 = vld [vmem:[#allocation10] sm:$0x3] }
0x4b24   : > { %6034 = vmatmul.mubr.msk.f32.vlgmr.msra.gmra.mrb[2].mxu0 %vm4304_vm13, %v4559_v61 }
0x4b25   : > { %6059 = vmatprep.mubr.msk.f32.mxu0 %vm6452_vm11, %v6453_v51 }
0x4bf7   : > { %v4643_v60 = vpop.f32.mrb[2].mxu0 }
0x4bf8   : > { %v4644_v20 = vadd.f32 %v5459_v58, %v4643_v60  ;;  %v6035_v62 = vpop.f32.mrb[3].mxu0 }
0x4bfa   : > { %v4649_v14 = vmul.f32 0.5, %v4644_v20 }
0x4bfc   : > { %v4650_v63 = vsel %vm6621_vm9, %v4644_v20, %v4649_v14 }
0x4bfd   : > { %6421 = vtanh.f32 %v4650_v63 }
0x4c07   : > { %v6422_v0 = vpop.eup %6421 }
0x4c08   : > { %v4652_v11 = vmul.f32 0.5, %v6422_v0 }
0x4c0a   : > { %v4653_v41 = vadd.f32 0.5, %v4652_v11 }
0x4c0c   : > { %v4654_v1 = vsel %vm6621_vm9, %v6422_v0, %v4653_v41 }
0x4c0d   : > { %4661 = vrot.lane.b32.xlu1 %v4654_v1, %s6454_s21  ;;  %v4659_v5 = vmul.f32 %v4657_v4, %v4654_v1 }
0x4c7f   : > { %v4662_v2 = vpop.permute.xlu1 %4661 }
0x4c80   : > { %v4664_v36 = vmul.f32 %v4662_v2, %v4654_v1 }
0x4c82   : > { %4666 = vrot.lane.b32.xlu1 %v4664_v36, %s6450_s26 }
0x4cf4   : > { %v4667_v8 = vpop.permute.xlu1 %4666 }
0x4cf5   : > { %v7575_v40 = vadd.f32 %v4667_v8, %v4659_v5 }
0x4cf7   : > { %6423 = vtanh.f32 %v7575_v40 }
0x4d01   : > { %v6424_v25 = vpop.eup %6423 }
0x4d02   : > { %4672 = vrot.lane.b32.xlu0 %v6424_v25, %s6454_s21 }
0x4d06   : > { %5053 = vrot.lane.b32.xlu0 %v4771_v46, %s6455_s11 }
0x4d74   : > { %v4673_v29 = vpop.permute.xlu0 %4672 }
0x4d75   : > { %v4675_v48 = vmul.f32 %v4673_v29, %v4654_v1 }
0x4d77   : > { %4677 = vrot.lane.b32.xlu1 %v4675_v48, %s6450_s26 }
0x4d78   : > { %v5054_v43 = vpop.permute.xlu0 %5053 }
0x4d7b   : > { %4971 = vrot.lane.b32.xlu1 %v4770_v6, %s6455_s11 }
0x4de9   : > { %v4678_v26 = vpop.permute.xlu1 %4677 }
0x4dea   : > { %4680 = vst.msk [vmem:[#allocation5 + $0x4] sm:$0x3] %vm4254_vm2, %v4678_v26  ;;  %6045 = vmatmul.mubr.msk.f32.vlgmr.msra.gmra.mrb[2].mxu1 %vm152_vm5, %v4678_v26 }
0x4deb   : > { %6049 = vmatprep.mubr.msk.f32.mxu1 %vm6452_vm11, %v6453_v51  ;;  %6048 = vmatpush3.xpose.msk.msra.mxu1 %vm4795_vm14, %v4770_v6 }
0x4dec   : > { %6052 = vmatprep.subr.mxu1 %v6453_v51 }
0x4ded   : > { %v4972_v55 = vpop.permute.xlu1 %4971 }
0x4dee   : > { %6058 = vmatpush3.xpose.msk.msra.mxu0 %vm4795_vm14, %v4972_v55 }
0x4def   : > { %6067 = vmatprep.subr.mxu0 %v6453_v51 }
0x4ebd   : > { %v4765_v28 = vpop.f32.mrb[2].mxu1 }
0x4ebe   : > { %v4766_v52 = vadd.f32 %v5461_v27, %v4765_v28  ;;  %v6046_v34 = vpop.f32.mrb[3].mxu1 }
0x4ec0   : > { %v4769_v30 = vmul.f32 0.25, %v4766_v52 }
0x4ec2   : > { %v4779_v37 = vrot.slane %v4769_v30, %v6765_v13 }
0x4ec4   : > { %v4780_v32 = vcombine.high %v4779_v37, %v4779_v37  ;;  %v4787_v33 = vrot.slane %v4779_v37, %v6765_v13 }
0x4ec6   : > { %v4794_v35 = vrot.slane %v4780_v32, %v6765_v13  ;;  %6050 = vmatmul.mubr.msk.f32.vlgmr.msra.gmra.mrb[4].mxu1 %vm4795_vm14, %v4787_v33  ;;  %v4968_v42 = vrot.slane %v4787_v33, %v6769_v19 }
0x4ec7   : > { %6053 = vmatpush3.xpose.msk.msra.mxu1 %vm4795_vm14, %v4771_v46  ;;  %6054 = vmatprep.mubr.msk.f32.mxu1 %vm6452_vm11, %v6453_v51 }
0x4ec8   : > { %4969 = vrot.lane.b32.xlu1 %v4968_v42, %s6455_s11  ;;  %v5050_v15 = vrot.slane %v4794_v35, %v6769_v19  ;;  %6062 = vmatprep.subr.mxu1 %v6453_v51 }
0x4eca   : > { %5051 = vrot.lane.b32.xlu0 %v5050_v15, %s6455_s11  ;;  %6055 = vmatmul.mubr.msk.f32.vlgmr.msra.gmra.mrb[6].mxu1 %vm4795_vm14, %v4794_v35 }
0x4ecb   : > { %6063 = vmatpush3.xpose.msk.msra.mxu1 %vm4795_vm14, %v5054_v43  ;;  %6064 = vmatprep.mubr.msk.f32.mxu1 %vm6452_vm11, %v6453_v51 }
0x4ecc   : > { %6072 = vmatprep.subr.mxu1 %v6453_v51 }
0x4f3a   : > { %v4970_v44 = vpop.permute.xlu1 %4969 }
0x4f3b   : > { %6060 = vmatmul.mubr.msk.f32.vlgmr.msra.gmra.mrb[4].mxu0 %vm4795_vm14, %v4970_v44 }
0x4f3c   : > { %v5052_v45 = vpop.permute.xlu0 %5051  ;;  %6069 = vmatprep.mubr.msk.f32.mxu0 %vm6452_vm11, %v6453_v51  ;;  %6068 = vmatpush3.msra.mxu0 %v5209_v17 }
0x4f3d   : > { %6065 = vmatmul.mubr.msk.f32.vlgmr.msra.gmra.mrb[8].mxu1 %vm4795_vm14, %v5052_v45 }
0x4f3e   : > { %6074 = vmatprep.mubr.msk.f32.mxu1 %vm6452_vm11, %v6453_v51 }
0x4f99   : > { %v4867_v56 = vpop.f32.mrb[4].mxu1 }
0x4f9a   : > { %v6051_v10 = vpop.f32.mrb[5].mxu1 }
0x4f9d   : > { %v4942_v57 = vpop.f32.mrb[6].mxu1 }
0x4f9e   : > { %v4949_v59 = vrot.slane %v4942_v57, 7  ;;  %v6056_v47 = vpop.f32.mrb[7].mxu1 }
0x4fa0   : > { %v4950_v12 = vsel %vm331_vm8, %v4949_v59, %v4867_v56  ;;  %v5368_v59 = vld [vmem:[%s7689_s14] sm:$0x3] }
0x4fa1   : > { %v4952_v16 = vsel %vm4946_vm0, -1e+30, %v4950_v12 }
0x4fa2   : > { %v4953_v61 = vsel %vm4262_vm3, %v4952_v16, -inf }
0x4fa3   : > { %4954 = vmax.xlane.f32.xlu0 %v4953_v61 }
0x500e   : > { %v5043_v58 = vpop.f32.mrb[4].mxu0 }
0x500f   : > { %v6061_v60 = vpop.f32.mrb[5].mxu0 }
0x5010   : > { %v5125_v20 = vpop.f32.mrb[8].mxu1 }
0x5011   : > { %v5131_v62 = vrot.slane %v5125_v20, 7  ;;  %v6066_v14 = vpop.f32.mrb[9].mxu1 }
0x5013   : > { %v5132_v63 = vsel %vm331_vm8, %v5131_v62, %v5043_v58 }
0x5014   : > { %v5134_v0 = vsel %vm4946_vm0, -1e+30, %v5132_v63 }
0x5015   : > { %v5135_v11 = vsel %vm4262_vm3, %v5134_v0, -inf }
0x5016   : > { %5136 = vmax.xlane.f32.xlu1 %v5135_v11 }
0x5030   : > { %v4955_v41 = vpop.xlane.xlu0 %4954 }
0x5031   : > { %v4956_v1 = vsub.f32 %v4952_v16, %v4955_v41 }
0x5033   : > { %v4957_v2 = vmul.f32 1.442695, %v4956_v1 }
0x5035   : > { %6425 = vpow2.f32 %v4957_v2 }
0x503f   : > { %v6426_v36 = vpop.eup %6425 }
0x5040   : > { %v4959_v4 = vsel %vm4262_vm3, %v6426_v36, 0.0 }
0x5041   : > { %4960 = vadd.xlane.f32.xlu0 %v4959_v4 }
0x50a3   : > { %v5137_v5 = vpop.xlane.xlu1 %5136 }
0x50a4   : > { %v5138_v8 = vsub.f32 %v5134_v0, %v5137_v5 }
0x50a6   : > { %v5139_v9 = vmul.f32 1.442695, %v5138_v8 }
0x50a8   : > { %6427 = vpow2.f32 %v5139_v9 }
0x50b2   : > { %v6428_v21 = vpop.eup %6427 }
0x50b3   : > { %v5141_v23 = vsel %vm4262_vm3, %v6428_v21, 0.0 }
0x50b4   : > { %5142 = vadd.xlane.f32.xlu0 %v5141_v23 }
0x50ce   : > { %v4961_v7 = vpop.xlane.xlu0 %4960 }
0x50cf   : > { %6429 = vrcp.f32 %v4961_v7 }
0x50d9   : > { %v6430_v49 = vpop.eup %6429 }
0x50da   : > { %v4963_v29 = vmul.f32 %v6430_v49, %v6426_v36 }
0x5141   : > { %v5143_v24 = vpop.xlane.xlu0 %5142 }
0x5142   : > { %6431 = vrcp.f32 %v5143_v24 }
0x514c   : > { %v6432_v25 = vpop.eup %6431 }
0x514d   : > { %v5145_v48 = vmul.f32 %v6432_v25, %v6428_v21 }
0x514f   : > { %v5146_v26 = vadd.f32 %v5145_v48, %v4963_v29 }
0x5151   : > { %v5147_v6 = vmul.f32 0.5, %v5146_v26 }
0x5153   : > { %v5148_v46 = vmax.f32 %v5147_v6, 1e-09 }
0x5155   : > { %v5149_v55 = vsel %vm4262_vm3, %v5148_v46, 0.0 }
0x5156   : > { %5150 = vadd.xlane.f32.xlu1 %v5149_v55 }
0x51e3   : > { %v5151_v27 = vpop.xlane.xlu1 %5150 }
0x51e4   : > { %6433 = vrcp.f32 %v5151_v27 }
0x51ee   : > { %v6434_v28 = vpop.eup %6433 }
0x51ef   : > { %v5153_v52 = vmul.f32 %v6434_v28, %v5148_v46 }
0x51f1   : > { %v5154_v34 = vsel %vm4262_vm3, %v5153_v52, -inf  ;;  %v5362_v30 = vsel %vm5211_vm1, %v5153_v52, 0.0 }
0x51f2   : > { %5155 = vmax.xlane.f32.xlu0 %v5154_v34  ;;  %5365 = vst [vmem:[%s5364_s25] sm:$0x3] %v5362_v30 }
0x527f   : > { %v5156_v37 = vpop.xlane.xlu0 %5155 }
0x5280   : > { %vm5157_vm4 = vcmp.ge.f32.partialorder %v5153_v52, %v5156_v37 }
0x5281   : > { %v5158_v32 = vsel %vm5157_vm4, %v6617_v31, 8 }
0x5282   : > { %v5159_v33 = vsel %vm4262_vm3, %v5158_v32, 2147483647 }
0x5283   : > { %v5161_v35 = vshra.s32 %v5159_v33, 16  ;;  %v5160_v15 = vand.u32 65535, %v5159_v33 }
0x5285   : > { %v5163_v42 = vcvt.s32.f32 %v5161_v35  ;;  %v5162_v44 = vcvt.s32.f32 %v5160_v15 }
0x5287   : > { %5164 = vmin.xlane.f32.xlu1 %v5163_v42 }
0x5298   : > { %4412 = vrot.lane.b32.xlu1 %v7475_v22, %s6456_s12  ;;  %v5210_v22 = vld [vmem:[#allocation2 + $0x8] sm:$0xff] }
0x5299   : > { %6073 = vmatpush3.msra.mxu1 %v5210_v22 }
0x529c   : > { %4682 = vrot.lane.b32.xlu1 %v7575_v40, %s6456_s12 }
0x5314   : > { %v5165_v43 = vpop.xlane.xlu1 %5164 }
0x5315   : > { %vm5166_vm6 = vcmp.eq.f32.partialorder %v5163_v42, %v5165_v43  ;;  %v5171_v40 = vcvt.f32.s32 %v5165_v43 }
0x5316   : > { %v5167_v45 = vsel %vm5166_vm6, %v5162_v44, inf }
0x5317   : > { %5168 = vmin.xlane.f32.xlu0 %v5167_v45  ;;  %v5172_v10 = vshll.u32 %v5171_v40, 16 }
0x5318   : > { %v4413_v50 = vpop.permute.xlu1 %4412 }
0x5319   : > { %4415 = vst.msk [vmem:[#allocation6] sm:$0x3] %vm4254_vm2, %v4413_v50 }
0x531c   : > { %v4683_v18 = vpop.permute.xlu1 %4682 }
0x531d   : > { %4685 = vst.msk [vmem:[#allocation6 + $0x4] sm:$0x3] %vm4254_vm2, %v4683_v18 }
0x532d   : > { %4547 = vrot.lane.b32.xlu0 %v7525_v3, %s6456_s12  ;;  %v5178_v3 = vld [vmem:[#allocation9] sm:$0x3] }
0x53a4   : > { %v5169_v56 = vpop.xlane.xlu0 %5168 }
0x53a5   : > { %v5170_v57 = vcvt.f32.s32 %v5169_v56 }
0x53a7   : > { %v5173_v47 = vadd.s32 %v5172_v10, %v5170_v57 }
0x53a8   : > { %v4548_v12 = vpop.permute.xlu0 %4547 }
0x53a9   : > { %vm5174_vm11 = vcmp.eq.s32.totalorder %v6617_v31, %v5173_v47  ;;  %v5369_v16 = vsel %vm5367_vm7, %v5173_v47, %v5368_v59  ;;  %4550 = vst.msk [vmem:[#allocation6 + $0x2] sm:$0x3] %vm4254_vm2, %v4548_v12 }
0x53aa   : > { %v5471_v61 = vsel %vm5174_vm11, 1.0, %v6453_v51  ;;  %5370 = vst [vmem:[%s7689_s14] sm:$0x3] %v5369_v16 }
0x53ab   : > { %v5182_v58 = vsel %vm5181_vm10, %v5471_v61, %v5178_v3  ;;  %v5184_v60 = vmax.f32 %v7627_v53, %v5471_v61  ;;  %v5193_v20 = vrot.slane %v5471_v61, %v6765_v13 }
0x53ac   : > { %5183 = vst.msk [vmem:[#allocation9] sm:$0x3] %vm4262_vm3, %v5182_v58 }
0x53ad   : > { %5185 = vst.msk [vmem:[#allocation8] sm:$0x3] %vm4262_vm3, %v5184_v60  ;;  %v5194_v62 = vcombine.high %v5193_v20, %v5193_v20  ;;  %v5201_v14 = vrot.slane %v5193_v20, %v6765_v13 }
0x53af   : > { %v5208_v63 = vrot.slane %v5194_v62, %v6765_v13  ;;  %6070 = vmatmul.mubr.msk.f32.vlgmr.msra.gmra.mrb[6].mxu0 %vm5211_vm1, %v5201_v14 }
0x53b1   : > { %6075 = vmatmul.mubr.msk.f32.vlgmr.msra.gmra.mrb[10].mxu1 %vm5211_vm1, %v5208_v63 }
0x5482   : > { %v5280_v51 = vpop.f32.mrb[6].mxu0  ;;  %4270 = sbr.rel (!%p4268_p2) target bundleno = 17674 (0x450a), region = 98 }
0x5483   : > { %v6071_v0 = vpop.f32.mrb[7].mxu0 }
0x5484   : > { %v5352_v11 = vpop.f32.mrb[10].mxu1 }
0x5485   : > { %v5358_v41 = vrot.slane %v5352_v11, 7  ;;  %v6076_v53 = vpop.f32.mrb[11].mxu1 }
0x5487   : > { %v5359_v1 = vsel %vm331_vm8, %v5358_v41, %v5280_v51 }
0x5488   : > { %5361 = vst.msk [vmem:[#allocation7] sm:$0x3] %vm4254_vm2, %v5359_v1 }

</bundles_post_ra>
